<compile_context>
chip_gen: v6e
topology: v6e:2x2x1
jax: 0.10.0
libtpu: 0.0.40
codegen_flags: <defaults>
</compile_context>

<pallas_src>
import functools

import jax
import jax.numpy as jnp
import numpy as np
from jax import lax
from jax.experimental import pallas as pl
from jax.experimental.pallas import tpu as pltpu

KH = KW = 5
PAD = 2            # 'same' padding for a 5x5 kernel
POOL = 3
BN_EPS = 1e-5
LANES = 128


def _round_up(x, m):
    return (x + m - 1) // m * m


# ---- kernel A: 5x5 conv as in-kernel shifted matmuls + per-image BN partial statistics ----------
def _conv_stats_kernel(xp_ref, w_ref, conv_ref, stats_ref, xw_ref, acc_ref):
    """One grid step = one batch image.

    xp_ref:   (H+4, W+4, Cin) bf16  spatially padded NHWC image (halo included).
    w_ref:    (KH, KW*Cin, Cp) bf16 weights grouped by kernel row (resident across the grid).
    conv_ref: (H, W, Cp)       bf16 conv output block (lane-dense channels).
    stats_ref:(2, Cp)          f32  per-image [sum, sum-of-squares] over pixels.
    xw_ref:   ((H+4)*W, KW*Cin) bf16 VMEM scratch: width-expanded patches, built once and shared
                                     by all KH row taps.
    acc_ref:  (H*W, Cp)        f32  VMEM accumulator for the KH row-grouped MXU dots.
    """
    hp, _, cin = xp_ref.shape
    h, w, cp = conv_ref.shape
    hw = h * w

    # Width im2col into VMEM only: xw[r*W + x, dw*Cin + c] = xpad[r, x + dw, c].
    for dw in range(KW):
        piece = xp_ref[:, pl.ds(dw, w), :]                       # (H+4, W, Cin)
        xw_ref[:, pl.ds(dw * cin, cin)] = piece.reshape(hp * w, cin)

    # 5 row-grouped dots: acc[h*W + x, :] += xw[(h+dh)*W + x, :] @ w[dh].
    # The lhs is a contiguous, sublane-aligned 2D slice of the scratch (start = dh*W).
    for dh in range(KH):
        lhs = xw_ref[pl.ds(dh * w, hw), :]                       # (H*W, KW*Cin) bf16
        contrib = jnp.dot(lhs, w_ref[dh], preferred_element_type=jnp.float32)
        if dh == 0:
            acc_ref[...] = contrib
        else:
            acc_ref[...] += contrib

    acc = acc_ref[...]
    conv_ref[...] = acc.reshape(h, w, cp).astype(conv_ref.dtype)  # bf16 intermediate (halves HBM)
    # Per-image partial BatchNorm stats in f32, rows written separately; summed in the wrapper.
    # TODO(synk): for very large N*H*W switch to centered/Welford partials to avoid
    #             E[x^2]-E[x]^2 cancellation.
    stats_ref[0:1, :] = jnp.sum(acc, axis=0, keepdims=True)
    stats_ref[1:2, :] = jnp.sum(acc * acc, axis=0, keepdims=True)


# ---- kernel B: BN affine + MaxPool2d(3) + ReLU/Tanh, R pool-rows of one image per grid step -----
def _bn_pool_act_kernel(y_ref, a_ref, b_ref, o_ref, rowmax_ref, *, nonlinearity):
    """y_ref: (R*POOL, W, Cp) bf16 conv rows; a/b: (1, Cp) f32 folded BN; o_ref: (R, Wo, Cp) f32."""
    r, wo, cp = o_ref.shape
    w = rowmax_ref.shape[1]
    # BN affine applied once over the whole contiguous block (a/b broadcast along lanes).
    z = y_ref[...].astype(jnp.float32) * a_ref[...] + b_ref[...]  # (R*POOL, W, Cp)
    z = z.reshape(r, POOL, w, cp)
    # Reduce over the 3 pool rows first (contiguous slices, plain VPU maxes) ...
    m = z[:, 0]
    for j in range(1, POOL):
        m = jnp.maximum(m, z[:, j])
    rowmax_ref[...] = m                                           # (R, W, Cp)
    # ... then only 3 strided column reads on the already row-reduced tensor.
    out = rowmax_ref[:, pl.ds(0, wo, stride=POOL), :]
    for dw in range(1, POOL):
        out = jnp.maximum(out, rowmax_ref[:, pl.ds(dw, wo, stride=POOL), :])
    if nonlinearity == "tanh":
        o_ref[...] = jnp.tanh(out)
    else:
        o_ref[...] = jnp.maximum(out, 0.0)


def conv_pool_activation(x_nchw, weight, gamma, beta, *, nonlinearity="relu",
                         pool_rows_per_step=None):
    """x_nchw: (N, Cin, H, W) f32; weight: (Cout, Cin, 5, 5); gamma/beta: (Cout,).
    Returns (N, Cout, H//3, W//3) f32 (MXU operands and the conv intermediate are bf16)."""
    N, Cin, H, W = x_nchw.shape
    Cout = weight.shape[0]
    Ho, Wo = H // POOL, W // POOL
    Cp = _round_up(Cout, LANES)                 # lane-dense output channels
    K = KW * Cin

    # glue: NHWC + 'same' halo, bf16 MXU operands; weights grouped per kernel row, Cout padded.
    xpad = jnp.pad(jnp.transpose(x_nchw, (0, 2, 3, 1)).astype(jnp.bfloat16),
                   ((0, 0), (PAD, PAD), (PAD, PAD), (0, 0)))            # (N, H+4, W+4, Cin)
    wmat = jnp.transpose(weight, (2, 3, 1, 0)).reshape(KH, K, Cout).astype(jnp.bfloat16)
    wmat = jnp.pad(wmat, ((0, 0), (0, 0), (0, Cp - Cout)))              # zero channels are inert

    # ---- kernel A: per-image conv + partial BN stats (fully "parallel" grid -> v7x megacore) ----
    conv, stats = pl.pallas_call(
        _conv_stats_kernel,
        out_shape=(jax.ShapeDtypeStruct((N, H, W, Cp), jnp.bfloat16),
                   jax.ShapeDtypeStruct((N, 2, Cp), jnp.float32)),
        grid=(N,),
        in_specs=[
            pl.BlockSpec((None, H + 2 * PAD, W + 2 * PAD, Cin), lambda n: (n, 0, 0, 0)),
            pl.BlockSpec((KH, K, Cp), lambda n: (0, 0, 0)),
        ],
        out_specs=(
            pl.BlockSpec((None, H, W, Cp), lambda n: (n, 0, 0, 0)),
            pl.BlockSpec((None, 2, Cp), lambda n: (n, 0, 0)),
        ),
        scratch_shapes=[
            pltpu.VMEM(((H + 2 * PAD) * W, K), jnp.bfloat16),
            pltpu.VMEM((H * W, Cp), jnp.float32),
        ],
        compiler_params=pltpu.CompilerParams(dimension_semantics=("parallel",)),
    )(xpad, wmat)

    # ---- fold BatchNorm (batch statistics, biased variance) into one per-channel scale/shift ----
    tot = jnp.sum(stats, axis=0)                      # (2, Cp) f32
    count = jnp.float32(N * H * W)
    mean = tot[0] / count
    var = jnp.maximum(tot[1] / count - mean * mean, 0.0)
    gamma_p = jnp.pad(gamma.astype(jnp.float32), (0, Cp - Cout))
    beta_p = jnp.pad(beta.astype(jnp.float32), (0, Cp - Cout))
    a = gamma_p * lax.rsqrt(var + BN_EPS)
    b = beta_p - mean * a
    a2d = a.reshape(1, Cp)
    b2d = b.reshape(1, Cp)

    # ---- kernel B tiling: R pool-rows per step (whole image here), R | Ho, tile kept modest so
    #      double-buffered blocks stay far under v7x's 32 MiB default scoped VMEM ----
    if pool_rows_per_step is None:
        r = max(1, min(Ho, (1 << 20) // max(1, POOL * W * Cp * 2)))
        while Ho % r:
            r -= 1
    else:
        r = pool_rows_per_step
    assert Ho % r == 0

    pooled = pl.pallas_call(
        functools.partial(_bn_pool_act_kernel, nonlinearity=nonlinearity),
        out_shape=jax.ShapeDtypeStruct((N, Ho, Wo, Cp), jnp.float32),
        grid=(N, Ho // r),
        in_specs=[
            pl.BlockSpec((None, r * POOL, W, Cp), lambda n, i: (n, i, 0, 0)),
            pl.BlockSpec((1, Cp), lambda n, i: (0, 0)),
            pl.BlockSpec((1, Cp), lambda n, i: (0, 0)),
        ],
        out_specs=pl.BlockSpec((None, r, Wo, Cp), lambda n, i: (n, i, 0, 0)),
        scratch_shapes=[pltpu.VMEM((r, W, Cp), jnp.float32)],
        compiler_params=pltpu.CompilerParams(dimension_semantics=("parallel", "parallel")),
    )(conv, a2d, b2d)

    return jnp.transpose(pooled[..., :Cout], (0, 3, 1, 2))        # tiny tensor -> NCHW


def reference(x_nchw, weight, gamma, beta, nonlinearity="relu"):
    """Pure-JAX f32 reference reproducing the PyTorch forward."""
    conv = lax.conv_general_dilated(
        x_nchw.astype(jnp.float32), weight.astype(jnp.float32),
        window_strides=(1, 1), padding="SAME",
        dimension_numbers=("NCHW", "OIHW", "NCHW"))
    mean = jnp.mean(conv, axis=(0, 2, 3), keepdims=True)
    var = jnp.var(conv, axis=(0, 2, 3), keepdims=True)            # biased, like torch BN
    bn = (conv - mean) * lax.rsqrt(var + BN_EPS)
    bn = bn * gamma[None, :, None, None] + beta[None, :, None, None]
    pooled = lax.reduce_window(bn, -jnp.inf, lax.max,
                               (1, 1, POOL, POOL), (1, 1, POOL, POOL), "VALID")
    return jnp.tanh(pooled) if nonlinearity == "tanh" else jnp.maximum(pooled, 0.0)


if __name__ == "__main__":
    key = jax.random.PRNGKey(0)
    k_x, k_w, k_g, k_b = jax.random.split(key, 4)

    N, Cin, Cout, H, W = 2, 4, 8, 16, 16
    x = jax.random.normal(k_x, (N, Cin, H, W), jnp.float32)
    weight = 0.1 * jax.random.normal(k_w, (Cout, Cin, KH, KW), jnp.float32)
    gamma = 1.0 + 0.2 * jax.random.normal(k_g, (Cout,), jnp.float32)
    beta = 0.1 * jax.random.normal(k_b, (Cout,), jnp.float32)

    # relu exercises the whole-image (R=Ho) kernel-B path, tanh the multi-step (R=1) path.
    # Tolerance 3e-2: MXU operands and the conv intermediate are bf16 (f32 accumulation / stats),
    # while the reference is end-to-end f32.
    for nl, r in (("relu", None), ("tanh", 1)):
        out = conv_pool_activation(x, weight, gamma, beta, nonlinearity=nl, pool_rows_per_step=r)
        out = jax.block_until_ready(out)
        assert out.shape == (N, Cout, H // POOL, W // POOL)
        ref = reference(x, weight, gamma, beta, nl)
        np.testing.assert_allclose(np.asarray(out), np.asarray(ref), rtol=3e-2, atol=3e-2)

    print("KERNEL_OK")
</pallas_src>

<mosaic_0001>
module attributes {stable_mosaic.version = 11 : i64} {
  func.func @_conv_stats_kernel(%arg0: i32, %arg1: memref<1x20x20x4xbf16, #tpu.memory_space<vmem>>, %arg2: memref<5x20x128xbf16, #tpu.memory_space<vmem>>, %arg3: memref<1x16x16x128xbf16, #tpu.memory_space<vmem>>, %arg4: memref<1x2x128xf32, #tpu.memory_space<vmem>>, %arg5: memref<320x20xbf16, #tpu.memory_space<vmem>>, %arg6: memref<256x128xf32, #tpu.memory_space<vmem>>) attributes {dimension_semantics = [#tpu.dimension_semantics<parallel>], iteration_bounds = array<i64: 2>, scalar_prefetch = 0 : i64, scratch_operands = 2 : i64, tpu.core_type = #tpu.core_type<tc>, window_params = [{transform_indices = @transform_0, window_bounds = array<i64: 1, 20, 20, 4>}, {pipeline_mode = #tpu.pipeline_mode<synchronous>, transform_indices = @transform_1, window_bounds = array<i64: 5, 20, 128>}, {transform_indices = @transform_2, window_bounds = array<i64: 1, 16, 16, 128>}, {transform_indices = @transform_3, window_bounds = array<i64: 1, 2, 128>}]} {
    %c0 = arith.constant 0 : index
    %c0_0 = arith.constant 0 : index
    %c0_1 = arith.constant 0 : index
    %c0_2 = arith.constant 0 : index
    %0 = vector.load %arg1[%c0, %c0_0, %c0_1, %c0_2] : memref<1x20x20x4xbf16, #tpu.memory_space<vmem>>, vector<1x20x16x4xbf16>
    %1 = vector.shape_cast %0 : vector<1x20x16x4xbf16> to vector<20x16x4xbf16>
    %2 = vector.shape_cast %1 : vector<20x16x4xbf16> to vector<320x4xbf16>
    %c0_3 = arith.constant 0 : index
    %c0_4 = arith.constant 0 : index
    %3 = vector.load %arg5[%c0_3, %c0_4] : memref<320x20xbf16, #tpu.memory_space<vmem>>, vector<320x4xbf16>
    tpu.vector_store %arg5[%c0_3, %c0_4], %2 {strides = array<i32>} : memref<320x20xbf16, #tpu.memory_space<vmem>>, vector<320x4xbf16>,
    %c0_5 = arith.constant 0 : index
    %c0_6 = arith.constant 0 : index
    %c1 = arith.constant 1 : index
    %c0_7 = arith.constant 0 : index
    %4 = vector.load %arg1[%c0_5, %c0_6, %c1, %c0_7] : memref<1x20x20x4xbf16, #tpu.memory_space<vmem>>, vector<1x20x16x4xbf16>
    %5 = vector.shape_cast %4 : vector<1x20x16x4xbf16> to vector<20x16x4xbf16>
    %6 = vector.shape_cast %5 : vector<20x16x4xbf16> to vector<320x4xbf16>
    %c0_8 = arith.constant 0 : index
    %c4 = arith.constant 4 : index
    %7 = vector.load %arg5[%c0_8, %c4] : memref<320x20xbf16, #tpu.memory_space<vmem>>, vector<320x4xbf16>
    tpu.vector_store %arg5[%c0_8, %c4], %6 {strides = array<i32>} : memref<320x20xbf16, #tpu.memory_space<vmem>>, vector<320x4xbf16>,
    %c0_9 = arith.constant 0 : index
    %c0_10 = arith.constant 0 : index
    %c2 = arith.constant 2 : index
    %c0_11 = arith.constant 0 : index
    %8 = vector.load %arg1[%c0_9, %c0_10, %c2, %c0_11] : memref<1x20x20x4xbf16, #tpu.memory_space<vmem>>, vector<1x20x16x4xbf16>
    %9 = vector.shape_cast %8 : vector<1x20x16x4xbf16> to vector<20x16x4xbf16>
    %10 = vector.shape_cast %9 : vector<20x16x4xbf16> to vector<320x4xbf16>
    %c0_12 = arith.constant 0 : index
    %c8 = arith.constant 8 : index
    %11 = vector.load %arg5[%c0_12, %c8] : memref<320x20xbf16, #tpu.memory_space<vmem>>, vector<320x4xbf16>
    tpu.vector_store %arg5[%c0_12, %c8], %10 {strides = array<i32>} : memref<320x20xbf16, #tpu.memory_space<vmem>>, vector<320x4xbf16>,
    %c0_13 = arith.constant 0 : index
    %c0_14 = arith.constant 0 : index
    %c3 = arith.constant 3 : index
    %c0_15 = arith.constant 0 : index
    %12 = vector.load %arg1[%c0_13, %c0_14, %c3, %c0_15] : memref<1x20x20x4xbf16, #tpu.memory_space<vmem>>, vector<1x20x16x4xbf16>
    %13 = vector.shape_cast %12 : vector<1x20x16x4xbf16> to vector<20x16x4xbf16>
    %14 = vector.shape_cast %13 : vector<20x16x4xbf16> to vector<320x4xbf16>
    %c0_16 = arith.constant 0 : index
    %c12 = arith.constant 12 : index
    %15 = vector.load %arg5[%c0_16, %c12] : memref<320x20xbf16, #tpu.memory_space<vmem>>, vector<320x4xbf16>
    tpu.vector_store %arg5[%c0_16, %c12], %14 {strides = array<i32>} : memref<320x20xbf16, #tpu.memory_space<vmem>>, vector<320x4xbf16>,
    %c0_17 = arith.constant 0 : index
    %c0_18 = arith.constant 0 : index
    %c4_19 = arith.constant 4 : index
    %c0_20 = arith.constant 0 : index
    %16 = vector.load %arg1[%c0_17, %c0_18, %c4_19, %c0_20] : memref<1x20x20x4xbf16, #tpu.memory_space<vmem>>, vector<1x20x16x4xbf16>
    %17 = vector.shape_cast %16 : vector<1x20x16x4xbf16> to vector<20x16x4xbf16>
    %18 = vector.shape_cast %17 : vector<20x16x4xbf16> to vector<320x4xbf16>
    %c0_21 = arith.constant 0 : index
    %c16 = arith.constant 16 : index
    %19 = vector.load %arg5[%c0_21, %c16] : memref<320x20xbf16, #tpu.memory_space<vmem>>, vector<320x4xbf16>
    tpu.vector_store %arg5[%c0_21, %c16], %18 {strides = array<i32>} : memref<320x20xbf16, #tpu.memory_space<vmem>>, vector<320x4xbf16>,
    %c0_22 = arith.constant 0 : index
    %c0_23 = arith.constant 0 : index
    %20 = vector.load %arg5[%c0_22, %c0_23] : memref<320x20xbf16, #tpu.memory_space<vmem>>, vector<256x20xbf16>
    %c0_24 = arith.constant 0 : index
    %c0_25 = arith.constant 0 : index
    %c0_26 = arith.constant 0 : index
    %21 = vector.load %arg2[%c0_24, %c0_25, %c0_26] : memref<5x20x128xbf16, #tpu.memory_space<vmem>>, vector<1x20x128xbf16>
    %22 = vector.shape_cast %21 : vector<1x20x128xbf16> to vector<20x128xbf16>
    %cst = arith.constant dense<0.000000e+00> : vector<256x128xf32>
    %23 = tpu.matmul %20, %22, %cst {dimension_numbers = #tpu.dot_dimension_numbers<[1], [0], [0], [1], [0, 0, 1, 1], [], []>} : vector<256x20xbf16>, vector<20x128xbf16>, vector<256x128xf32> -> vector<256x128xf32>
    %c0_27 = arith.constant 0 : index
    %c0_28 = arith.constant 0 : index
    %24 = vector.load %arg6[%c0_27, %c0_28] : memref<256x128xf32, #tpu.memory_space<vmem>>, vector<256x128xf32>
    tpu.vector_store %arg6[%c0_27, %c0_28], %23 {strides = array<i32>} : memref<256x128xf32, #tpu.memory_space<vmem>>, vector<256x128xf32>,
    %c16_29 = arith.constant 16 : index
    %c0_30 = arith.constant 0 : index
    %25 = vector.load %arg5[%c16_29, %c0_30] : memref<320x20xbf16, #tpu.memory_space<vmem>>, vector<256x20xbf16>
    %c1_31 = arith.constant 1 : index
    %c0_32 = arith.constant 0 : index
    %c0_33 = arith.constant 0 : index
    %26 = vector.load %arg2[%c1_31, %c0_32, %c0_33] : memref<5x20x128xbf16, #tpu.memory_space<vmem>>, vector<1x20x128xbf16>
    %27 = vector.shape_cast %26 : vector<1x20x128xbf16> to vector<20x128xbf16>
    %cst_34 = arith.constant dense<0.000000e+00> : vector<256x128xf32>
    %28 = tpu.matmul %25, %27, %cst_34 {dimension_numbers = #tpu.dot_dimension_numbers<[1], [0], [0], [1], [0, 0, 1, 1], [], []>} : vector<256x20xbf16>, vector<20x128xbf16>, vector<256x128xf32> -> vector<256x128xf32>
    %c0_35 = arith.constant 0 : index
    %c0_36 = arith.constant 0 : index
    %29 = vector.load %arg6[%c0_35, %c0_36] : memref<256x128xf32, #tpu.memory_space<vmem>>, vector<256x128xf32>
    %30 = arith.addf %29, %28 : vector<256x128xf32>
    %c0_37 = arith.constant 0 : index
    %c0_38 = arith.constant 0 : index
    %31 = vector.load %arg6[%c0_37, %c0_38] : memref<256x128xf32, #tpu.memory_space<vmem>>, vector<256x128xf32>
    tpu.vector_store %arg6[%c0_37, %c0_38], %30 {strides = array<i32>} : memref<256x128xf32, #tpu.memory_space<vmem>>, vector<256x128xf32>,
    %c32 = arith.constant 32 : index
    %c0_39 = arith.constant 0 : index
    %32 = vector.load %arg5[%c32, %c0_39] : memref<320x20xbf16, #tpu.memory_space<vmem>>, vector<256x20xbf16>
    %c2_40 = arith.constant 2 : index
    %c0_41 = arith.constant 0 : index
    %c0_42 = arith.constant 0 : index
    %33 = vector.load %arg2[%c2_40, %c0_41, %c0_42] : memref<5x20x128xbf16, #tpu.memory_space<vmem>>, vector<1x20x128xbf16>
    %34 = vector.shape_cast %33 : vector<1x20x128xbf16> to vector<20x128xbf16>
    %cst_43 = arith.constant dense<0.000000e+00> : vector<256x128xf32>
    %35 = tpu.matmul %32, %34, %cst_43 {dimension_numbers = #tpu.dot_dimension_numbers<[1], [0], [0], [1], [0, 0, 1, 1], [], []>} : vector<256x20xbf16>, vector<20x128xbf16>, vector<256x128xf32> -> vector<256x128xf32>
    %c0_44 = arith.constant 0 : index
    %c0_45 = arith.constant 0 : index
    %36 = vector.load %arg6[%c0_44, %c0_45] : memref<256x128xf32, #tpu.memory_space<vmem>>, vector<256x128xf32>
    %37 = arith.addf %36, %35 : vector<256x128xf32>
    %c0_46 = arith.constant 0 : index
    %c0_47 = arith.constant 0 : index
    %38 = vector.load %arg6[%c0_46, %c0_47] : memref<256x128xf32, #tpu.memory_space<vmem>>, vector<256x128xf32>
    tpu.vector_store %arg6[%c0_46, %c0_47], %37 {strides = array<i32>} : memref<256x128xf32, #tpu.memory_space<vmem>>, vector<256x128xf32>,
    %c48 = arith.constant 48 : index
    %c0_48 = arith.constant 0 : index
    %39 = vector.load %arg5[%c48, %c0_48] : memref<320x20xbf16, #tpu.memory_space<vmem>>, vector<256x20xbf16>
    %c3_49 = arith.constant 3 : index
    %c0_50 = arith.constant 0 : index
    %c0_51 = arith.constant 0 : index
    %40 = vector.load %arg2[%c3_49, %c0_50, %c0_51] : memref<5x20x128xbf16, #tpu.memory_space<vmem>>, vector<1x20x128xbf16>
    %41 = vector.shape_cast %40 : vector<1x20x128xbf16> to vector<20x128xbf16>
    %cst_52 = arith.constant dense<0.000000e+00> : vector<256x128xf32>
    %42 = tpu.matmul %39, %41, %cst_52 {dimension_numbers = #tpu.dot_dimension_numbers<[1], [0], [0], [1], [0, 0, 1, 1], [], []>} : vector<256x20xbf16>, vector<20x128xbf16>, vector<256x128xf32> -> vector<256x128xf32>
    %c0_53 = arith.constant 0 : index
    %c0_54 = arith.constant 0 : index
    %43 = vector.load %arg6[%c0_53, %c0_54] : memref<256x128xf32, #tpu.memory_space<vmem>>, vector<256x128xf32>
    %44 = arith.addf %43, %42 : vector<256x128xf32>
    %c0_55 = arith.constant 0 : index
    %c0_56 = arith.constant 0 : index
    %45 = vector.load %arg6[%c0_55, %c0_56] : memref<256x128xf32, #tpu.memory_space<vmem>>, vector<256x128xf32>
    tpu.vector_store %arg6[%c0_55, %c0_56], %44 {strides = array<i32>} : memref<256x128xf32, #tpu.memory_space<vmem>>, vector<256x128xf32>,
    %c64 = arith.constant 64 : index
    %c0_57 = arith.constant 0 : index
    %46 = vector.load %arg5[%c64, %c0_57] : memref<320x20xbf16, #tpu.memory_space<vmem>>, vector<256x20xbf16>
    %c4_58 = arith.constant 4 : index
    %c0_59 = arith.constant 0 : index
    %c0_60 = arith.constant 0 : index
    %47 = vector.load %arg2[%c4_58, %c0_59, %c0_60] : memref<5x20x128xbf16, #tpu.memory_space<vmem>>, vector<1x20x128xbf16>
    %48 = vector.shape_cast %47 : vector<1x20x128xbf16> to vector<20x128xbf16>
    %cst_61 = arith.constant dense<0.000000e+00> : vector<256x128xf32>
    %49 = tpu.matmul %46, %48, %cst_61 {dimension_numbers = #tpu.dot_dimension_numbers<[1], [0], [0], [1], [0, 0, 1, 1], [], []>} : vector<256x20xbf16>, vector<20x128xbf16>, vector<256x128xf32> -> vector<256x128xf32>
    %c0_62 = arith.constant 0 : index
    %c0_63 = arith.constant 0 : index
    %50 = vector.load %arg6[%c0_62, %c0_63] : memref<256x128xf32, #tpu.memory_space<vmem>>, vector<256x128xf32>
    %51 = arith.addf %50, %49 : vector<256x128xf32>
    %c0_64 = arith.constant 0 : index
    %c0_65 = arith.constant 0 : index
    %52 = vector.load %arg6[%c0_64, %c0_65] : memref<256x128xf32, #tpu.memory_space<vmem>>, vector<256x128xf32>
    tpu.vector_store %arg6[%c0_64, %c0_65], %51 {strides = array<i32>} : memref<256x128xf32, #tpu.memory_space<vmem>>, vector<256x128xf32>,
    %c0_66 = arith.constant 0 : index
    %c0_67 = arith.constant 0 : index
    %53 = vector.load %arg6[%c0_66, %c0_67] : memref<256x128xf32, #tpu.memory_space<vmem>>, vector<256x128xf32>
    %54 = vector.shape_cast %53 : vector<256x128xf32> to vector<16x16x128xf32>
    %55 = arith.truncf %54 : vector<16x16x128xf32> to vector<16x16x128xbf16>
    %c0_68 = arith.constant 0 : index
    %c0_69 = arith.constant 0 : index
    %c0_70 = arith.constant 0 : index
    %c0_71 = arith.constant 0 : index
    %56 = vector.load %arg3[%c0_68, %c0_69, %c0_70, %c0_71] : memref<1x16x16x128xbf16, #tpu.memory_space<vmem>>, vector<1x16x16x128xbf16>
    %57 = vector.shape_cast %56 : vector<1x16x16x128xbf16> to vector<16x16x128xbf16>
    %58 = vector.shape_cast %55 : vector<16x16x128xbf16> to vector<1x16x16x128xbf16>
    tpu.vector_store %arg3[%c0_68, %c0_69, %c0_70, %c0_71], %58 {strides = array<i32>} : memref<1x16x16x128xbf16, #tpu.memory_space<vmem>>, vector<1x16x16x128xbf16>,
    %cst_72 = arith.constant dense<0.000000e+00> : vector<128xf32>
    %59 = vector.multi_reduction <add>, %53, %cst_72 [0] : vector<256x128xf32> to vector<128xf32>
    %60 = vector.shape_cast %59 : vector<128xf32> to vector<1x128xf32>
    %c0_73 = arith.constant 0 : index
    %c0_74 = arith.constant 0 : index
    %c0_75 = arith.constant 0 : index
    %61 = vector.load %arg4[%c0_73, %c0_74, %c0_75] : memref<1x2x128xf32, #tpu.memory_space<vmem>>, vector<1x1x128xf32>
    %62 = vector.shape_cast %61 : vector<1x1x128xf32> to vector<1x128xf32>
    %63 = vector.shape_cast %60 : vector<1x128xf32> to vector<1x1x128xf32>
    tpu.vector_store %arg4[%c0_73, %c0_74, %c0_75], %63 {strides = array<i32>} : memref<1x2x128xf32, #tpu.memory_space<vmem>>, vector<1x1x128xf32>,
    %64 = arith.mulf %53, %53 : vector<256x128xf32>
    %cst_76 = arith.constant dense<0.000000e+00> : vector<128xf32>
    %65 = vector.multi_reduction <add>, %64, %cst_76 [0] : vector<256x128xf32> to vector<128xf32>
    %66 = vector.shape_cast %65 : vector<128xf32> to vector<1x128xf32>
    %c0_77 = arith.constant 0 : index
    %c1_78 = arith.constant 1 : index
    %c0_79 = arith.constant 0 : index
    %67 = vector.load %arg4[%c0_77, %c1_78, %c0_79] : memref<1x2x128xf32, #tpu.memory_space<vmem>>, vector<1x1x128xf32>
    %68 = vector.shape_cast %67 : vector<1x1x128xf32> to vector<1x128xf32>
    %69 = vector.shape_cast %66 : vector<1x128xf32> to vector<1x1x128xf32>
    tpu.vector_store %arg4[%c0_77, %c1_78, %c0_79], %69 {strides = array<i32>} : memref<1x2x128xf32, #tpu.memory_space<vmem>>, vector<1x1x128xf32>,
    return
  }
  func.func @transform_0(%arg0: i32) -> (i32, i32, i32, i32) {
    %c0_i32 = arith.constant 0 : i32
    %c0_i32_0 = arith.constant 0 : i32
    %c0_i32_1 = arith.constant 0 : i32
    %c0_i32_2 = arith.constant 0 : i32
    return %arg0, %c0_i32, %c0_i32_0, %c0_i32_1 : i32, i32, i32, i32
  }
  func.func @transform_1(%arg0: i32) -> (i32, i32, i32) {
    %c0_i32 = arith.constant 0 : i32
    %c0_i32_0 = arith.constant 0 : i32
    %c0_i32_1 = arith.constant 0 : i32
    %c0_i32_2 = arith.constant 0 : i32
    return %c0_i32, %c0_i32_0, %c0_i32_1 : i32, i32, i32
  }
  func.func @transform_2(%arg0: i32) -> (i32, i32, i32, i32) {
    %c0_i32 = arith.constant 0 : i32
    %c0_i32_0 = arith.constant 0 : i32
    %c0_i32_1 = arith.constant 0 : i32
    %c0_i32_2 = arith.constant 0 : i32
    return %arg0, %c0_i32, %c0_i32_0, %c0_i32_1 : i32, i32, i32, i32
  }
  func.func @transform_3(%arg0: i32) -> (i32, i32, i32) {
    %c0_i32 = arith.constant 0 : i32
    %c0_i32_0 = arith.constant 0 : i32
    %c0_i32_1 = arith.constant 0 : i32
    return %arg0, %c0_i32, %c0_i32_0 : i32, i32, i32
  }
}

</mosaic_0001>

<bundles_post_ra>
// kernel: tpu_custom_call.1
= control target key start
LH: loop header
LB: loop body
LE: loop exit
PB: predicated region body
PF: predicated region fallthrough
CT: control target
= control target key end

     0   :  { %9 = vsyncpa [#allocation5], 0  ;;  %s7742_s0 = inlined_call_operand.vmem [shape: bf16[2,20,20,4], index: 0, kind: input, shape index: {}]   ;;  %s7743_s1 = inlined_call_operand.vmem [shape: bf16[5,20,128], index: 1, kind: input, shape index: {}]   ;;  %s7744_s2 = inlined_call_operand.hbm [shape: bf16[2,16,16,128], index: 2, kind: output, shape index: {0}]   ;;  %s7745_s3 = inlined_call_operand.hbm [shape: f32[2,2,128], index: 3, kind: output, shape index: {1}]  }
   0x1   :  { %11 = vsyncpa [#allocation5 + $0x1], 0 }
   0x2   :  { %12 = vsyncpa [#allocation7], 0 }
   0x3   :  { %14 = vsyncpa [#allocation7 + $0x1], 0  ;;  %s6061_s12 = smov 0   ;;  %s6063_s13 = smov 0  }
   0x4   :  { %s6065_s14 = smov 0   ;;  %s6067_s15 = smov 0  }
   0x5 LB: > { %s6082_s16 = sadd.s32 4294967295, %s6032_s15   ;;  %s5126_s17 = sadd.s32 4294967294, %s6032_s15   ;;  %s6032_s15 = sphi %s6067_s15, %s7827_s15   ;;  %s6028_s14 = sphi %s6065_s14, %s7826_s14   ;;  %s6024_s13 = sphi %s6063_s13, %s7825_s13   ;;  %s6020_s12 = sphi %s6061_s12, %s7824_s12  }
   0x6   : > { %s6086_s18 = sadd.s32 1, %s6032_s15   ;;  %s74_s19 = sadd.s32 1, %s6028_s14 }
   0x7   : > { %s71_s20 = ssub.s32 %s6032_s15, %s6086_s18  ;;  %p84_p0 = scmp.ne.s32.totalorder %s6028_s14, %s6024_s13 }
   0x8   : > { %p72_p1 = scmp.eq.s32.totalorder %s71_s20, 0  ;;  %p85_p2 = scmp.eq.s32.totalorder %s6082_s16, 1 }
   0x9   : > { %p90_p3 = scmp.ne.s32.totalorder %s6024_s13, %s6020_s12  ;;  %p91_p4 = scmp.eq.s32.totalorder %s5126_s17, 1 }
   0xa   : > { %s6097_s21 = scalar_select %p72_p1, %s6028_s14, %s74_s19  }
   0xb   : > { %p6099_p5 = por %p85_p2, %p84_p0  ;;  %p6103_p6 = por %p91_p4, %p90_p3 }
   0xc   : > { %p5129_p7 = scmp.ge.s32.totalorder %s6032_s15, 1  ;;  %p146_p8 = scmp.lt.s32.totalorder %s6032_s15, 3 }
   0xe   : > { %p147_p9 = pnand %p5129_p7, %p146_p8 }
  0x10   : > { %150 = sbr.rel (%p147_p9) target bundleno = 783 (0x30f), region = 28 }
  0x15   : > { %p175_p10 = scmp.lt.s32.totalorder %s6082_s16, 1  ;;  %vm1086_vm0 = vcmask 1042432   ;;  %vm1087_vm1 = vcmask 1046532   ;;  %vm322_vm3 = vsmask.f32 3328  ;;  %s6034_s29 = smov 8  }
  0x16   : > { %vm6111_vm2 = vmor %vm1086_vm0, %vm1087_vm1  ;;  %vm323_vm4 = vsmask.f32 7440  ;;  %vm1450_vm6 = vsmask.f32 2304  ;;  %vm1451_vm7 = vsmask.f32 6416 }
  0x17   : > { %s176_s24 = scalar_select %p175_p10, %s6082_s16, 1  ;;  %vm6146_vm5 = vmor %vm322_vm3, %vm323_vm4  ;;  %vm2294_vm9 = vcmask 1041408   ;;  %vm2295_vm10 = vcmask 1045508   ;;  %vm221_vm12 = vcmask 27648   ;;  %vm925_vm13 = vcmask 60448  }
  0x18   : > { %s6035_s30 = smov 4   ;;  %vm6177_vm8 = vmor %vm1450_vm6, %vm1451_vm7  ;;  %s6036_s4 = smov 12   ;;  %vm1349_vm14 = vcmask 93248   ;;  %vm2133_vm15 = vcmask 126048   ;;  %vm2557_vm0 = vcmask 158848   ;;  %vm2722_vm1 = vcmask 162816  }
  0x19   : > { %s5802_s25 = smul.u32 240, %s176_s24  ;;  %vm6218_vm11 = vmor %vm2294_vm9, %vm2295_vm10  ;;  %s6037_s5 = smov 16  }
  0x1a   : > { %s7565_s9 = sand.u32 1, %s6024_s13   ;;  %s5426_s17 = sshll.u32 %s6082_s16, 11 }
  0x1b   : > { %s6118_s28 = scalar_lea.vmem %s7742_s0, %s5802_s25  ;;  %s5130_s10 = sshll.u32 %s7565_s9, 7 }
  0x1c   : > { %v990_v1 = vld [vmem:[%s6118_s28 + $0x60] sm:$0xe]  ;;  %v991_v2 = vld [vmem:[%s6118_s28 + $0x64] sm:$0xf]  ;;  %v992_v3 = vld [vmem:[%s6118_s28 + $0x68] sm:$0x1]  ;;  %s7677_s25 = scalar_lea.hbm %s7744_s2, %s5426_s17 }
  0x1d   : > { %v5141_v4 = vrot.slane %v990_v1, 9  ;;  %v1147_v5 = vrot.slane %v991_v2, 5  ;;  %v1150_v6 = vrot.slane %v992_v3, 5  ;;  %v993_v7 = vld [vmem:[%s6118_s28 + $0x6c] sm:$0xe]  ;;  %s7583_s11 = scalar_lea.vmem [#allocation4], %s5130_s10 }
  0x1e   : > { %v994_v8 = vld [vmem:[%s6118_s28 + $0x70] sm:$0xf]  ;;  %v5142_v9 = vrot.slane %v993_v7, 9  ;;  %v995_v10 = vld [vmem:[%s6118_s28 + $0x74] sm:$0x1]  ;;  %s5019_s19 = sshll.u32 %s7583_s11, 4  ;;  %s7680_s19 = int_to_ptr.vmem [resolvable:$true] %s5019_s19 }
  0x1f   : > { %v1148_v11 = vsel %vm6111_vm2, %v5141_v4, %v1147_v5  ;;  %v1149_v12 = vrot.slane %v1147_v5, 4  ;;  %v1154_v13 = vrot.slane %v994_v8, 5  ;;  %v1157_v14 = vrot.slane %v995_v10, 5  ;;  %v286_v15 = vld [vmem:[%s6118_s28 + $0x60] sm:$0xf]  ;;  %s5001_s26 = scalar_lea.sflag [#allocation5], %s7565_s9 }
  0x20   : > { %1261 = vrot.lane.b32.xlu0 %v1148_v11, %s6034_s29  ;;  %v287_v16 = vld [vmem:[%s6118_s28 + $0x64] sm:$0xf]  ;;  %v518_v17 = vshrl.u32 %v286_v15, 16  ;;  %v521_v18 = vshll.u32 %v286_v15, 16  ;;  %v289_v19 = vld [vmem:[%s6118_s28 + $0x6c] sm:$0xf] }
  0x21   : > { %v1151_v20 = vsel %vm6111_vm2, %v1149_v12, %v1150_v6  ;;  %v1155_v21 = vsel %vm6111_vm2, %v5142_v9, %v1154_v13  ;;  %v1156_v22 = vrot.slane %v1154_v13, 4  ;;  %v527_v23 = vshll.u32 %v287_v16, 16  ;;  %v290_v24 = vld [vmem:[%s6118_s28 + $0x70] sm:$0xf]  ;;  %v288_v25 = vld [vmem:[%s6118_s28 + $0x68] sm:$0x1] }
  0x22   : > { %1263 = vrot.lane.b32.xlu1 %v1151_v20, %s6034_s29  ;;  %v520_v26 = vrot.slane %v518_v17, 4  ;;  %v523_v27 = vrot.slane %v521_v18, 5  ;;  %v531_v28 = vshrl.u32 %v287_v16, 16  ;;  %v542_v29 = vshrl.u32 %v289_v19, 16  ;;  %v291_v30 = vld [vmem:[%s6118_s28 + $0x74] sm:$0x1] }
  0x23   : > { %v1158_v31 = vsel %vm6111_vm2, %v1156_v22, %v1157_v14  ;;  %v529_v32 = vrot.slane %v527_v23, 5  ;;  %v545_v33 = vshll.u32 %v289_v19, 16  ;;  %v551_v34 = vshll.u32 %v290_v24, 16  ;;  %v263_v35 = vld [vmem:[%s6118_s28 + $0x4] sm:$0xf]  ;;  %s5942_s27 = scalar_lea.vmem %s7680_s19, 2048 }
  0x24   : > { %1265 = vrot.lane.b32.xlu0 %v1155_v21, %s6034_s29  ;;  %v524_v36 = vor.u32 %v523_v27, %v520_v26  ;;  %v544_v37 = vrot.slane %v542_v29, 4  ;;  %v555_v38 = vshrl.u32 %v290_v24, 16  ;;  %v533_v39 = vrot.slane %v531_v28, 4  ;;  %v264_v45 = vld [vmem:[%s6118_s28 + $0x8] sm:$0x1]  ;;  %p5943_p11 = scmp.ne.s32.totalorder %s7680_s19, %s5942_s27  ;;  %s6038_s6 = smov [#allocation4]  }
  0x25   : > { %v547_v41 = vrot.slane %v545_v33, 5  ;;  %v553_v42 = vrot.slane %v551_v34, 5  ;;  %v537_v43 = vshll.u32 %v288_v25, 16  ;;  %v561_v44 = vshll.u32 %v291_v30, 16  ;;  %v262_v50 = vld [vmem:[%s6118_s28] sm:$0xf] }
  0x26   : > { %1267 = vrot.lane.b32.xlu1 %v1158_v31, %s6034_s29  ;;  %v525_v46 = vrot.slane %v524_v36, 4  ;;  %v534_v47 = vor.u32 %v533_v39, %v529_v32  ;;  %v557_v48 = vrot.slane %v555_v38, 4  ;;  %v335_v49 = vshll.u32 %v263_v35, 16  ;;  %v1415_v55 = vld [vmem:[%s6118_s28 + $0x64] sm:$0xf]  ;;  %p5944_p12 = pnand %p5943_p11, %p6099_p5  ;;  %s5946_s7 = sshll.u32 %s6038_s6, 4  ;;  %s5947_s7 = int_to_ptr.vmem [resolvable:$false] %s5946_s7 }
  0x27   : > { %v548_v51 = vor.u32 %v547_v41, %v544_v37  ;;  %v539_v52 = vrot.slane %v537_v43, 5  ;;  %v563_v53 = vrot.slane %v561_v44, 5  ;;  %v339_v54 = vshrl.u32 %v263_v35, 16  ;;  %v1416_v1 = vld [vmem:[%s6118_s28 + $0x68] sm:$0x3]  ;;  %s5948_s8 = scalar_lea.vmem %s5947_s7, 4096  ;;  %p5949_p0 = scmp.lt.s32.totalorder %s7680_s19, %s5947_s7 }
  0x28   : > { %v530_v56 = vsel %vm6146_vm5, %v525_v46, %v529_v32  ;;  %v535_v57 = vrot.slane %v534_v47, 4  ;;  %v558_v58 = vor.u32 %v557_v48, %v553_v42  ;;  %v337_v59 = vrot.slane %v335_v49, 5  ;;  %v1414_v6 = vld [vmem:[%s6118_s28 + $0x60] sm:$0xe]  ;;  %v266_v11 = vld [vmem:[%s6118_s28 + $0x10] sm:$0xf]  ;;  %p5945_p13 = pneg %p5944_p12  ;;  %p5950_p1 = scmp.lt.s32.totalorder %s5948_s8, %s5942_s27 }
  0x29   : > { %837 = vrot.lane.b32.xlu0 %v530_v56, %s6035_s30  ;;  %v549_v60 = vrot.slane %v548_v51, 4  ;;  %v341_v61 = vrot.slane %v339_v54, 4  ;;  %v345_v62 = vshll.u32 %v264_v45, 16  ;;  %v326_v63 = vshrl.u32 %v262_v50, 16  ;;  %v267_v20 = vld [vmem:[%s6118_s28 + $0x14] sm:$0x1] }
  0x2a   : > { %v540_v2 = vsel %vm6146_vm5, %v535_v57, %v539_v52  ;;  %v559_v3 = vrot.slane %v558_v58, 4  ;;  %v329_v4 = vshll.u32 %v262_v50, 16  ;;  %v1687_v5 = vshrl.u32 %v1415_v55, 16  ;;  %v265_v25 = vld [vmem:[%s6118_s28 + $0xc] sm:$0xf]  ;;  %p5951_p2 = por %p5950_p1, %p5949_p0 }
  0x2b   : > { %v554_v7 = vsel %vm6146_vm5, %v549_v60, %v553_v42  ;;  %v342_v8 = vor.u32 %v341_v61, %v337_v59  ;;  %v347_v9 = vrot.slane %v345_v62, 5  ;;  %v328_v10 = vrot.slane %v326_v63, 4  ;;  %v967_v44 = vld [vmem:[%s6118_s28 + $0x4] sm:$0xf]  ;;  %v1418_v45 = vld [vmem:[%s6118_s28 + $0x70] sm:$0xf] }
  0x2c   : > { %841 = vrot.lane.b32.xlu1 %v554_v7, %s6035_s30  ;;  %v564_v12 = vsel %vm6146_vm5, %v559_v3, %v563_v53  ;;  %v331_v13 = vrot.slane %v329_v4, 5  ;;  %v1689_v14 = vrot.slane %v1687_v5, 5  ;;  %v1690_v15 = vshll.u32 %v1415_v55, 16  ;;  %v968_v48 = vld [vmem:[%s6118_s28 + $0x8] sm:$0x1]  ;;  %p5952_p3 = pnand %p5951_p2, %p5945_p13 }
  0x2d   : > { %839 = vrot.lane.b32.xlu0 %v540_v2, %s6035_s30  ;;  %v343_v16 = vrot.slane %v342_v8, 4  ;;  %v1697_v17 = vshrl.u32 %v1416_v1, 16  ;;  %v1700_v18 = vshll.u32 %v1416_v1, 16  ;;  %v1678_v19 = vshrl.u32 %v1414_v6, 16  ;;  %v1419_v49 = vld [vmem:[%s6118_s28 + $0x74] sm:$0x3] }
  0x2e   : > { %v332_v21 = vor.u32 %v331_v13, %v328_v10  ;;  %v1692_v22 = vrot.slane %v1690_v15, 6  ;;  %v1681_v23 = vshll.u32 %v1414_v6, 16  ;;  %v359_v24 = vshll.u32 %v266_v11, 16  ;;  %v966_v53 = vld [vmem:[%s6118_s28] sm:$0xe] }
  0x2f   : > { %v348_v26 = vsel %vm6146_vm5, %v343_v16, %v347_v9  ;;  %v1699_v27 = vrot.slane %v1697_v17, 5  ;;  %v1702_v28 = vrot.slane %v1700_v18, 6  ;;  %v1680_v29 = vrot.slane %v1678_v19, 5  ;;  %v1417_v62 = vld [vmem:[%s6118_s28 + $0x6c] sm:$0xe] }
  0x30   : > { %843 = vrot.lane.b32.xlu1 %v564_v12, %s6035_s30  ;;  %v333_v30 = vrot.slane %v332_v21, 4  ;;  %v1693_v31 = vor.u32 %v1692_v22, %v1689_v14  ;;  %v1683_v32 = vrot.slane %v1681_v23, 6  ;;  %v361_v33 = vrot.slane %v359_v24, 5  ;;  %v2199_v8 = vld [vmem:[%s6118_s28 + $0x64] sm:$0xf] }
  0x31   : > { %v1703_v34 = vor.u32 %v1702_v28, %v1699_v27  ;;  %v363_v35 = vshrl.u32 %v266_v11, 16  ;;  %v369_v36 = vshll.u32 %v267_v20, 16  ;;  %v350_v37 = vshrl.u32 %v265_v25, 16  ;;  %v2200_v16 = vld [vmem:[%s6118_s28 + $0x68] sm:$0x3] }
  0x32   : > { %v338_v38 = vsel %vm6146_vm5, %v333_v30, %v337_v59  ;;  %v1695_v41 = vrot.slane %v1693_v31, 4  ;;  %v1684_v42 = vor.u32 %v1683_v32, %v1680_v29  ;;  %v353_v43 = vshll.u32 %v265_v25, 16  ;;  %v1391_v20 = vld [vmem:[%s6118_s28 + $0x4] sm:$0xf]  ;;  %v2198_v24 = vld [vmem:[%s6118_s28 + $0x60] sm:$0xc] }
  0x33   : > { %805 = vrot.lane.b32.xlu0 %v338_v38, %s6035_s30  ;;  %v365_v46 = vrot.slane %v363_v35, 4  ;;  %v352_v47 = vrot.slane %v350_v37, 4  ;;  %v371_v51 = vrot.slane %v369_v36, 5  ;;  %v1091_v56 = vrot.slane %v967_v44, 5  ;;  %v970_v25 = vld [vmem:[%s6118_s28 + $0x10] sm:$0xf] }
  0x34   : > { %807 = vrot.lane.b32.xlu1 %v348_v26, %s6035_s30  ;;  %v1685_v50 = vrot.slane %v1684_v42, 4  ;;  %v355_v52 = vrot.slane %v353_v43, 5  ;;  %v1704_v54 = vsel %vm6177_vm8, %v1695_v41, %v1703_v34  ;;  %v1715_v57 = vshrl.u32 %v1418_v45, 16  ;;  %v1392_v28 = vld [vmem:[%s6118_s28 + $0x8] sm:$0x3] }
  0x35   : > { %v366_v55 = vor.u32 %v365_v46, %v361_v33  ;;  %v1718_v60 = vshll.u32 %v1418_v45, 16  ;;  %v1725_v61 = vshrl.u32 %v1419_v49, 16  ;;  %v1094_v1 = vrot.slane %v968_v48, 5  ;;  %v1390_v29 = vld [vmem:[%s6118_s28] sm:$0xe] }
  0x36   : > { %v1694_v58 = vsel %vm6177_vm8, %v1685_v50, %v1693_v31  ;;  %v356_v59 = vor.u32 %v355_v52, %v352_v47  ;;  %v5133_v2 = vrot.slane %v966_v53, 9  ;;  %v1717_v3 = vrot.slane %v1715_v57, 5  ;;  %v971_v36 = vld [vmem:[%s6118_s28 + $0x14] sm:$0x1]  ;;  %v1394_v45 = vld [vmem:[%s6118_s28 + $0x10] sm:$0xf] }
  0x37   : > { %2045 = vrot.lane.b32.xlu0 %v1694_v58, %s6036_s4  ;;  %v367_v63 = vrot.slane %v366_v55, 4  ;;  %v1720_v5 = vrot.slane %v1718_v60, 6  ;;  %v1727_v6 = vrot.slane %v1725_v61, 5  ;;  %v1728_v7 = vshll.u32 %v1419_v49, 16  ;;  %v969_v47 = vld [vmem:[%s6118_s28 + $0xc] sm:$0xe] }
  0x38   : > { %2047 = vrot.lane.b32.xlu1 %v1704_v54, %s6036_s4  ;;  %v357_v4 = vrot.slane %v356_v59, 4  ;;  %v1093_v10 = vrot.slane %v1091_v56, 4  ;;  %v1706_v11 = vshrl.u32 %v1417_v62, 16  ;;  %v1709_v12 = vshll.u32 %v1417_v62, 16  ;;  %v1395_v55 = vld [vmem:[%s6118_s28 + $0x14] sm:$0x3] }
  0x39   : > { %v372_v9 = vsel %vm6146_vm5, %v367_v63, %v371_v51  ;;  %v1721_v14 = vor.u32 %v1720_v5, %v1717_v3  ;;  %v1730_v15 = vrot.slane %v1728_v7, 6  ;;  %v2355_v19 = vrot.slane %v2199_v8, 6  ;;  %v1393_v61 = vld [vmem:[%s6118_s28 + $0xc] sm:$0xe]  ;;  %v2202_v3 = vld [vmem:[%s6118_s28 + $0x70] sm:$0xf] }
  0x3a   : > { %v362_v13 = vsel %vm6146_vm5, %v357_v4, %v361_v33  ;;  %v1708_v17 = vrot.slane %v1706_v11, 5  ;;  %v1711_v18 = vrot.slane %v1709_v12, 6  ;;  %v1092_v21 = vsel %vm6111_vm2, %v5133_v2, %v1091_v56 }
  0x3b   : > { %809 = vrot.lane.b32.xlu0 %v362_v13, %s6035_s30  ;;  %v1723_v22 = vrot.slane %v1721_v14, 4  ;;  %v1731_v23 = vor.u32 %v1730_v15, %v1727_v6  ;;  %v1095_v26 = vsel %vm6111_vm2, %v1093_v10, %v1094_v1  ;;  %v2358_v30 = vrot.slane %v2200_v16, 6  ;;  %v2201_v16 = vld [vmem:[%s6118_s28 + $0x6c] sm:$0xc] }
  0x3c   : > { %811 = vrot.lane.b32.xlu1 %v372_v9, %s6035_s30  ;;  %v1712_v27 = vor.u32 %v1711_v18, %v1708_v17  ;;  %v1463_v31 = vshrl.u32 %v1391_v20, 16  ;;  %v1466_v32 = vshll.u32 %v1391_v20, 16  ;;  %v2357_v34 = vrot.slane %v2355_v19, 4 }
  0x3d   : > { %v5161_v35 = vrot.slane %v2198_v24, 10  ;;  %v1098_v37 = vrot.slane %v970_v25, 5  ;;  %v1732_v38 = vsel %vm6177_vm8, %v1723_v22, %v1731_v23  ;;  %v1473_v42 = vshrl.u32 %v1392_v28, 16 }
  0x3e   : > { %v1713_v33 = vrot.slane %v1712_v27, 4  ;;  %v1476_v43 = vshll.u32 %v1392_v28, 16  ;;  %v1454_v44 = vshrl.u32 %v1390_v29, 16  ;;  %v1465_v48 = vrot.slane %v1463_v31, 5  ;;  %v2176_v31 = vld [vmem:[%s6118_s28 + $0x8] sm:$0x3] }
  0x3f   : > { %1229 = vrot.lane.b32.xlu0 %v1092_v21, %s6034_s29  ;;  %v1468_v49 = vrot.slane %v1466_v32, 6  ;;  %v1457_v50 = vshll.u32 %v1390_v29, 16  ;;  %v2359_v52 = vsel %vm6218_vm11, %v2357_v34, %v2358_v30  ;;  %v1101_v53 = vrot.slane %v971_v36, 5  ;;  %v292_v30 = vld [vmem:[%s6118_s28 + $0x78] sm:$0xf] }
  0x40   : > { %1231 = vrot.lane.b32.xlu1 %v1095_v26, %s6034_s29  ;;  %v1722_v46 = vsel %vm6177_vm8, %v1713_v33, %v1721_v14  ;;  %v1456_v51 = vrot.slane %v1454_v44, 5  ;;  %v1491_v56 = vshrl.u32 %v1394_v45, 16  ;;  %v2356_v57 = vsel %vm6218_vm11, %v5161_v35, %v2355_v19  ;;  %v2203_v19 = vld [vmem:[%s6118_s28 + $0x74] sm:$0x3]  ;;  %v2175_v26 = vld [vmem:[%s6118_s28 + $0x4] sm:$0xf] }
  0x41   : > { %v1459_v54 = vrot.slane %v1457_v50, 6  ;;  %v1100_v58 = vrot.slane %v1098_v37, 4  ;;  %v5134_v59 = vrot.slane %v969_v47, 9  ;;  %v1494_v60 = vshll.u32 %v1394_v45, 16  ;;  %v293_v32 = vld [vmem:[%s6118_s28 + $0x7c] sm:$0xf] }
  0x42   : > { %v1469_v62 = vor.u32 %v1468_v49, %v1465_v48  ;;  %v1475_v63 = vrot.slane %v1473_v42, 5  ;;  %v1478_v1 = vrot.slane %v1476_v43, 6  ;;  %v1493_v4 = vrot.slane %v1491_v56, 5  ;;  %v2178_v42 = vld [vmem:[%s6118_s28 + $0x10] sm:$0xf] }
  0x43   : > { %2049 = vrot.lane.b32.xlu0 %v1722_v46, %s6036_s4  ;;  %v1460_v2 = vor.u32 %v1459_v54, %v1456_v51  ;;  %v1501_v5 = vshrl.u32 %v1395_v55, 16  ;;  %v1496_v6 = vrot.slane %v1494_v60, 6  ;;  %v1504_v7 = vshll.u32 %v1395_v55, 16  ;;  %v295_v48 = vld [vmem:[%s6118_s28 + $0x84] sm:$0xf] }
  0x44   : > { %2051 = vrot.lane.b32.xlu1 %v1732_v38, %s6036_s4  ;;  %v1482_v8 = vshrl.u32 %v1393_v61, 16  ;;  %v1485_v9 = vshll.u32 %v1393_v61, 16  ;;  %v1102_v10 = vsel %vm6111_vm2, %v1100_v58, %v1101_v53  ;;  %v1099_v11 = vsel %vm6111_vm2, %v5134_v59, %v1098_v37  ;;  %v2174_v37 = vld [vmem:[%s6118_s28] sm:$0xc]  ;;  %v296_v51 = vld [vmem:[%s6118_s28 + $0x88] sm:$0xf] }
  0x45   : > { %v1461_v12 = vrot.slane %v1460_v2, 4  ;;  %v2362_v13 = vrot.slane %v2202_v3, 6  ;;  %v1471_v14 = vrot.slane %v1469_v62, 4  ;;  %v1479_v15 = vor.u32 %v1478_v1, %v1475_v63  ;;  %v2179_v55 = vld [vmem:[%s6118_s28 + $0x14] sm:$0x3] }
  0x46   : > { %v1484_v17 = vrot.slane %v1482_v8, 5  ;;  %v1487_v18 = vrot.slane %v1485_v9, 6  ;;  %v1497_v20 = vor.u32 %v1496_v6, %v1493_v4  ;;  %v1503_v21 = vrot.slane %v1501_v5, 5  ;;  %v294_v3 = vld [vmem:[%s6118_s28 + $0x80] sm:$0x1] }
  0x47   : > { %2469 = vrot.lane.b32.xlu0 %v2356_v57, %s6037_s5  ;;  %v1506_v22 = vrot.slane %v1504_v7, 6  ;;  %v1470_v24 = vsel %vm6177_vm8, %v1461_v12, %v1469_v62  ;;  %v5162_v25 = vrot.slane %v2201_v16, 10  ;;  %v1480_v27 = vsel %vm6177_vm8, %v1471_v14, %v1479_v15  ;;  %v2177_v57 = vld [vmem:[%s6118_s28 + $0xc] sm:$0xc]  ;;  %v269_v12 = vld [vmem:[%s6118_s28 + $0x1c] sm:$0xf] }
  0x48   : > { %2471 = vrot.lane.b32.xlu1 %v2359_v52, %s6037_s5  ;;  %v1488_v23 = vor.u32 %v1487_v18, %v1484_v17  ;;  %v2364_v28 = vrot.slane %v2362_v13, 4  ;;  %v2365_v29 = vrot.slane %v2203_v19, 6  ;;  %v1499_v33 = vrot.slane %v1497_v20, 4  ;;  %v268_v17 = vld [vmem:[%s6118_s28 + $0x18] sm:$0xf] }
  0x49   : > { %v1507_v34 = vor.u32 %v1506_v22, %v1503_v21  ;;  %v2299_v36 = vrot.slane %v2175_v26, 6  ;;  %v2363_v38 = vsel %vm6218_vm11, %v5162_v25, %v2362_v13  ;;  %v566_v43 = vshrl.u32 %v292_v30, 16  ;;  %v297_v18 = vld [vmem:[%s6118_s28 + $0x8c] sm:$0x1]  ;;  %v997_v21 = vld [vmem:[%s6118_s28 + $0x7c] sm:$0xf] }
  0x4a   : > { %v1489_v35 = vrot.slane %v1488_v23, 4  ;;  %v569_v44 = vshll.u32 %v292_v30, 16  ;;  %v2366_v45 = vsel %vm6218_vm11, %v2364_v28, %v2365_v29  ;;  %v575_v46 = vshll.u32 %v293_v32, 16 }
  0x4b   : > { %1233 = vrot.lane.b32.xlu0 %v1099_v11, %s6034_s29  ;;  %v579_v47 = vshrl.u32 %v293_v32, 16  ;;  %v2302_v49 = vrot.slane %v2176_v31, 6  ;;  %v5153_v50 = vrot.slane %v2174_v37, 10  ;;  %v1508_v52 = vsel %vm6177_vm8, %v1499_v33, %v1507_v34  ;;  %v998_v32 = vld [vmem:[%s6118_s28 + $0x80] sm:$0x1] }
  0x4c   : > { %1235 = vrot.lane.b32.xlu1 %v1102_v10, %s6034_s29  ;;  %v1498_v53 = vsel %vm6177_vm8, %v1489_v35, %v1497_v20  ;;  %v2301_v54 = vrot.slane %v2299_v36, 4  ;;  %v2306_v56 = vrot.slane %v2178_v42, 6  ;;  %v568_v58 = vrot.slane %v566_v43, 4  ;;  %v996_v34 = vld [vmem:[%s6118_s28 + $0x78] sm:$0xe] }
  0x4d   : > { %v571_v59 = vrot.slane %v569_v44, 5  ;;  %v590_v60 = vshrl.u32 %v295_v48, 16  ;;  %v593_v61 = vshll.u32 %v295_v48, 16  ;;  %v577_v62 = vrot.slane %v575_v46, 5  ;;  %v270_v35 = vld [vmem:[%s6118_s28 + $0x20] sm:$0x1] }
  0x4e   : > { %v581_v63 = vrot.slane %v579_v47, 4  ;;  %v599_v1 = vshll.u32 %v296_v51, 16  ;;  %v603_v2 = vshrl.u32 %v296_v51, 16  ;;  %v2300_v4 = vsel %vm6218_vm11, %v5153_v50, %v2299_v36 }
  0x4f   : > { %2013 = vrot.lane.b32.xlu0 %v1470_v24, %s6036_s4  ;;  %v2308_v5 = vrot.slane %v2306_v56, 4  ;;  %v2309_v6 = vrot.slane %v2179_v55, 6  ;;  %v5154_v7 = vrot.slane %v2177_v57, 10  ;;  %v2303_v8 = vsel %vm6218_vm11, %v2301_v54, %v2302_v49  ;;  %v1421_v49 = vld [vmem:[%s6118_s28 + $0x7c] sm:$0xf] }
  0x50   : > { %2015 = vrot.lane.b32.xlu1 %v1480_v27, %s6036_s4  ;;  %v572_v9 = vor.u32 %v571_v59, %v568_v58  ;;  %v592_v10 = vrot.slane %v590_v60, 4  ;;  %v595_v11 = vrot.slane %v593_v61, 5  ;;  %v582_v13 = vor.u32 %v581_v63, %v577_v62  ;;  %v197_v54 = vld [vmem:[%s6118_s28 + $0x60] sm:$0xf] }
  0x51   : > { %v585_v14 = vshll.u32 %v294_v3, 16  ;;  %v6279_v15 = vrot.slane %v599_v1, 5  ;;  %v605_v16 = vrot.slane %v603_v2, 4  ;;  %v2310_v19 = vsel %vm6218_vm11, %v2308_v5, %v2309_v6  ;;  %238 = vst.msk [vmem:[#allocation2 + $0x40] sm:$0xf] %vm221_vm12, %v197_v54 }
  0x52   : > { %v2307_v20 = vsel %vm6218_vm11, %v5154_v7, %v2306_v56  ;;  %v383_v22 = vshll.u32 %v269_v12, 16  ;;  %v387_v23 = vshrl.u32 %v269_v12, 16  ;;  %v573_v24 = vrot.slane %v572_v9, 4  ;;  %v6308_v56 = vld [vmem:[%s6118_s28 + $0x88] sm:$0xf] }
  0x53   : > { %2473 = vrot.lane.b32.xlu0 %v2363_v38, %s6037_s5  ;;  %v596_v25 = vor.u32 %v595_v11, %v592_v10  ;;  %v374_v26 = vshrl.u32 %v268_v17, 16  ;;  %v377_v27 = vshll.u32 %v268_v17, 16  ;;  %v583_v28 = vrot.slane %v582_v13, 4  ;;  %v1422_v61 = vld [vmem:[%s6118_s28 + $0x80] sm:$0x3] }
  0x54   : > { %2475 = vrot.lane.b32.xlu1 %v2366_v45, %s6037_s5  ;;  %v587_v29 = vrot.slane %v585_v14, 5  ;;  %v606_v30 = vor.u32 %v605_v16, %v6279_v15  ;;  %v609_v31 = vshll.u32 %v297_v18, 16  ;;  %v1161_v33 = vrot.slane %v997_v21, 5  ;;  %v1420_v45 = vld [vmem:[%s6118_s28 + $0x78] sm:$0xe] }
  0x55   : > { %v6295_v36 = vrot.slane %v383_v22, 5  ;;  %v389_v37 = vrot.slane %v387_v23, 4  ;;  %v578_v38 = vsel %vm6146_vm5, %v573_v24, %v577_v62  ;;  %v597_v42 = vrot.slane %v596_v25, 4  ;;  %v271_v2 = vld [vmem:[%s6118_s28 + $0x24] sm:$0xf] }
  0x56   : > { %v376_v43 = vrot.slane %v374_v26, 4  ;;  %v379_v44 = vrot.slane %v377_v27, 5  ;;  %v588_v46 = vsel %vm6146_vm5, %v583_v28, %v587_v29  ;;  %v607_v47 = vrot.slane %v606_v30, 4  ;;  %v199_v3 = vld [vmem:[%s6118_s28 + $0x6c] sm:$0xf] }
  0x57   : > { %2017 = vrot.lane.b32.xlu0 %v1498_v53, %s6036_s4  ;;  %v611_v48 = vrot.slane %v609_v31, 5  ;;  %v1163_v50 = vrot.slane %v1161_v33, 4  ;;  %v1164_v51 = vrot.slane %v998_v32, 5  ;;  %v393_v53 = vshll.u32 %v270_v35, 16  ;;  %240 = vst.msk [vmem:[#allocation2 + $0x48] sm:$0xf] %vm221_vm12, %v199_v3 }
  0x58   : > { %2019 = vrot.lane.b32.xlu1 %v1508_v52, %s6036_s4  ;;  %v5143_v52 = vrot.slane %v996_v34, 9  ;;  %v390_v55 = vor.u32 %v389_v37, %v6295_v36  ;;  %v1734_v57 = vshrl.u32 %v1420_v45, 16  ;;  %v1737_v58 = vshll.u32 %v1420_v45, 16  ;;  %v198_v9 = vld [vmem:[%s6118_s28 + $0x64] sm:$0xf] }
  0x59   : > { %v602_v59 = vsel %vm6146_vm5, %v597_v42, %v6279_v15  ;;  %v380_v60 = vor.u32 %v379_v44, %v376_v43  ;;  %v1743_v62 = vshrl.u32 %v1421_v49, 16  ;;  %v612_v63 = vsel %vm6146_vm5, %v607_v47, %v611_v48  ;;  %v1001_v11 = vld [vmem:[%s6118_s28 + $0x8c] sm:$0x1]  ;;  %239 = vst.msk [vmem:[#allocation2 + $0x44] sm:$0xf] %vm221_vm12, %v198_v9 }
  0x5a   : > { %v1746_v1 = vshll.u32 %v1421_v49, 16  ;;  %v1162_v5 = vsel %vm6111_vm2, %v5143_v52, %v1161_v33  ;;  %v395_v6 = vrot.slane %v393_v53, 5  ;;  %v1168_v7 = vrot.slane %v6308_v56, 5  ;;  %v999_v16 = vld [vmem:[%s6118_s28 + $0x84] sm:$0xe] }
  0x5b   : > { %2437 = vrot.lane.b32.xlu0 %v2300_v4, %s6037_s5  ;;  %v1165_v4 = vsel %vm6111_vm2, %v1163_v50, %v1164_v51  ;;  %v391_v10 = vrot.slane %v390_v55, 4  ;;  %v1753_v12 = vshrl.u32 %v1422_v61, 16  ;;  %v1736_v13 = vrot.slane %v1734_v57, 5  ;;  %v200_v24 = vld [vmem:[%s6118_s28 + $0x70] sm:$0xf] }
  0x5c   : > { %2439 = vrot.lane.b32.xlu1 %v2303_v8, %s6037_s5  ;;  %v272_v8 = vld [vmem:[%s6118_s28 + $0x28] sm:$0xf]  ;;  %v1739_v14 = vrot.slane %v1737_v58, 6  ;;  %v381_v15 = vrot.slane %v380_v60, 4  ;;  %v1745_v17 = vrot.slane %v1743_v62, 5  ;;  %v398_v18 = vshrl.u32 %v271_v2, 16 }
  0x5d   : > { %v1756_v21 = vshll.u32 %v1422_v61, 16  ;;  %v407_v22 = vshll.u32 %v272_v8, 16  ;;  %v411_v23 = vshrl.u32 %v272_v8, 16  ;;  %v1171_v25 = vrot.slane %v1001_v11, 5  ;;  %241 = vst.msk [vmem:[#allocation2 + $0x4c] sm:$0xf] %vm221_vm12, %v200_v24 }
  0x5e   : > { %v1170_v26 = vrot.slane %v1168_v7, 4  ;;  %v5144_v27 = vrot.slane %v999_v16, 9  ;;  %v1755_v28 = vrot.slane %v1753_v12, 5  ;;  %v1740_v29 = vor.u32 %v1739_v14, %v1736_v13  ;;  %v1424_v30 = vld [vmem:[%s6118_s28 + $0x88] sm:$0xf] }
  0x5f   : > { %2441 = vrot.lane.b32.xlu0 %v2307_v20, %s6037_s5  ;;  %v1748_v20 = vrot.slane %v1746_v1, 6  ;;  %v396_v31 = vsel %vm6146_vm5, %v391_v10, %v395_v6  ;;  %v386_v32 = vsel %vm6146_vm5, %v381_v15, %v6295_v36  ;;  %v400_v33 = vrot.slane %v398_v18, 4  ;;  %v182_v35 = vld [vmem:[%s6118_s28 + $0x4] sm:$0xf]  ;;  %v181_v37 = vld [vmem:[%s6118_s28] sm:$0xf] }
  0x60   : > { %2443 = vrot.lane.b32.xlu1 %v2310_v19, %s6037_s5  ;;  %v401_v19 = vshll.u32 %v271_v2, 16  ;;  %v1758_v42 = vrot.slane %v1756_v21, 6  ;;  %v409_v43 = vrot.slane %v407_v22, 5  ;;  %v413_v44 = vrot.slane %v411_v23, 4  ;;  %v1423_v45 = vld [vmem:[%s6118_s28 + $0x84] sm:$0xe] }
  0x61   : > { %223 = vst.msk [vmem:[#allocation2 + $0x4] sm:$0xf] %vm221_vm12, %v182_v35  ;;  %222 = vst.msk [vmem:[#allocation2] sm:$0xf] %vm221_vm12, %v181_v37  ;;  %v1169_v36 = vsel %vm6111_vm2, %v5144_v27, %v1168_v7  ;;  %v1741_v47 = vrot.slane %v1740_v29, 4  ;;  %v1771_v48 = vshrl.u32 %v1424_v30, 16  ;;  %v1172_v50 = vsel %vm6111_vm2, %v1170_v26, %v1171_v25 }
  0x62   : > { %v403_v34 = vrot.slane %v401_v19, 5  ;;  %v1774_v49 = vshll.u32 %v1424_v30, 16  ;;  %v1425_v52 = vld [vmem:[%s6118_s28 + $0x8c] sm:$0x3]  ;;  %v1762_v53 = vshrl.u32 %v1423_v45, 16  ;;  %v1765_v54 = vshll.u32 %v1423_v45, 16 }
  0x63   : > { %845 = vrot.lane.b32.xlu0 %v578_v38, %s6035_s30  ;;  %v1749_v38 = vor.u32 %v1748_v20, %v1745_v17  ;;  %v1759_v56 = vor.u32 %v1758_v42, %v1755_v28  ;;  %v414_v57 = vor.u32 %v413_v44, %v409_v43  ;;  %v972_v60 = vld [vmem:[%s6118_s28 + $0x18] sm:$0xe]  ;;  %v1773_v62 = vrot.slane %v1771_v48, 5  ;;  %v184_v2 = vld [vmem:[%s6118_s28 + $0x10] sm:$0xf] }
  0x64   : > { %847 = vrot.lane.b32.xlu1 %v588_v46, %s6035_s30  ;;  %v273_v46 = vld [vmem:[%s6118_s28 + $0x2c] sm:$0x1]  ;;  %v404_v51 = vor.u32 %v403_v34, %v400_v33  ;;  %v1781_v1 = vshrl.u32 %v1425_v52, 16  ;;  %v1767_v6 = vrot.slane %v1765_v54, 6  ;;  %225 = vst.msk [vmem:[#allocation2 + $0xc] sm:$0xf] %vm221_vm12, %v184_v2 }
  0x65   : > { %v1751_v55 = vrot.slane %v1749_v38, 4  ;;  %v417_v58 = vshll.u32 %v273_v46, 16  ;;  %v1750_v61 = vsel %vm6177_vm8, %v1741_v47, %v1749_v38  ;;  %v183_v7 = vld [vmem:[%s6118_s28 + $0xc] sm:$0xf]  ;;  %v415_v9 = vrot.slane %v414_v57, 4 }
  0x66   : > { %v405_v3 = vrot.slane %v404_v51, 4  ;;  %224 = vst.msk [vmem:[#allocation2 + $0x8] sm:$0xf] %vm221_vm12, %v183_v7  ;;  %v974_v12 = vld [vmem:[%s6118_s28 + $0x20] sm:$0x1]  ;;  %v5135_v13 = vrot.slane %v972_v60, 9 }
  0x67   : > { %849 = vrot.lane.b32.xlu0 %v602_v59, %s6035_s30  ;;  %v973_v59 = vld [vmem:[%s6118_s28 + $0x1c] sm:$0xf]  ;;  %v1760_v8 = vsel %vm6177_vm8, %v1751_v55, %v1759_v56  ;;  %v419_v10 = vrot.slane %v417_v58, 5  ;;  %v1783_v16 = vrot.slane %v1781_v1, 5  ;;  %v1108_v22 = vrot.slane %v974_v12, 5 }
  0x68   : > { %851 = vrot.lane.b32.xlu1 %v612_v63, %s6035_s30  ;;  %v1776_v63 = vrot.slane %v1774_v49, 6  ;;  %v1105_v11 = vrot.slane %v973_v59, 5  ;;  %v410_v15 = vsel %vm6146_vm5, %v405_v3, %v409_v43  ;;  %v2205_v19 = vld [vmem:[%s6118_s28 + $0x7c] sm:$0xf]  ;;  %v1396_v23 = vld [vmem:[%s6118_s28 + $0x18] sm:$0xe] }
  0x69   : > { %v420_v20 = vsel %vm6146_vm5, %v415_v9, %v419_v10  ;;  %v1397_v24 = vld [vmem:[%s6118_s28 + $0x1c] sm:$0xf]  ;;  %v2206_v27 = vld [vmem:[%s6118_s28 + $0x80] sm:$0x3]  ;;  %v2369_v28 = vrot.slane %v2205_v19, 6  ;;  %v1510_v33 = vshrl.u32 %v1396_v23, 16 }
  0x6a   : > { %v1777_v14 = vor.u32 %v1776_v63, %v1773_v62  ;;  %v1107_v21 = vrot.slane %v1105_v11, 4  ;;  %v1106_v25 = vsel %vm6111_vm2, %v5135_v13, %v1105_v11  ;;  %v2204_v29 = vld [vmem:[%s6118_s28 + $0x78] sm:$0xc]  ;;  %v1513_v34 = vshll.u32 %v1396_v23, 16  ;;  %v1398_v42 = vld [vmem:[%s6118_s28 + $0x20] sm:$0x3] }
  0x6b   : > { %1269 = vrot.lane.b32.xlu0 %v1162_v5, %s6034_s29  ;;  %v1764_v5 = vrot.slane %v1762_v53, 5  ;;  %v1519_v37 = vshrl.u32 %v1397_v24, 16  ;;  %v1522_v38 = vshll.u32 %v1397_v24, 16  ;;  %v2371_v43 = vrot.slane %v2369_v28, 4  ;;  %v977_v49 = vld [vmem:[%s6118_s28 + $0x2c] sm:$0x1] }
  0x6c   : > { %1271 = vrot.lane.b32.xlu1 %v1165_v4, %s6034_s29  ;;  %v1784_v4 = vshll.u32 %v1425_v52, 16  ;;  %v1779_v26 = vrot.slane %v1777_v14, 4  ;;  %v1109_v35 = vsel %vm6111_vm2, %v1107_v21, %v1108_v22  ;;  %v2372_v44 = vrot.slane %v2206_v27, 6  ;;  %v1399_v52 = vld [vmem:[%s6118_s28 + $0x24] sm:$0xe] }
  0x6d   : > { %v1768_v18 = vor.u32 %v1767_v6, %v1764_v5  ;;  %v5163_v45 = vrot.slane %v2204_v29, 10  ;;  %v1515_v51 = vrot.slane %v1513_v34, 6  ;;  %v975_v53 = vld [vmem:[%s6118_s28 + $0x24] sm:$0xe]  ;;  %v1521_v54 = vrot.slane %v1519_v37, 5 }
  0x6e   : > { %v1786_v17 = vrot.slane %v1784_v4, 6  ;;  %v1524_v55 = vrot.slane %v1522_v38, 6  ;;  %v1529_v56 = vshrl.u32 %v1398_v42, 16  ;;  %v1532_v57 = vshll.u32 %v1398_v42, 16  ;;  %v1401_v60 = vld [vmem:[%s6118_s28 + $0x2c] sm:$0x3] }
  0x6f   : > { %813 = vrot.lane.b32.xlu0 %v386_v32, %s6035_s30  ;;  %v976_v32 = vld [vmem:[%s6118_s28 + $0x28] sm:$0xf]  ;;  %v2370_v59 = vsel %vm6218_vm11, %v5163_v45, %v2369_v28  ;;  %v1538_v62 = vshrl.u32 %v1399_v52, 16  ;;  %v1541_v63 = vshll.u32 %v1399_v52, 16  ;;  %v2373_v1 = vsel %vm6218_vm11, %v2371_v43, %v2372_v44  ;;  %v2207_v23 = vld [vmem:[%s6118_s28 + $0x84] sm:$0xc] }
  0x70   : > { %815 = vrot.lane.b32.xlu1 %v396_v31, %s6035_s30  ;;  %v1787_v30 = vor.u32 %v1786_v17, %v1783_v16  ;;  %v1769_v31 = vrot.slane %v1768_v18, 4  ;;  %v1112_v46 = vrot.slane %v976_v32, 5  ;;  %v1115_v2 = vrot.slane %v977_v49, 5  ;;  %v2208_v9 = vld [vmem:[%s6118_s28 + $0x88] sm:$0xf] }
  0x71   : > { %v5136_v3 = vrot.slane %v975_v53, 9  ;;  %v1525_v6 = vor.u32 %v1524_v55, %v1521_v54  ;;  %v1531_v7 = vrot.slane %v1529_v56, 5  ;;  %v1557_v11 = vshrl.u32 %v1401_v60, 16  ;;  %v6409_v12 = vld [vmem:[%s7743_s1 + $0x8] ss:$0 sps:$4 sm:$0x33]  }
  0x72   : > { %v1788_v47 = vsel %vm6177_vm8, %v1779_v26, %v1787_v30  ;;  %v1778_v48 = vsel %vm6177_vm8, %v1769_v31, %v1777_v14  ;;  %v1114_v5 = vrot.slane %v1112_v46, 4  ;;  %v1560_v14 = vshll.u32 %v1401_v60, 16  ;;  %5797 = vmatprep.subr.msk.bf16.mxu1 %vm2294_vm9, %v6409_v12  ;;  %5796 = vmatprep.subr.msk.bf16.mxu0 %vm2294_vm9, %v6409_v12  ;;  %v2209_v24 = vld [vmem:[%s6118_s28 + $0x8c] sm:$0x3]  ;;  %v2181_v29 = vld [vmem:[%s6118_s28 + $0x1c] sm:$0xf] }
  0x73   : > { %1273 = vrot.lane.b32.xlu0 %v1169_v36, %s6034_s29  ;;  %v1400_v36 = vld [vmem:[%s6118_s28 + $0x28] sm:$0xf]  ;;  %v1543_v16 = vrot.slane %v1541_v63, 6  ;;  %v1113_v17 = vsel %vm6111_vm2, %v5136_v3, %v1112_v46  ;;  %v2376_v22 = vrot.slane %v2208_v9, 6  ;;  %v1559_v26 = vrot.slane %v1557_v11, 5 }
  0x74   : > { %1275 = vrot.lane.b32.xlu1 %v1172_v50, %s6034_s29  ;;  %v1512_v50 = vrot.slane %v1510_v33, 5  ;;  %v1547_v58 = vshrl.u32 %v1400_v36, 16  ;;  %v1116_v19 = vsel %vm6111_vm2, %v1114_v5, %v1115_v2  ;;  %v1562_v27 = vrot.slane %v1560_v14, 6  ;;  %v298_v37 = vld [vmem:[%s6118_s28 + $0x90] sm:$0xf] }
  0x75   : > { %v5164_v31 = vrot.slane %v2207_v23, 10  ;;  %v2378_v33 = vrot.slane %v2376_v22, 4  ;;  %v2379_v34 = vrot.slane %v2209_v24, 6  ;;  %v2313_v38 = vrot.slane %v2181_v29, 6  ;;  %v2180_v42 = vld [vmem:[%s6118_s28 + $0x18] sm:$0xc] }
  0x76   : > { %v1516_v4 = vor.u32 %v1515_v51, %v1512_v50  ;;  %v1549_v10 = vrot.slane %v1547_v58, 5  ;;  %v299_v43 = vld [vmem:[%s6118_s28 + $0x94] sm:$0xf]  ;;  %v1563_v45 = vor.u32 %v1562_v27, %v1559_v26  ;;  %v2184_v49 = vld [vmem:[%s6118_s28 + $0x28] sm:$0xf]  ;;  %v614_v50 = vshrl.u32 %v298_v37, 16 }
  0x77   : > { %2053 = vrot.lane.b32.xlu0 %v1750_v61, %s6036_s4  ;;  %v1550_v61 = vshll.u32 %v1400_v36, 16  ;;  %v202_v36 = vld [vmem:[%s6118_s28 + $0x7c] sm:$0xf]  ;;  %v617_v51 = vshll.u32 %v298_v37, 16  ;;  %v2380_v52 = vsel %vm6218_vm11, %v2378_v33, %v2379_v34  ;;  %v623_v53 = vshll.u32 %v299_v43, 16 }
  0x78   : > { %2055 = vrot.lane.b32.xlu1 %v1760_v8, %s6036_s4  ;;  %v1534_v8 = vrot.slane %v1532_v57, 6  ;;  %v1517_v18 = vrot.slane %v1516_v4, 4  ;;  %243 = vst.msk [vmem:[#allocation2 + $0x54] sm:$0xf] %vm221_vm12, %v202_v36  ;;  %v627_v54 = vshrl.u32 %v299_v43, 16  ;;  %v5155_v58 = vrot.slane %v2180_v42, 10 }
  0x79   : > { %v1552_v13 = vrot.slane %v1550_v61, 6  ;;  %v301_v55 = vld [vmem:[%s6118_s28 + $0x9c] sm:$0xf]  ;;  %v302_v60 = vld [vmem:[%s6118_s28 + $0xa0] sm:$0xf]  ;;  %v2315_v63 = vrot.slane %v2313_v38, 4 }
  0x7a   : > { %v1535_v21 = vor.u32 %v1534_v8, %v1531_v7  ;;  %v1526_v30 = vsel %vm6177_vm8, %v1517_v18, %v1525_v6  ;;  %v2183_v2 = vld [vmem:[%s6118_s28 + $0x24] sm:$0xc]  ;;  %v204_v3 = vld [vmem:[%s6118_s28 + $0x88] sm:$0xf]  ;;  %v616_v5 = vrot.slane %v614_v50, 4  ;;  %v638_v7 = vshrl.u32 %v301_v55, 16 }
  0x7b   : > { %817 = vrot.lane.b32.xlu0 %v410_v15, %s6035_s30  ;;  %v1540_v15 = vrot.slane %v1538_v62, 5  ;;  %v641_v8 = vshll.u32 %v301_v55, 16  ;;  %245 = vst.msk [vmem:[#allocation2 + $0x5c] sm:$0xf] %vm221_vm12, %v204_v3  ;;  %v203_v9 = vld [vmem:[%s6118_s28 + $0x84] sm:$0xf]  ;;  %v2314_v18 = vsel %vm6218_vm11, %v5155_v58, %v2313_v38 }
  0x7c   : > { %819 = vrot.lane.b32.xlu1 %v420_v20, %s6035_s30  ;;  %v1527_v20 = vrot.slane %v1525_v6, 4  ;;  %v619_v6 = vrot.slane %v617_v51, 5  ;;  %v629_v11 = vrot.slane %v627_v54, 4  ;;  %v651_v14 = vshrl.u32 %v302_v60, 16  ;;  %244 = vst.msk [vmem:[#allocation2 + $0x58] sm:$0xf] %vm221_vm12, %v203_v9 }
  0x7d   : > { %v1544_v28 = vor.u32 %v1543_v16, %v1540_v15  ;;  %v5156_v16 = vrot.slane %v2183_v2, 10  ;;  %v640_v24 = vrot.slane %v638_v7, 4  ;;  %v275_v26 = vld [vmem:[%s6118_s28 + $0x34] sm:$0xf]  ;;  %v303_v34 = vld [vmem:[%s6118_s28 + $0xa4] sm:$0x1] }
  0x7e   : > { %v1536_v32 = vsel %vm6177_vm8, %v1527_v20, %v1535_v21  ;;  %v620_v23 = vor.u32 %v619_v6, %v616_v5  ;;  %v186_v37 = vld [vmem:[%s6118_s28 + $0x1c] sm:$0xf]  ;;  %v431_v43 = vshll.u32 %v275_v26, 16  ;;  %v1004_v54 = vld [vmem:[%s6118_s28 + $0x98] sm:$0x1] }
  0x7f   : > { %1237 = vrot.lane.b32.xlu0 %v1106_v25, %s6034_s29  ;;  %v1553_v25 = vor.u32 %v1552_v13, %v1549_v10  ;;  %v1545_v46 = vrot.slane %v1544_v28, 4  ;;  %v6462_v10 = vrot.slane %v623_v53, 5  ;;  %v647_v13 = vshll.u32 %v302_v60, 16  ;;  %227 = vst.msk [vmem:[#allocation2 + $0x14] sm:$0xf] %vm221_vm12, %v186_v37 }
  0x80   : > { %1239 = vrot.lane.b32.xlu1 %v1109_v35, %s6034_s29  ;;  %v2182_v35 = vld [vmem:[%s6118_s28 + $0x20] sm:$0x3]  ;;  %v621_v36 = vrot.slane %v620_v23, 4  ;;  %v1002_v58 = vld [vmem:[%s6118_s28 + $0x90] sm:$0xe]  ;;  %v6510_v60 = vrot.slane %v431_v43, 5 }
  0x81   : > { %v1555_v44 = vrot.slane %v1553_v25, 4  ;;  %v2316_v57 = vrot.slane %v2182_v35, 6  ;;  %v1554_v62 = vsel %vm6177_vm8, %v1545_v46, %v1553_v25  ;;  %v643_v25 = vrot.slane %v641_v8, 5  ;;  %v6488_v35 = vld [vmem:[%s6118_s28 + $0x94] sm:$0xf] }
  0x82   : > { %v630_v27 = vor.u32 %v629_v11, %v6462_v10  ;;  %v6478_v29 = vrot.slane %v647_v13, 5  ;;  %v185_v46 = vld [vmem:[%s6118_s28 + $0x18] sm:$0xf]  ;;  %v1175_v55 = vrot.slane %v6488_v35, 5  ;;  %v1426_v2 = vld [vmem:[%s6118_s28 + $0x90] sm:$0xe] }
  0x83   : > { %2057 = vrot.lane.b32.xlu0 %v1778_v48, %s6036_s4  ;;  %v2377_v48 = vsel %vm6218_vm11, %v5164_v31, %v2376_v22  ;;  %v1564_v61 = vsel %vm6177_vm8, %v1555_v44, %v1563_v45  ;;  %v2317_v22 = vsel %vm6218_vm11, %v2315_v63, %v2316_v57  ;;  %v274_v31 = vld [vmem:[%s6118_s28 + $0x30] sm:$0xf]  ;;  %v435_v44 = vshrl.u32 %v275_v26, 16  ;;  %226 = vst.msk [vmem:[#allocation2 + $0x10] sm:$0xf] %vm221_vm12, %v185_v46 }
  0x84   : > { %2059 = vrot.lane.b32.xlu1 %v1788_v47, %s6036_s4  ;;  %v201_v47 = vld [vmem:[%s6118_s28 + $0x78] sm:$0xf]  ;;  %v2773_v45 = vsel %vm2294_vm9, %v6409_v12, 0  ;;  %v631_v50 = vrot.slane %v630_v27, 4  ;;  %v1427_v7 = vld [vmem:[%s6118_s28 + $0x94] sm:$0xf] }
  0x85   : > { %242 = vst.msk [vmem:[#allocation2 + $0x50] sm:$0xf] %vm221_vm12, %v201_v47  ;;  %v644_v47 = vor.u32 %v643_v25, %v640_v24  ;;  %5794 = vmatpush3.bf16.msra.mxu1 %v2773_v45  ;;  %5613 = vmatpush3.bf16.msra.mxu0 %v2773_v45  ;;  %v1177_v9 = vrot.slane %v1175_v55, 4  ;;  %v5145_v11 = vrot.slane %v1002_v58, 9  ;;  %v187_v23 = vld [vmem:[%s6118_s28 + $0x24] sm:$0xf] }
  0x86   : > { %v1802_v26 = vshll.u32 %v1427_v7, 16  ;;  %v277_v27 = vld [vmem:[%s6118_s28 + $0x3c] sm:$0xf]  ;;  %228 = vst.msk [vmem:[#allocation2 + $0x18] sm:$0xf] %vm221_vm12, %v187_v23 }
  0x87   : > { %2477 = vrot.lane.b32.xlu0 %v2370_v59, %s6037_s5  ;;  %v2185_v59 = vld [vmem:[%s6118_s28 + $0x2c] sm:$0x3]  ;;  %v1005_v43 = vld [vmem:[%s6118_s28 + $0x9c] sm:$0xe]  ;;  %v446_v45 = vshrl.u32 %v277_v27, 16  ;;  %v449_v46 = vshll.u32 %v277_v27, 16 }
  0x88   : > { %2479 = vrot.lane.b32.xlu1 %v2373_v1, %s6037_s5  ;;  %v2320_v1 = vrot.slane %v2184_v49, 6  ;;  %v2323_v20 = vrot.slane %v2185_v59, 6  ;;  %v425_v49 = vshll.u32 %v274_v31, 16  ;;  %v276_v59 = vld [vmem:[%s6118_s28 + $0x38] sm:$0x1] }
  0x89   : > { %v441_v13 = vshll.u32 %v276_v59, 16  ;;  %v448_v59 = vrot.slane %v446_v45, 4  ;;  %v979_v23 = vld [vmem:[%s6118_s28 + $0x34] sm:$0xf] }
  0x8a   : > { %v2321_v33 = vsel %vm6218_vm11, %v5156_v16, %v2320_v1  ;;  %v1428_v16 = vld [vmem:[%s6118_s28 + $0x98] sm:$0x3] }
  0x8b   : > { %1241 = vrot.lane.b32.xlu0 %v1113_v17, %s6034_s29  ;;  %v300_v17 = vld [vmem:[%s6118_s28 + $0x98] sm:$0x1]  ;;  %v1809_v35 = vshrl.u32 %v1428_v16, 16 }
  0x8c   : > { %1243 = vrot.lane.b32.xlu1 %v1116_v19, %s6034_s29  ;;  %v2322_v19 = vrot.slane %v2320_v1, 4  ;;  %v633_v28 = vshll.u32 %v300_v17, 16  ;;  %v427_v1 = vrot.slane %v425_v49, 5  ;;  %v1793_v17 = vshll.u32 %v1426_v2, 16 }
  0x8e   : > { %v2324_v42 = vsel %vm6218_vm11, %v2322_v19, %v2323_v20  ;;  %v635_v51 = vrot.slane %v633_v28, 5  ;;  %v1799_v20 = vshrl.u32 %v1427_v7, 16  ;;  %v279_v7 = vld [vmem:[%s6118_s28 + $0x44] sm:$0x1] }
  0x8f   : > { %2021 = vrot.lane.b32.xlu0 %v1526_v30, %s6036_s4  ;;  %v653_v30 = vrot.slane %v651_v14, 4 }
  0x90   : > { %2023 = vrot.lane.b32.xlu1 %v1536_v32, %s6036_s4  ;;  %v5854_v32 = vld [vmem:[%s7743_s1] sm:$0xff]   ;;  %v636_v3 = vsel %vm6146_vm5, %v631_v50, %v635_v51 }
  0x91   : > { %v654_v12 = vor.u32 %v653_v30, %v6478_v29  ;;  %5793 = vmatprep.subr.bf16.mxu1 %v5854_v32  ;;  %5614 = vmatprep.subr.bf16.mxu0 %v5854_v32  ;;  %v443_v30 = vrot.slane %v441_v13, 5 }
  0x92   : > { %v6446_v56 = vpop.permute.xlu0 %1261  ;;  %5795 = vmatpush3.bf16.msra.mxu1 %v5854_v32  ;;  %5615 = vmatpush3.bf16.msra.mxu0 %v5854_v32  ;;  %v278_v32 = vld [vmem:[%s6118_s28 + $0x40] sm:$0xf] }
  0x93   : > { %2481 = vrot.lane.b32.xlu0 %v2377_v48, %s6037_s5  ;;  %v422_v48 = vshrl.u32 %v274_v31, 16  ;;  %v655_v5 = vrot.slane %v654_v12, 4  ;;  %v455_v49 = vshll.u32 %v278_v32, 16  ;;  %v459_v50 = vshrl.u32 %v278_v32, 16 }
  0x94   : > { %2483 = vrot.lane.b32.xlu1 %v2380_v52, %s6037_s5  ;;  %v6458_v4 = vpop.permute.xlu1 %1263  ;;  %v657_v52 = vshll.u32 %v303_v34, 16  ;;  %v1007_v34 = vld [vmem:[%s6118_s28 + $0xa4] sm:$0x1] }
  0x95   : > { %v424_v63 = vrot.slane %v422_v48, 4  ;;  %v1812_v48 = vshll.u32 %v1428_v16, 16  ;;  %v1185_v12 = vrot.slane %v1007_v34, 5 }
  0x96   : > { %v6465_v15 = vpop.permute.xlu0 %1265  ;;  %v659_v6 = vrot.slane %v657_v52, 5 }
  0x97   : > { %2025 = vrot.lane.b32.xlu0 %v1554_v62, %s6036_s4  ;;  %v645_v62 = vrot.slane %v644_v47, 4  ;;  %v428_v19 = vor.u32 %v427_v1, %v424_v63  ;;  %v1804_v47 = vrot.slane %v1802_v26, 6  ;;  %v1814_v1 = vrot.slane %v1812_v48, 6  ;;  %v6602_v48 = vld [vmem:[%s6118_s28 + $0x94] sm:$0xf] }
  0x98   : > { %2027 = vrot.lane.b32.xlu1 %v1564_v61, %s6036_s4  ;;  %v6472_v21 = vpop.permute.xlu1 %1267  ;;  %v437_v61 = vrot.slane %v435_v44, 4  ;;  %v660_v25 = vsel %vm6146_vm5, %v655_v5, %v659_v6  ;;  %v1801_v44 = vrot.slane %v1799_v20, 5  ;;  %v1429_v5 = vld [vmem:[%s6118_s28 + $0x9c] sm:$0xe]  ;;  %v465_v20 = vshll.u32 %v279_v7, 16 }
  0x99   : > { %v1821_v16 = vshll.u32 %v1429_v5, 16 }
  0x9a   : > { %v438_v14 = vor.u32 %v437_v61, %v6510_v60  ;;  %v451_v61 = vrot.slane %v449_v46, 5  ;;  %v1805_v63 = vor.u32 %v1804_v47, %v1801_v44 }
  0x9b   : > { %v838_v38 = vpop.permute.xlu0 %837  ;;  %2445 = vrot.lane.b32.xlu0 %v2314_v18, %s6037_s5  ;;  %v650_v18 = vsel %vm6146_vm5, %v645_v62, %v6478_v29  ;;  %v1176_v29 = vsel %vm6111_vm2, %v5145_v11, %v1175_v55 }
  0x9c   : > { %942 = vst.msk [vmem:[#allocation2 + $0x40] sm:$0xf] %vm925_vm13, %v838_v38  ;;  %2447 = vrot.lane.b32.xlu1 %v2317_v22, %s6037_s5  ;;  %v188_v22 = vld [vmem:[%s6118_s28 + $0x28] sm:$0xf]  ;;  %v1795_v38 = vrot.slane %v1793_v17, 6  ;;  %v452_v13 = vor.u32 %v451_v61, %v448_v59  ;;  %v1807_v17 = vrot.slane %v1805_v63, 4 }
  0x9d   : > { %1366 = vst.msk [vmem:[#allocation2 + $0x40] sm:$0xf] %vm1349_vm14, %v6446_v56  ;;  %v626_v56 = vsel %vm6146_vm5, %v621_v36, %v6462_v10  ;;  %v1178_v10 = vrot.slane %v1004_v54, 5  ;;  %v1811_v54 = vrot.slane %v1809_v35, 5  ;;  %v467_v35 = vrot.slane %v465_v20, 5 }
  0x9e   : > { %v842_v53 = vpop.permute.xlu1 %841  ;;  %229 = vst.msk [vmem:[#allocation2 + $0x1c] sm:$0xf] %vm221_vm12, %v188_v22  ;;  %v2383_v59 = vrot.slane %v6602_v48, 6  ;;  %v2210_v61 = vld [vmem:[%s6118_s28 + $0x90] sm:$0xc] }
  0x9f   : > { %944 = vst.msk [vmem:[#allocation2 + $0x48] sm:$0xf] %vm925_vm13, %v842_v53  ;;  %v840_v57 = vpop.permute.xlu0 %839  ;;  %2449 = vrot.lane.b32.xlu0 %v2321_v33, %s6037_s5  ;;  %v439_v33 = vrot.slane %v438_v14, 4  ;;  %v5146_v53 = vrot.slane %v1005_v43, 9  ;;  %v1431_v14 = vld [vmem:[%s6118_s28 + $0xa4] sm:$0x3] }
  0xa0   : > { %943 = vst.msk [vmem:[#allocation2 + $0x44] sm:$0xf] %vm925_vm13, %v840_v57  ;;  %2451 = vrot.lane.b32.xlu1 %v2324_v42, %s6037_s5  ;;  %v429_v42 = vrot.slane %v428_v19, 4  ;;  %v1837_v27 = vshrl.u32 %v1431_v14, 16 }
  0xa1   : > { %1368 = vst.msk [vmem:[#allocation2 + $0x48] sm:$0xf] %vm1349_vm14, %v6465_v15  ;;  %1367 = vst.msk [vmem:[#allocation2 + $0x44] sm:$0xf] %vm1349_vm14, %v6458_v4  ;;  %v6529_v15 = vld [vmem:[%s6118_s28 + $0xa0] sm:$0xf]  ;;  %v444_v57 = vsel %vm6146_vm5, %v439_v33, %v443_v30 }
  0xa2   : > { %v844_v8 = vpop.permute.xlu1 %843  ;;  %v1790_v4 = vshrl.u32 %v1426_v2, 16  ;;  %v1182_v31 = vrot.slane %v6529_v15, 5  ;;  %v434_v58 = vsel %vm6146_vm5, %v429_v42, %v6510_v60  ;;  %v6567_v2 = vrot.slane %v455_v49, 5  ;;  %v980_v42 = vld [vmem:[%s6118_s28 + $0x38] sm:$0x1] }
  0xa3   : > { %945 = vst.msk [vmem:[#allocation2 + $0x4c] sm:$0xf] %vm925_vm13, %v844_v8  ;;  %853 = vrot.lane.b32.xlu0 %v626_v56, %s6035_s30  ;;  %v1430_v56 = vld [vmem:[%s6118_s28 + $0xa0] sm:$0xf]  ;;  %v1818_v15 = vshrl.u32 %v1429_v5, 16  ;;  %v1839_v46 = vrot.slane %v1837_v27, 5 }
  0xa4   : > { %855 = vrot.lane.b32.xlu1 %v636_v3, %s6035_s30  ;;  %1369 = vst.msk [vmem:[#allocation2 + $0x4c] sm:$0xf] %vm1349_vm14, %v6472_v21  ;;  %v1179_v21 = vsel %vm6111_vm2, %v1177_v9, %v1178_v10  ;;  %v1792_v37 = vrot.slane %v1790_v4, 5  ;;  %v1184_v52 = vrot.slane %v1182_v31, 4  ;;  %v461_v3 = vrot.slane %v459_v50, 4 }
  0xa5   : > { %v806_v24 = vpop.permute.xlu0 %805  ;;  %v1183_v60 = vsel %vm6111_vm2, %v5146_v53, %v1182_v31  ;;  %v1827_v9 = vshrl.u32 %v1430_v56, 16  ;;  %v1830_v10 = vshll.u32 %v1430_v56, 16  ;;  %v1820_v30 = vrot.slane %v1818_v15, 5 }
  0xa6   : > { %v808_v28 = vpop.permute.xlu1 %807  ;;  %926 = vst.msk [vmem:[#allocation2] sm:$0xf] %vm925_vm13, %v806_v24  ;;  %v1796_v55 = vor.u32 %v1795_v38, %v1792_v37  ;;  %v1186_v11 = vsel %vm6111_vm2, %v1184_v52, %v1185_v12  ;;  %v462_v19 = vor.u32 %v461_v3, %v6567_v2  ;;  %v1823_v31 = vrot.slane %v1821_v16, 6  ;;  %v1402_v52 = vld [vmem:[%s6118_s28 + $0x30] sm:$0xe] }
  0xa7   : > { %927 = vst.msk [vmem:[#allocation2 + $0x4] sm:$0xf] %vm925_vm13, %v808_v28  ;;  %857 = vrot.lane.b32.xlu0 %v650_v18, %s6035_s30  ;;  %v1815_v18 = vor.u32 %v1814_v1, %v1811_v54  ;;  %v1832_v26 = vrot.slane %v1830_v10, 6  ;;  %v453_v28 = vrot.slane %v452_v13, 4  ;;  %v1119_v37 = vrot.slane %v979_v23, 5 }
  0xa8   : > { %859 = vrot.lane.b32.xlu1 %v660_v25, %s6035_s30  ;;  %v1797_v8 = vrot.slane %v1796_v55, 4  ;;  %v1829_v25 = vrot.slane %v1827_v9, 5  ;;  %v463_v34 = vrot.slane %v462_v19, 4  ;;  %v1824_v47 = vor.u32 %v1823_v31, %v1820_v30  ;;  %v1403_v54 = vld [vmem:[%s6118_s28 + $0x34] sm:$0xf] }
  0xa9   : > { %v2046_v36 = vpop.permute.xlu0 %2045  ;;  %v1816_v33 = vsel %vm6177_vm8, %v1807_v17, %v1815_v18  ;;  %v458_v45 = vsel %vm6146_vm5, %v453_v28, %v6567_v2  ;;  %v1122_v12 = vrot.slane %v980_v42, 5  ;;  %v1566_v1 = vshrl.u32 %v1402_v52, 16  ;;  %v1404_v10 = vld [vmem:[%s6118_s28 + $0x38] sm:$0x3]  ;;  %v1405_v23 = vld [vmem:[%s6118_s28 + $0x3c] sm:$0xe] }
  0xaa   : > { %v2048_v51 = vpop.permute.xlu1 %2047  ;;  %2150 = vst.msk [vmem:[#allocation2 + $0x40] sm:$0xf] %vm2133_vm15, %v2046_v36  ;;  %v1806_v24 = vsel %vm6177_vm8, %v1797_v8, %v1805_v63  ;;  %v6595_v44 = vor.u32 %v1832_v26, %v1829_v25  ;;  %v468_v50 = vsel %vm6146_vm5, %v463_v34, %v467_v35  ;;  %v6619_v63 = vld [vmem:[%s6118_s28 + $0x40] sm:$0xf]  ;;  %v1569_v2 = vshll.u32 %v1402_v52, 16 }
  0xab   : > { %2151 = vst.msk [vmem:[#allocation2 + $0x44] sm:$0xf] %vm2133_vm15, %v2048_v51  ;;  %1277 = vrot.lane.b32.xlu0 %v1176_v29, %s6034_s29  ;;  %v1840_v29 = vshll.u32 %v1431_v14, 16  ;;  %v1121_v51 = vrot.slane %v1119_v37, 4  ;;  %v1575_v7 = vshrl.u32 %v1403_v54, 16  ;;  %v2385_v13 = vrot.slane %v2383_v59, 4 }
  0xac   : > { %1279 = vrot.lane.b32.xlu1 %v1179_v21, %s6034_s29  ;;  %v978_v21 = vld [vmem:[%s6118_s28 + $0x30] sm:$0xe]  ;;  %v206_v8 = vld [vmem:[%s6118_s28 + $0x94] sm:$0xf]  ;;  %v5165_v15 = vrot.slane %v2210_v61, 10  ;;  %v1126_v16 = vrot.slane %v6619_v63, 5 }
  0xad   : > { %v810_v62 = vpop.permute.xlu0 %809  ;;  %v5137_v43 = vrot.slane %v978_v21, 9  ;;  %v1842_v36 = vrot.slane %v1840_v29, 6  ;;  %v1123_v5 = vsel %vm6111_vm2, %v1121_v51, %v1122_v12  ;;  %247 = vst.msk [vmem:[#allocation2 + $0x64] sm:$0xf] %vm221_vm12, %v206_v8  ;;  %v1568_v19 = vrot.slane %v1566_v1, 5 }
  0xae   : > { %v812_v6 = vpop.permute.xlu1 %811  ;;  %928 = vst.msk [vmem:[#allocation2 + $0x8] sm:$0xf] %vm925_vm13, %v810_v62  ;;  %v1825_v62 = vrot.slane %v1824_v47, 4  ;;  %v1571_v20 = vrot.slane %v1569_v2, 6  ;;  %v1577_v25 = vrot.slane %v1575_v7, 5  ;;  %v1585_v27 = vshrl.u32 %v1404_v10, 16 }
  0xaf   : > { %929 = vst.msk [vmem:[#allocation2 + $0xc] sm:$0xf] %vm925_vm13, %v812_v6  ;;  %821 = vrot.lane.b32.xlu0 %v434_v58, %s6035_s30  ;;  %v1120_v55 = vsel %vm6111_vm2, %v5137_v43, %v1119_v37  ;;  %v2212_v58 = vld [vmem:[%s6118_s28 + $0x98] sm:$0x3]  ;;  %v1843_v56 = vor.u32 %v1842_v36, %v1839_v46  ;;  %v6624_v6 = vld [vmem:[%s6118_s28 + $0x44] sm:$0x1] }
  0xb0   : > { %823 = vrot.lane.b32.xlu1 %v444_v57, %s6035_s30  ;;  %v1835_v57 = vrot.slane %v6595_v44, 4  ;;  %v2386_v14 = vrot.slane %v2212_v58, 6  ;;  %v1834_v18 = vsel %vm6177_vm8, %v1825_v62, %v6595_v44  ;;  %v1588_v28 = vshll.u32 %v1404_v10, 16  ;;  %v1407_v34 = vld [vmem:[%s6118_s28 + $0x44] sm:$0x3] }
  0xb1   : > { %v1230_v4 = vpop.permute.xlu0 %1229  ;;  %v1129_v30 = vrot.slane %v6624_v6, 5  ;;  %v208_v37 = vld [vmem:[%s6118_s28 + $0xa0] sm:$0xf]  ;;  %v1594_v43 = vshrl.u32 %v1405_v23, 16  ;;  %v1597_v44 = vshll.u32 %v1405_v23, 16  ;;  %v1128_v36 = vrot.slane %v1126_v16, 4 }
  0xb2   : > { %v1232_v22 = vpop.permute.xlu1 %1231  ;;  %1350 = vst.msk [vmem:[#allocation2] sm:$0xf] %vm1349_vm14, %v1230_v4  ;;  %v981_v4 = vld [vmem:[%s6118_s28 + $0x3c] sm:$0xe]  ;;  %v1844_v17 = vsel %vm6177_vm8, %v1835_v57, %v1843_v56  ;;  %v2387_v31 = vsel %vm6218_vm11, %v2385_v13, %v2386_v14  ;;  %v1587_v48 = vrot.slane %v1585_v27, 5 }
  0xb3   : > { %1351 = vst.msk [vmem:[#allocation2 + $0x4] sm:$0xf] %vm1349_vm14, %v1232_v22  ;;  %1281 = vrot.lane.b32.xlu0 %v1183_v60, %s6034_s29  ;;  %v1578_v60 = vshll.u32 %v1403_v54, 16  ;;  %v1406_v22 = vld [vmem:[%s6118_s28 + $0x40] sm:$0xf]  ;;  %v1616_v54 = vshll.u32 %v1407_v34, 16  ;;  %v1130_v62 = vsel %vm6111_vm2, %v1128_v36, %v1129_v30 }
  0xb4   : > { %1283 = vrot.lane.b32.xlu1 %v1186_v11, %s6034_s29  ;;  %v205_v11 = vld [vmem:[%s6118_s28 + $0x90] sm:$0xf]  ;;  %v1603_v35 = vshrl.u32 %v1406_v22, 16  ;;  %v1606_v42 = vshll.u32 %v1406_v22, 16  ;;  %249 = vst.msk [vmem:[#allocation2 + $0x6c] sm:$0xf] %vm221_vm12, %v208_v37 }
  0xb5   : > { %v2050_v32 = vpop.permute.xlu0 %2049  ;;  %246 = vst.msk [vmem:[#allocation2 + $0x60] sm:$0xf] %vm221_vm12, %v205_v11  ;;  %v1580_v26 = vrot.slane %v1578_v60, 6  ;;  %v2214_v51 = vld [vmem:[%s6118_s28 + $0xa0] sm:$0xf]  ;;  %v1599_v61 = vrot.slane %v1597_v44, 6 }
  0xb6   : > { %v2052_v38 = vpop.permute.xlu1 %2051  ;;  %2152 = vst.msk [vmem:[#allocation2 + $0x48] sm:$0xf] %vm2133_vm15, %v2050_v32  ;;  %v2384_v32 = vsel %vm6218_vm11, %v5165_v15, %v2383_v59  ;;  %v1605_v52 = vrot.slane %v1603_v35, 5  ;;  %v2213_v57 = vld [vmem:[%s6118_s28 + $0x9c] sm:$0xc]  ;;  %v1608_v58 = vrot.slane %v1606_v42, 6 }
  0xb7   : > { %2153 = vst.msk [vmem:[#allocation2 + $0x4c] sm:$0xf] %vm2133_vm15, %v2052_v38  ;;  %2061 = vrot.lane.b32.xlu0 %v1806_v24, %s6036_s4  ;;  %v1572_v38 = vor.u32 %v1571_v20, %v1568_v19  ;;  %v1581_v47 = vor.u32 %v1580_v26, %v1577_v25  ;;  %v1596_v59 = vrot.slane %v1594_v43, 5  ;;  %v2390_v2 = vrot.slane %v2214_v51, 6  ;;  %v190_v6 = vld [vmem:[%s6118_s28 + $0x34] sm:$0xf] }
  0xb8   : > { %2063 = vrot.lane.b32.xlu1 %v1816_v33, %s6036_s4  ;;  %v5138_v33 = vrot.slane %v981_v4, 9  ;;  %v189_v7 = vld [vmem:[%s6118_s28 + $0x30] sm:$0xf]  ;;  %v5166_v60 = vrot.slane %v2213_v57, 10  ;;  %231 = vst.msk [vmem:[#allocation2 + $0x24] sm:$0xf] %vm221_vm12, %v190_v6  ;;  %v1609_v13 = vor.u32 %v1608_v58, %v1605_v52 }
  0xb9   : > { %v2470_v49 = vpop.permute.xlu0 %2469  ;;  %v1583_v63 = vrot.slane %v1581_v47, 4  ;;  %230 = vst.msk [vmem:[#allocation2 + $0x20] sm:$0xf] %vm221_vm12, %v189_v7  ;;  %v191_v10 = vld [vmem:[%s6118_s28 + $0x3c] sm:$0xf]  ;;  %v1618_v14 = vrot.slane %v1616_v54, 6  ;;  %v1600_v15 = vor.u32 %v1599_v61, %v1596_v59 }
  0xba   : > { %v2472_v53 = vpop.permute.xlu1 %2471  ;;  %2574 = vst.msk [vmem:[#allocation2 + $0x40] sm:$0xf] %vm2557_vm0, %v2470_v49  ;;  %v1590_v49 = vrot.slane %v1588_v28, 6  ;;  %v1127_v12 = vsel %vm6111_vm2, %v5138_v33, %v1126_v16  ;;  %v304_v16 = vld [vmem:[%s6118_s28 + $0xa8] sm:$0xf]  ;;  %v2391_v25 = vsel %vm6218_vm11, %v5166_v60, %v2390_v2 }
  0xbb   : > { %2575 = vst.msk [vmem:[#allocation2 + $0x44] sm:$0xf] %vm2557_vm0, %v2472_v53  ;;  %825 = vrot.lane.b32.xlu0 %v458_v45, %s6035_s30  ;;  %v207_v45 = vld [vmem:[%s6118_s28 + $0x9c] sm:$0xf]  ;;  %v1613_v53 = vshrl.u32 %v1407_v34, 16  ;;  %v662_v28 = vshrl.u32 %v304_v16, 16 }
  0xbc   : > { %827 = vrot.lane.b32.xlu1 %v468_v50, %s6035_s30  ;;  %248 = vst.msk [vmem:[#allocation2 + $0x68] sm:$0xf] %vm221_vm12, %v207_v45  ;;  %v1591_v1 = vor.u32 %v1590_v49, %v1587_v48  ;;  %232 = vst.msk [vmem:[#allocation2 + $0x28] sm:$0xf] %vm221_vm12, %v191_v10  ;;  %v6688_v20 = vld [vmem:[%s6118_s28 + $0x34] sm:$0xf] }
  0xbd   : > { %v1234_v3 = vpop.permute.xlu0 %1233  ;;  %v1615_v8 = vrot.slane %v1613_v53, 5  ;;  %v2188_v26 = vld [vmem:[%s6118_s28 + $0x38] sm:$0x3]  ;;  %v2186_v27 = vld [vmem:[%s6118_s28 + $0x30] sm:$0xc]  ;;  %v664_v36 = vrot.slane %v662_v28, 4 }
  0xbe   : > { %v1236_v9 = vpop.permute.xlu1 %1235  ;;  %1352 = vst.msk [vmem:[#allocation2 + $0x8] sm:$0xf] %vm1349_vm14, %v1234_v3  ;;  %v307_v33 = vld [vmem:[%s6118_s28 + $0xb4] sm:$0xf]  ;;  %v2190_v37 = vld [vmem:[%s6118_s28 + $0x40] sm:$0xf] }
  0xbf   : > { %1353 = vst.msk [vmem:[#allocation2 + $0xc] sm:$0xf] %vm1349_vm14, %v1236_v9  ;;  %1245 = vrot.lane.b32.xlu0 %v1120_v55, %s6034_s29  ;;  %v1573_v55 = vrot.slane %v1572_v38, 4  ;;  %v192_v9 = vld [vmem:[%s6118_s28 + $0x40] sm:$0xf]  ;;  %v1619_v30 = vor.u32 %v1618_v14, %v1615_v8  ;;  %v2330_v44 = vrot.slane %v2188_v26, 6 }
  0xc0   : > { %1247 = vrot.lane.b32.xlu1 %v1123_v5, %s6034_s29  ;;  %v2215_v5 = vld [vmem:[%s6118_s28 + $0xa4] sm:$0x3]  ;;  %233 = vst.msk [vmem:[#allocation2 + $0x2c] sm:$0xf] %vm221_vm12, %v192_v9  ;;  %v5157_v45 = vrot.slane %v2186_v27, 10  ;;  %v686_v48 = vshrl.u32 %v307_v33, 16 }
  0xc1   : > { %v2014_v24 = vpop.permute.xlu0 %2013  ;;  %v1582_v11 = vsel %vm6177_vm8, %v1573_v55, %v1581_v47  ;;  %v2393_v19 = vrot.slane %v2215_v5, 6  ;;  %v689_v49 = vshll.u32 %v307_v33, 16  ;;  %v2191_v52 = vld [vmem:[%s6118_s28 + $0x44] sm:$0x3]  ;;  %v2334_v53 = vrot.slane %v2190_v37, 6 }
  0xc2   : > { %v2016_v21 = vpop.permute.xlu1 %2015  ;;  %2134 = vst.msk [vmem:[#allocation2] sm:$0xf] %vm2133_vm15, %v2014_v24  ;;  %v5852_v29 = vld [vmem:[#allocation2 + $0x40] sm:$0xff]   ;;  %v305_v24 = vld [vmem:[%s6118_s28 + $0xac] sm:$0xf]  ;;  %v688_v5 = vrot.slane %v686_v48, 4 }
  0xc3   : > { %2135 = vst.msk [vmem:[#allocation2 + $0x4] sm:$0xf] %vm2133_vm15, %v2016_v21  ;;  %2065 = vrot.lane.b32.xlu0 %v1834_v18, %s6036_s4  ;;  %5632 = vmatprep.mubr.msk.bf16.mxu1 %vm2722_vm1, %v5852_v29  ;;  %v2392_v18 = vrot.slane %v2390_v2, 4  ;;  %v665_v21 = vshll.u32 %v304_v16, 16  ;;  %v1611_v29 = vrot.slane %v1609_v13, 4  ;;  %v671_v38 = vshll.u32 %v305_v24, 16 }
  0xc4   : > { %2067 = vrot.lane.b32.xlu1 %v1844_v17, %s6036_s4  ;;  %v1592_v17 = vsel %vm6177_vm8, %v1583_v63, %v1591_v1  ;;  %v675_v42 = vshrl.u32 %v305_v24, 16  ;;  %v2189_v54 = vld [vmem:[%s6118_s28 + $0x3c] sm:$0xc]  ;;  %v306_v63 = vld [vmem:[%s6118_s28 + $0xb0] sm:$0x1]  ;;  %v691_v6 = vrot.slane %v689_v49, 5 }
  0xc5   : > { %v2474_v46 = vpop.permute.xlu0 %2473  ;;  %v2394_v35 = vsel %vm6218_vm11, %v2392_v18, %v2393_v19  ;;  %v667_v47 = vrot.slane %v665_v21, 5  ;;  %v6716_v57 = vrot.slane %v671_v38, 5  ;;  %v5158_v1 = vrot.slane %v2189_v54, 10  ;;  %v281_v10 = vld [vmem:[%s6118_s28 + $0x4c] sm:$0xf] }
  0xc6   : > { %v2476_v50 = vpop.permute.xlu1 %2475  ;;  %2576 = vst.msk [vmem:[#allocation2 + $0x48] sm:$0xf] %vm2557_vm0, %v2474_v46  ;;  %v308_v46 = vld [vmem:[%s6118_s28 + $0xb8] sm:$0xf]  ;;  %v677_v58 = vrot.slane %v675_v42, 4  ;;  %v2336_v8 = vrot.slane %v2334_v53, 4 }
  0xc7   : > { %2577 = vst.msk [vmem:[#allocation2 + $0x4c] sm:$0xf] %vm2557_vm0, %v2476_v50  ;;  %2485 = vrot.lane.b32.xlu0 %v2384_v32, %s6037_s5  ;;  %v2327_v32 = vrot.slane %v6688_v20, 6  ;;  %v1620_v50 = vsel %vm6177_vm8, %v1611_v29, %v1619_v30  ;;  %v695_v59 = vshll.u32 %v308_v46, 16  ;;  %v699_v61 = vshrl.u32 %v308_v46, 16 }
  0xc8   : > { %2487 = vrot.lane.b32.xlu1 %v2387_v31, %s6037_s5  ;;  %v1601_v31 = vrot.slane %v1600_v15, 4  ;;  %v668_v2 = vor.u32 %v667_v47, %v664_v36  ;;  %v2337_v9 = vrot.slane %v2191_v52, 6  ;;  %v678_v14 = vor.u32 %v677_v58, %v6716_v57  ;;  %v1009_v33 = vld [vmem:[%s6118_s28 + $0xac] sm:$0xf]  ;;  %v6758_v46 = vld [vmem:[%s6118_s28 + $0xb0] sm:$0x1] }
  0xc9   : > { %v2018_v56 = vpop.permute.xlu0 %2017  ;;  %v2328_v60 = vsel %vm6218_vm11, %v5157_v45, %v2327_v32  ;;  %v681_v15 = vshll.u32 %v306_v63, 16  ;;  %v6732_v16 = vrot.slane %v695_v59, 5  ;;  %v2335_v19 = vsel %vm6218_vm11, %v5158_v1, %v2334_v53  ;;  %v284_v45 = vld [vmem:[%s6118_s28 + $0x58] sm:$0xf] }
  0xca   : > { %v2020_v3 = vpop.permute.xlu1 %2019  ;;  %2136 = vst.msk [vmem:[#allocation2 + $0x8] sm:$0xf] %vm2133_vm15, %v2018_v56  ;;  %v1610_v51 = vsel %vm6177_vm8, %v1601_v31, %v1609_v13  ;;  %v669_v20 = vrot.slane %v668_v2, 4  ;;  %v479_v24 = vshll.u32 %v281_v10, 16  ;;  %v2338_v21 = vsel %vm6218_vm11, %v2336_v8, %v2337_v9 }
  0xcb   : > { %2137 = vst.msk [vmem:[#allocation2 + $0xc] sm:$0xf] %vm2133_vm15, %v2020_v3  ;;  %1249 = vrot.lane.b32.xlu0 %v1127_v12, %s6034_s29  ;;  %v2329_v12 = vrot.slane %v2327_v32, 4  ;;  %v309_v3 = vld [vmem:[%s6118_s28 + $0xbc] sm:$0x1]  ;;  %v679_v29 = vrot.slane %v678_v14, 4 }
  0xcc   : > { %1251 = vrot.lane.b32.xlu1 %v1130_v62, %s6034_s29  ;;  %v683_v30 = vrot.slane %v681_v15, 5  ;;  %v674_v37 = vsel %vm6146_vm5, %v669_v20, %v6716_v57  ;;  %v6760_v36 = vrot.slane %v479_v24, 5  ;;  %v1189_v53 = vrot.slane %v1009_v33, 5  ;;  %v6787_v14 = vld [vmem:[%s6118_s28 + $0xb8] sm:$0xf] }
  0xcd   : > { %v2438_v4 = vpop.permute.xlu0 %2437  ;;  %v2331_v7 = vsel %vm6218_vm11, %v2329_v12, %v2330_v44  ;;  %v1432_v44 = vld [vmem:[%s6118_s28 + $0xa8] sm:$0xe]  ;;  %v503_v1 = vshll.u32 %v284_v45, 16  ;;  %v507_v2 = vshrl.u32 %v284_v45, 16  ;;  %v1434_v15 = vld [vmem:[%s6118_s28 + $0xb0] sm:$0x3] }
  0xce   : > { %v2440_v22 = vpop.permute.xlu1 %2439  ;;  %2558 = vst.msk [vmem:[#allocation2] sm:$0xf] %vm2557_vm0, %v2438_v4  ;;  %v5855_v23 = vld [vmem:[#allocation2 + $0x48] sm:$0xff]   ;;  %v701_v4 = vrot.slane %v699_v61, 4  ;;  %v684_v12 = vsel %vm6146_vm5, %v679_v29, %v683_v30  ;;  %v283_v61 = vld [vmem:[%s6118_s28 + $0x54] sm:$0xf] }
  0xcf   : > { %2559 = vst.msk [vmem:[#allocation2 + $0x4] sm:$0xf] %vm2557_vm0, %v2440_v22  ;;  %2029 = vrot.lane.b32.xlu0 %v1582_v11, %s6036_s4  ;;  %5633 = vmatmul.mubr.msk.bf16.vlgmr.msra.gmra.mxu1 %vm2722_vm1, %v5855_v23  ;;  %v280_v11 = vld [vmem:[%s6118_s28 + $0x48] sm:$0xf]  ;;  %v705_v22 = vshll.u32 %v309_v3, 16  ;;  %v692_v23 = vor.u32 %v691_v6, %v688_v5  ;;  %v1849_v63 = vshll.u32 %v1432_v44, 16 }
  0xd0   : > { %2031 = vrot.lane.b32.xlu1 %v1592_v17, %s6036_s4  ;;  %v470_v26 = vshrl.u32 %v280_v11, 16  ;;  %v473_v27 = vshll.u32 %v280_v11, 16  ;;  %v702_v31 = vor.u32 %v701_v4, %v6732_v16  ;;  %v211_v3 = vld [vmem:[%s6118_s28 + $0xb4] sm:$0xf]  ;;  %v1192_v11 = vrot.slane %v6758_v46, 5 }
  0xd1   : > { %v2442_v34 = vpop.permute.xlu0 %2441  ;;  %v707_v38 = vrot.slane %v705_v22, 5  ;;  %v693_v42 = vrot.slane %v692_v23, 4  ;;  %252 = vst.msk [vmem:[#allocation2 + $0x78] sm:$0xf] %vm221_vm12, %v211_v3  ;;  %v6792_v4 = vld [vmem:[%s6118_s28 + $0xbc] sm:$0x1] }
  0xd2   : > { %v2444_v43 = vpop.permute.xlu1 %2443  ;;  %2560 = vst.msk [vmem:[#allocation2 + $0x8] sm:$0xf] %vm2557_vm0, %v2442_v34  ;;  %v1008_v34 = vld [vmem:[%s6118_s28 + $0xa8] sm:$0xe]  ;;  %v472_v48 = vrot.slane %v470_v26, 4  ;;  %v475_v49 = vrot.slane %v473_v27, 5 }
  0xd3   : > { %2561 = vst.msk [vmem:[#allocation2 + $0xc] sm:$0xf] %vm2557_vm0, %v2444_v43  ;;  %2489 = vrot.lane.b32.xlu0 %v2391_v25, %s6037_s5  ;;  %v483_v25 = vshrl.u32 %v281_v10, 16  ;;  %v282_v43 = vld [vmem:[%s6118_s28 + $0x50] sm:$0x1]  ;;  %v703_v52 = vrot.slane %v702_v31, 4  ;;  %v698_v5 = vsel %vm6146_vm5, %v693_v42, %v6732_v16 }
  0xd4   : > { %2491 = vrot.lane.b32.xlu1 %v2394_v35, %s6037_s5  ;;  %v1433_v35 = vld [vmem:[%s6118_s28 + $0xac] sm:$0xf]  ;;  %v5147_v54 = vrot.slane %v1008_v34, 9  ;;  %v1191_v10 = vrot.slane %v1189_v53, 4  ;;  %v494_v20 = vshrl.u32 %v283_v61, 16  ;;  %v497_v22 = vshll.u32 %v283_v61, 16 }
  0xd5   : > { %v846_v55 = vpop.permute.xlu0 %845  ;;  %v485_v47 = vrot.slane %v483_v25, 4  ;;  %v1855_v58 = vshrl.u32 %v1433_v35, 16  ;;  %v1858_v59 = vshll.u32 %v1433_v35, 16  ;;  %v708_v9 = vsel %vm6146_vm5, %v703_v52, %v707_v38  ;;  %v1011_v23 = vld [vmem:[%s6118_s28 + $0xb4] sm:$0xe] }
  0xd6   : > { %v848_v56 = vpop.permute.xlu1 %847  ;;  %946 = vst.msk [vmem:[#allocation2 + $0x50] sm:$0xf] %vm925_vm13, %v846_v55  ;;  %v5856_v62 = vld [vmem:[#allocation2] sm:$0xff]   ;;  %v209_v55 = vld [vmem:[%s6118_s28 + $0xa8] sm:$0xf]  ;;  %v1851_v25 = vrot.slane %v1849_v63, 6  ;;  %v1193_v33 = vsel %vm6111_vm2, %v1191_v10, %v1192_v11 }
  0xd7   : > { %947 = vst.msk [vmem:[#allocation2 + $0x54] sm:$0xf] %vm925_vm13, %v848_v56  ;;  %2033 = vrot.lane.b32.xlu0 %v1610_v51, %s6036_s4  ;;  %5616 = vmatprep.mubr.msk.bf16.mxu0 %vm2722_vm1, %v5856_v62  ;;  %v212_v56 = vld [vmem:[%s6118_s28 + $0xb8] sm:$0xf]  ;;  %v1846_v62 = vshrl.u32 %v1432_v44, 16  ;;  %v486_v6 = vor.u32 %v485_v47, %v6760_v36  ;;  %v6798_v26 = vrot.slane %v503_v1, 5 }
  0xd8   : > { %2035 = vrot.lane.b32.xlu1 %v1620_v50, %s6036_s4  ;;  %v210_v50 = vld [vmem:[%s6118_s28 + $0xac] sm:$0xf]  ;;  %250 = vst.msk [vmem:[#allocation2 + $0x70] sm:$0xf] %vm221_vm12, %v209_v55  ;;  %253 = vst.msk [vmem:[#allocation2 + $0x7c] sm:$0xf] %vm221_vm12, %v212_v56 }
  0xd9   : > { %v850_v13 = vpop.permute.xlu0 %849  ;;  %251 = vst.msk [vmem:[#allocation2 + $0x74] sm:$0xf] %vm221_vm12, %v210_v50  ;;  %v1848_v24 = vrot.slane %v1846_v62, 5  ;;  %v509_v27 = vrot.slane %v507_v2, 4  ;;  %v1196_v30 = vrot.slane %v6787_v14, 5  ;;  %v1865_v34 = vshrl.u32 %v1434_v15, 16 }
  0xda   : > { %v852_v17 = vpop.permute.xlu1 %851  ;;  %948 = vst.msk [vmem:[#allocation2 + $0x58] sm:$0xf] %vm925_vm13, %v850_v13  ;;  %v5857_v18 = vld [vmem:[#allocation2 + $0x8] sm:$0xff]   ;;  %v1190_v13 = vsel %vm6111_vm2, %v5147_v54, %v1189_v53  ;;  %v1436_v31 = vld [vmem:[%s6118_s28 + $0xb8] sm:$0xf]  ;;  %v1868_v35 = vshll.u32 %v1434_v15, 16 }
  0xdb   : > { %949 = vst.msk [vmem:[#allocation2 + $0x5c] sm:$0xf] %vm925_vm13, %v852_v17  ;;  %2453 = vrot.lane.b32.xlu0 %v2328_v60, %s6037_s5  ;;  %5617 = vmatmul.mubr.msk.bf16.vlgmr.msra.gmra.mxu0 %vm2722_vm1, %v5857_v18  ;;  %v476_v60 = vor.u32 %v475_v49, %v472_v48  ;;  %v1857_v17 = vrot.slane %v1855_v58, 5  ;;  %v1860_v18 = vrot.slane %v1858_v59, 6  ;;  %v194_v38 = vld [vmem:[%s6118_s28 + $0x4c] sm:$0xf]  ;;  %v1852_v50 = vor.u32 %v1851_v25, %v1848_v24 }
  0xdc   : > { %2455 = vrot.lane.b32.xlu1 %v2331_v7, %s6037_s5  ;;  %v489_v7 = vshll.u32 %v282_v43, 16  ;;  %v496_v44 = vrot.slane %v494_v20, 4  ;;  %v499_v45 = vrot.slane %v497_v22, 5  ;;  %v6810_v46 = vld [vmem:[%s6118_s28 + $0x4c] sm:$0xf]  ;;  %v1199_v49 = vrot.slane %v6792_v4, 5 }
  0xdd   : > { %v1270_v28 = vpop.permute.xlu0 %1269  ;;  %v477_v29 = vrot.slane %v476_v60, 4  ;;  %v6807_v43 = vor.u32 %v1860_v18, %v1857_v17  ;;  %v6813_v47 = vld [vmem:[%s6118_s28 + $0xbc] sm:$0x3]  ;;  %235 = vst.msk [vmem:[#allocation2 + $0x34] sm:$0xf] %vm221_vm12, %v194_v38  ;;  %v1198_v53 = vrot.slane %v1196_v30, 4 }
  0xde   : > { %v1272_v32 = vpop.permute.xlu1 %1271  ;;  %1370 = vst.msk [vmem:[#allocation2 + $0x50] sm:$0xf] %vm1349_vm14, %v1270_v28  ;;  %v487_v28 = vrot.slane %v486_v6, 4  ;;  %v193_v48 = vld [vmem:[%s6118_s28 + $0x48] sm:$0xf]  ;;  %v5148_v54 = vrot.slane %v1011_v23, 9  ;;  %v500_v3 = vor.u32 %v499_v45, %v496_v44 }
  0xdf   : > { %1371 = vst.msk [vmem:[#allocation2 + $0x54] sm:$0xf] %vm1349_vm14, %v1272_v32  ;;  %2457 = vrot.lane.b32.xlu0 %v2335_v19, %s6037_s5  ;;  %v285_v19 = vld [vmem:[%s6118_s28 + $0x5c] sm:$0x1]  ;;  %v482_v52 = vsel %vm6146_vm5, %v477_v29, %v6760_v36  ;;  %v1435_v55 = vld [vmem:[%s6118_s28 + $0xb4] sm:$0xe] }
  0xe0   : > { %2459 = vrot.lane.b32.xlu1 %v2338_v21, %s6037_s5  ;;  %v491_v21 = vrot.slane %v489_v7, 5  ;;  %234 = vst.msk [vmem:[#allocation2 + $0x30] sm:$0xf] %vm221_vm12, %v193_v48  ;;  %v1867_v58 = vrot.slane %v1865_v34, 5  ;;  %v1870_v59 = vrot.slane %v1868_v35, 6  ;;  %v1883_v61 = vshrl.u32 %v1436_v31, 16 }
  0xe1   : > { %v814_v51 = vpop.permute.xlu0 %813  ;;  %v1886_v56 = vshll.u32 %v1436_v31, 16  ;;  %v196_v62 = vld [vmem:[%s6118_s28 + $0x58] sm:$0xf]  ;;  %v1863_v1 = vrot.slane %v6807_v43, 4  ;;  %v195_v36 = vld [vmem:[%s6118_s28 + $0x54] sm:$0xf] }
  0xe2   : > { %v816_v57 = vpop.permute.xlu1 %815  ;;  %930 = vst.msk [vmem:[#allocation2 + $0x10] sm:$0xf] %vm925_vm13, %v814_v51  ;;  %v510_v51 = vor.u32 %v509_v27, %v6798_v26  ;;  %v1133_v7 = vrot.slane %v6810_v46, 5  ;;  %v1893_v60 = vshrl.u32 %v6813_v47, 16  ;;  %v1877_v10 = vshll.u32 %v1435_v55, 16 }
  0xe3   : > { %931 = vst.msk [vmem:[#allocation2 + $0x14] sm:$0xf] %vm925_vm13, %v816_v57  ;;  %861 = vrot.lane.b32.xlu0 %v674_v37, %s6035_s30  ;;  %v513_v37 = vshll.u32 %v285_v19, 16  ;;  %v1871_v14 = vor.u32 %v1870_v59, %v1867_v58  ;;  %v1885_v15 = vrot.slane %v1883_v61, 5  ;;  %v501_v17 = vrot.slane %v500_v3, 4 }
  0xe4   : > { %863 = vrot.lane.b32.xlu1 %v684_v12, %s6035_s30  ;;  %v492_v12 = vsel %vm6146_vm5, %v487_v28, %v491_v21  ;;  %237 = vst.msk [vmem:[#allocation2 + $0x3c] sm:$0xf] %vm221_vm12, %v196_v62  ;;  %v511_v6 = vrot.slane %v510_v51, 4  ;;  %236 = vst.msk [vmem:[#allocation2 + $0x38] sm:$0xf] %vm221_vm12, %v195_v36  ;;  %v1896_v20 = vshll.u32 %v6813_v47, 16 }
  0xe5   : > { %v1274_v8 = vpop.permute.xlu0 %1273  ;;  %v515_v2 = vrot.slane %v513_v37, 5  ;;  %v986_v18 = vld [vmem:[%s6118_s28 + $0x50] sm:$0x1]  ;;  %v984_v19 = vld [vmem:[%s6118_s28 + $0x48] sm:$0xe]  ;;  %v1879_v24 = vrot.slane %v1877_v10, 6  ;;  %v1872_v27 = vsel %vm6177_vm8, %v1863_v1, %v1871_v14 }
  0xe6   : > { %v1276_v16 = vpop.permute.xlu1 %1275  ;;  %1372 = vst.msk [vmem:[#allocation2 + $0x58] sm:$0xf] %vm1349_vm14, %v1274_v8  ;;  %v1197_v8 = vsel %vm6111_vm2, %v5148_v54, %v1196_v30  ;;  %v1409_v21 = vld [vmem:[%s6118_s28 + $0x4c] sm:$0xf]  ;;  %v1408_v29 = vld [vmem:[%s6118_s28 + $0x48] sm:$0xe] }
  0xe7   : > { %1373 = vst.msk [vmem:[#allocation2 + $0x5c] sm:$0xf] %vm1349_vm14, %v1276_v16  ;;  %865 = vrot.lane.b32.xlu0 %v698_v5, %s6035_s30  ;;  %v1853_v5 = vrot.slane %v1852_v50, 4  ;;  %v1888_v16 = vrot.slane %v1886_v56, 6  ;;  %v1135_v30 = vrot.slane %v1133_v7, 4  ;;  %v1136_v31 = vrot.slane %v986_v18, 5 }
  0xe8   : > { %867 = vrot.lane.b32.xlu1 %v708_v9, %s6035_s30  ;;  %v1874_v9 = vshrl.u32 %v1435_v55, 16  ;;  %v516_v37 = vsel %vm6146_vm5, %v511_v6, %v515_v2  ;;  %v2217_v45 = vld [vmem:[%s6118_s28 + $0xac] sm:$0xf]  ;;  %v2216_v46 = vld [vmem:[%s6118_s28 + $0xa8] sm:$0xc]  ;;  %v1631_v47 = vshrl.u32 %v1409_v21, 16 }
  0xe9   : > { %v2054_v32 = vpop.permute.xlu0 %2053  ;;  %v1862_v22 = vsel %vm6177_vm8, %v1853_v5, %v6807_v43  ;;  %v1889_v38 = vor.u32 %v1888_v16, %v1885_v15  ;;  %v1898_v43 = vrot.slane %v1896_v20, 6  ;;  %v1634_v48 = vshll.u32 %v1409_v21, 16  ;;  %v6882_v59 = vld [vmem:[%s6118_s28 + $0x5c] sm:$0x1]  ;;  %v1410_v61 = vld [vmem:[%s6118_s28 + $0x50] sm:$0x3] }
  0xea   : > { %v2056_v42 = vpop.permute.xlu1 %2055  ;;  %2154 = vst.msk [vmem:[#allocation2 + $0x50] sm:$0xf] %vm2133_vm15, %v2054_v32  ;;  %v1876_v23 = vrot.slane %v1874_v9, 5  ;;  %v5139_v32 = vrot.slane %v984_v19, 9  ;;  %v1625_v50 = vshll.u32 %v1408_v29, 16  ;;  %v1137_v54 = vsel %vm6111_vm2, %v1135_v30, %v1136_v31 }
  0xeb   : > { %2155 = vst.msk [vmem:[#allocation2 + $0x54] sm:$0xf] %vm2133_vm15, %v2056_v42  ;;  %1285 = vrot.lane.b32.xlu0 %v1190_v13, %s6034_s29  ;;  %v1200_v13 = vsel %vm6111_vm2, %v1198_v53, %v1199_v49  ;;  %v1895_v42 = vrot.slane %v1893_v60, 5  ;;  %v1622_v49 = vshrl.u32 %v1408_v29, 16  ;;  %v1891_v55 = vrot.slane %v1889_v38, 4 }
  0xec   : > { %1287 = vrot.lane.b32.xlu1 %v1193_v33, %s6034_s29  ;;  %v506_v33 = vsel %vm6146_vm5, %v501_v17, %v6798_v26  ;;  %v1880_v34 = vor.u32 %v1879_v24, %v1876_v23  ;;  %v6873_v26 = vld [vmem:[%s6118_s28 + $0x58] sm:$0xf]  ;;  %v1134_v51 = vsel %vm6111_vm2, %v5139_v32, %v1133_v7  ;;  %v2397_v58 = vrot.slane %v2217_v45, 6  ;;  %v987_v1 = vld [vmem:[%s6118_s28 + $0x54] sm:$0xe] }
  0xed   : > { %v818_v57 = vpop.permute.xlu0 %817  ;;  %v5167_v62 = vrot.slane %v2216_v46, 10  ;;  %v1633_v2 = vrot.slane %v1631_v47, 5  ;;  %v1636_v3 = vrot.slane %v1634_v48, 6  ;;  %v1624_v36 = vrot.slane %v1622_v49, 5  ;;  %v1412_v9 = vld [vmem:[%s6118_s28 + $0x58] sm:$0xf] }
  0xee   : > { %v820_v63 = vpop.permute.xlu1 %819  ;;  %932 = vst.msk [vmem:[#allocation2 + $0x18] sm:$0xf] %vm925_vm13, %v818_v57  ;;  %v1899_v57 = vor.u32 %v1898_v43, %v1895_v42  ;;  %v1627_v5 = vrot.slane %v1625_v50, 6  ;;  %v5866_v6 = vld [vmem:[%s7743_s1 + $0x14] ss:$0 sps:$4 sm:$0x33]  }
  0xef   : > { %933 = vst.msk [vmem:[#allocation2 + $0x1c] sm:$0xf] %vm925_vm13, %v820_v63  ;;  %829 = vrot.lane.b32.xlu0 %v482_v52, %s6035_s30  ;;  %v2218_v52 = vld [vmem:[%s6118_s28 + $0xb0] sm:$0x3]  ;;  %v1140_v63 = vrot.slane %v6873_v26, 5  ;;  %v1641_v60 = vshrl.u32 %v1410_v61, 16  ;;  %5798 = vmatprep.subr.msk.bf16.mxu1 %vm2294_vm9, %v5866_v6  ;;  %v2398_v17 = vsel %vm6218_vm11, %v5167_v62, %v2397_v58 }
  0xf0   : > { %831 = vrot.lane.b32.xlu1 %v492_v12, %s6035_s30  ;;  %v1881_v12 = vrot.slane %v1880_v34, 4  ;;  %v2400_v14 = vrot.slane %v2218_v52, 6  ;;  %v1411_v15 = vld [vmem:[%s6118_s28 + $0x54] sm:$0xe]  ;;  %v1143_v18 = vrot.slane %v6882_v59, 5  ;;  %v5140_v19 = vrot.slane %v987_v1, 9 }
  0xf1   : > { %v1238_v11 = vpop.permute.xlu0 %1237  ;;  %v1142_v20 = vrot.slane %v1140_v63, 4  ;;  %v1628_v23 = vor.u32 %v1627_v5, %v1624_v36  ;;  %v3142_v24 = vsel %vm2294_vm9, %v5866_v6, 0  ;;  %v6916_v21 = vld [vmem:[%s6118_s28 + $0xb8] sm:$0xf]  ;;  %v1650_v29 = vshrl.u32 %v1411_v15, 16 }
  0xf2   : > { %v1240_v4 = vpop.permute.xlu1 %1239  ;;  %1354 = vst.msk [vmem:[#allocation2 + $0x10] sm:$0xf] %vm1349_vm14, %v1238_v11  ;;  %v1890_v7 = vsel %vm6177_vm8, %v1881_v12, %v1889_v38  ;;  %v1900_v11 = vsel %vm6177_vm8, %v1891_v55, %v1899_v57  ;;  %v1653_v30 = vshll.u32 %v1411_v15, 16  ;;  %v1662_v34 = vshll.u32 %v1412_v9, 16  ;;  %5649 = vmatpush3.bf16.msra.mxu1 %v3142_v24  ;;  %v2221_v38 = vld [vmem:[%s6118_s28 + $0xbc] sm:$0x3] }
  0xf3   : > { %1355 = vst.msk [vmem:[#allocation2 + $0x14] sm:$0xf] %vm1349_vm14, %v1240_v4  ;;  %1289 = vrot.lane.b32.xlu0 %v1197_v8, %s6034_s29  ;;  %v1644_v8 = vshll.u32 %v1410_v61, 16  ;;  %v2219_v42 = vld [vmem:[%s6118_s28 + $0xb4] sm:$0xc]  ;;  %v1629_v46 = vrot.slane %v1628_v23, 4  ;;  %v1144_v26 = vsel %vm6111_vm2, %v1142_v20, %v1143_v18 }
  0xf4   : > { %1291 = vrot.lane.b32.xlu1 %v1200_v13, %s6034_s29  ;;  %v2399_v13 = vrot.slane %v2397_v58, 4  ;;  %v1413_v43 = vld [vmem:[%s6118_s28 + $0x5c] sm:$0x3]  ;;  %v2404_v47 = vrot.slane %v6916_v21, 6  ;;  %v1652_v49 = vrot.slane %v1650_v29, 5  ;;  %v1655_v50 = vrot.slane %v1653_v30, 6 }
  0xf5   : > { %v2058_v25 = vpop.permute.xlu0 %2057  ;;  %v1664_v52 = vrot.slane %v1662_v34, 6  ;;  %v6937_v57 = vld [vmem:[%s6118_s28 + $0x4c] sm:$0xf]  ;;  %v311_v58 = vld [vmem:[%s6118_s28 + $0xc4] sm:$0xf]  ;;  %v2407_v59 = vrot.slane %v2221_v38, 6 }
  0xf6   : > { %v2060_v28 = vpop.permute.xlu1 %2059  ;;  %2156 = vst.msk [vmem:[#allocation2 + $0x58] sm:$0xf] %vm2133_vm15, %v2058_v25  ;;  %v5867_v25 = vld [vmem:[%s7743_s1 + $0x20] ss:$0 sps:$4 sm:$0x33]   ;;  %v2401_v32 = vsel %vm6218_vm11, %v2399_v13, %v2400_v14  ;;  %v5168_v61 = vrot.slane %v2219_v42, 10  ;;  %v1656_v1 = vor.u32 %v1655_v50, %v1652_v49 }
  0xf7   : > { %2157 = vst.msk [vmem:[#allocation2 + $0x5c] sm:$0xf] %vm2133_vm15, %v2060_v28  ;;  %2069 = vrot.lane.b32.xlu0 %v1862_v22, %s6036_s4  ;;  %v6907_v22 = vor.u32 %v1636_v3, %v1633_v2  ;;  %v1646_v28 = vrot.slane %v1644_v8, 6  ;;  %5799 = vmatprep.subr.msk.bf16.mxu0 %vm2294_vm9, %v5867_v25  ;;  %v310_v2 = vld [vmem:[%s6118_s28 + $0xc0] sm:$0xf]  ;;  %v719_v14 = vshll.u32 %v311_v58, 16 }
  0xf8   : > { %2071 = vrot.lane.b32.xlu1 %v1872_v27, %s6036_s4  ;;  %v1643_v27 = vrot.slane %v1641_v60, 5  ;;  %v2341_v60 = vrot.slane %v6937_v57, 6  ;;  %v2192_v8 = vld [vmem:[%s6118_s28 + $0x48] sm:$0xc]  ;;  %v6959_v13 = vld [vmem:[%s6118_s28 + $0x5c] sm:$0x3] }
  0xf9   : > { %v2478_v35 = vpop.permute.xlu0 %2477  ;;  %v1639_v45 = vrot.slane %v6907_v22, 4  ;;  %v1638_v62 = vsel %vm6177_vm8, %v1629_v46, %v6907_v22  ;;  %v6964_v15 = vld [vmem:[%s6118_s28 + $0x54] sm:$0xc]  ;;  %v1657_v18 = vrot.slane %v1656_v1, 4  ;;  %v5870_v29 = vld [vmem:[%s7743_s1 + $0xc] sm:$0xff]   ;;  %v6986_v38 = vrot.slane %v719_v14, 5 }
  0xfa   : > { %v2480_v44 = vpop.permute.xlu1 %2479  ;;  %2578 = vst.msk [vmem:[#allocation2 + $0x50] sm:$0xf] %vm2557_vm0, %v2478_v35  ;;  %v3575_v35 = vsel %vm2294_vm9, %v5867_v25, 0  ;;  %v1647_v48 = vor.u32 %v1646_v28, %v1643_v27  ;;  %v5159_v28 = vrot.slane %v2192_v8, 10  ;;  %v2343_v30 = vrot.slane %v2341_v60, 4  ;;  %5650 = vmatprep.subr.bf16.mxu1 %v5870_v29 }
  0xfb   : > { %2579 = vst.msk [vmem:[#allocation2 + $0x54] sm:$0xf] %vm2557_vm0, %v2480_v44  ;;  %833 = vrot.lane.b32.xlu0 %v506_v33, %s6035_s30  ;;  %v1659_v33 = vshrl.u32 %v1412_v9, 16  ;;  %5685 = vmatpush3.bf16.msra.mxu0 %v3575_v35  ;;  %v1141_v44 = vsel %vm6111_vm2, %v5140_v19, %v1140_v63  ;;  %v2406_v63 = vrot.slane %v2404_v47, 4  ;;  %v6955_v9 = vld [vmem:[%s6118_s28 + $0x58] sm:$0xf] }
  0xfc   : > { %835 = vrot.lane.b32.xlu1 %v516_v37, %s6035_s30  ;;  %v723_v19 = vshrl.u32 %v311_v58, 16  ;;  %v2348_v21 = vrot.slane %v6955_v9, 6  ;;  %5651 = vmatpush3.bf16.msra.mxu1 %v5870_v29  ;;  %v1438_v57 = vld [vmem:[%s6118_s28 + $0xc0] sm:$0xe] }
  0xfd   : > { %v1242_v53 = vpop.permute.xlu0 %1241  ;;  %v1661_v12 = vrot.slane %v1659_v33, 5  ;;  %v2408_v22 = vsel %vm6218_vm11, %v2406_v63, %v2407_v59  ;;  %v1905_v14 = vshll.u32 %v1438_v57, 16 }
  0xfe   : > { %v1244_v56 = vpop.permute.xlu1 %1243  ;;  %1356 = vst.msk [vmem:[#allocation2 + $0x18] sm:$0xf] %vm1349_vm14, %v1242_v53  ;;  %v1669_v53 = vshrl.u32 %v1413_v43, 16  ;;  %v725_v42 = vrot.slane %v723_v19, 4  ;;  %v2350_v49 = vrot.slane %v2348_v21, 4 }
  0xff   : > { %1357 = vst.msk [vmem:[#allocation2 + $0x1c] sm:$0xf] %vm1349_vm14, %v1244_v56  ;;  %1253 = vrot.lane.b32.xlu0 %v1134_v51, %s6034_s29  ;;  %v1648_v56 = vsel %vm6177_vm8, %v1639_v45, %v1647_v48  ;;  %v1665_v36 = vor.u32 %v1664_v52, %v1661_v12  ;;  %v5872_v45 = vld [vmem:[%s7743_s1 + $0x18] sm:$0xff]   ;;  %v2342_v12 = vsel %vm6218_vm11, %v5159_v28, %v2341_v60  ;;  %v7003_v52 = vld [vmem:[%s6118_s28 + $0xc4] sm:$0xf] }
 0x100   : > { %1255 = vrot.lane.b32.xlu1 %v1137_v54, %s6034_s29  ;;  %v1672_v54 = vshll.u32 %v1413_v43, 16  ;;  %v1671_v5 = vrot.slane %v1669_v53, 5  ;;  %v314_v43 = vld [vmem:[%s6118_s28 + $0xd0] sm:$0xf]  ;;  %5686 = vmatprep.subr.bf16.mxu0 %v5872_v45  ;;  %v1440_v60 = vld [vmem:[%s6118_s28 + $0xc8] sm:$0x3] }
 0x101   : > { %v2022_v10 = vpop.permute.xlu0 %2021  ;;  %v1667_v23 = vrot.slane %v1665_v36, 4  ;;  %v1666_v35 = vsel %vm6177_vm8, %v1657_v18, %v1665_v36  ;;  %5687 = vmatpush3.bf16.msra.mxu0 %v5872_v45  ;;  %v743_v63 = vshll.u32 %v314_v43, 16  ;;  %v747_v1 = vshrl.u32 %v314_v43, 16 }
 0x102   : > { %v2024_v16 = vpop.permute.xlu1 %2023  ;;  %2138 = vst.msk [vmem:[#allocation2 + $0x10] sm:$0xf] %vm2133_vm15, %v2022_v10  ;;  %v5858_v4 = vld [vmem:[#allocation2 + $0x50] sm:$0xff]   ;;  %v1674_v6 = vrot.slane %v1672_v54, 6  ;;  %v1924_v28 = vshll.u32 %v1440_v60, 16 }
 0x103   : > { %2139 = vst.msk [vmem:[#allocation2 + $0x14] sm:$0xf] %vm2133_vm15, %v2024_v16  ;;  %2073 = vrot.lane.b32.xlu0 %v1890_v7, %s6036_s4  ;;  %5636 = vmatprep.mubr.msk.bf16.mxu1 %vm2722_vm1, %v5858_v4  ;;  %v6950_v7 = vld [vmem:[%s6118_s28 + $0x50] sm:$0x3]  ;;  %v710_v16 = vshrl.u32 %v310_v2, 16  ;;  %v713_v4 = vshll.u32 %v310_v2, 16 }
 0x104   : > { %2075 = vrot.lane.b32.xlu1 %v1900_v11, %s6036_s4  ;;  %v1675_v24 = vor.u32 %v1674_v6, %v1671_v5  ;;  %v2344_v27 = vrot.slane %v6950_v7, 6  ;;  %v749_v18 = vrot.slane %v747_v1, 4  ;;  %v7080_v1 = vld [vmem:[%s6118_s28 + $0xc4] sm:$0xf] }
 0x105   : > { %v2482_v31 = vpop.permute.xlu0 %2481  ;;  %v712_v33 = vrot.slane %v710_v16, 4  ;;  %v715_v34 = vrot.slane %v713_v4, 5  ;;  %v1203_v4 = vrot.slane %v7003_v52, 5 }
 0x106   : > { %v2484_v37 = vpop.permute.xlu1 %2483  ;;  %2580 = vst.msk [vmem:[#allocation2 + $0x58] sm:$0xf] %vm2557_vm0, %v2482_v31  ;;  %v2351_v31 = vrot.slane %v6959_v13, 6  ;;  %v2345_v59 = vsel %vm6218_vm11, %v2343_v30, %v2344_v27  ;;  %v1902_v13 = vshrl.u32 %v1438_v57, 16  ;;  %v1921_v27 = vshrl.u32 %v1440_v60, 16 }
 0x107   : > { %2581 = vst.msk [vmem:[#allocation2 + $0x5c] sm:$0xf] %vm2557_vm0, %v2484_v37  ;;  %2493 = vrot.lane.b32.xlu0 %v2398_v17, %s6037_s5  ;;  %v2405_v17 = vsel %vm6218_vm11, %v5168_v61, %v2404_v47  ;;  %v5160_v37 = vrot.slane %v6964_v15, 10  ;;  %v1676_v47 = vsel %vm6177_vm8, %v1667_v23, %v1675_v24  ;;  %v726_v61 = vor.u32 %v725_v42, %v6986_v38  ;;  %v315_v23 = vld [vmem:[%s6118_s28 + $0xd4] sm:$0x1] }
 0x108   : > { %2495 = vrot.lane.b32.xlu1 %v2401_v32, %s6037_s5  ;;  %v312_v32 = vld [vmem:[%s6118_s28 + $0xc8] sm:$0x1]  ;;  %v2352_v36 = vsel %vm6218_vm11, %v2350_v49, %v2351_v31  ;;  %v1904_v30 = vrot.slane %v1902_v13, 5  ;;  %v1907_v31 = vrot.slane %v1905_v14, 6  ;;  %v1923_v45 = vrot.slane %v1921_v27, 5 }
 0x109   : > { %v2026_v51 = vpop.permute.xlu0 %2025  ;;  %v729_v50 = vshll.u32 %v312_v32, 16  ;;  %v2349_v5 = vsel %vm6218_vm11, %v5160_v37, %v2348_v21  ;;  %v727_v16 = vrot.slane %v726_v61, 4  ;;  %v753_v37 = vshll.u32 %v315_v23, 16  ;;  %v7042_v42 = vld [vmem:[%s7743_s1 + $0x2c] ss:$0 sps:$4 sm:$0x33]  }
 0x10a   : > { %v2028_v55 = vpop.permute.xlu1 %2027  ;;  %2140 = vst.msk [vmem:[#allocation2 + $0x18] sm:$0xf] %vm2133_vm15, %v2026_v51  ;;  %v716_v51 = vor.u32 %v715_v34, %v712_v33  ;;  %v1205_v34 = vrot.slane %v1203_v4, 4  ;;  %5800 = vmatprep.subr.msk.bf16.mxu1 %vm2294_vm9, %v7042_v42  ;;  %v7060_v49 = vld [vmem:[%s6118_s28 + $0xd0] sm:$0xf]  ;;  %v2411_v14 = vrot.slane %v7080_v1, 6 }
 0x10b   : > { %2141 = vst.msk [vmem:[#allocation2 + $0x1c] sm:$0xf] %vm2133_vm15, %v2028_v55  ;;  %1257 = vrot.lane.b32.xlu0 %v1141_v44, %s6034_s29  ;;  %v313_v44 = vld [vmem:[%s6118_s28 + $0xcc] sm:$0xf]  ;;  %v1439_v55 = vld [vmem:[%s6118_s28 + $0xc4] sm:$0xf] }
 0x10c   : > { %1259 = vrot.lane.b32.xlu1 %v1144_v26, %s6034_s29  ;;  %v734_v53 = vshrl.u32 %v313_v44, 16  ;;  %v737_v54 = vshll.u32 %v313_v44, 16  ;;  %v731_v6 = vrot.slane %v729_v50, 5  ;;  %v717_v7 = vrot.slane %v716_v51, 4 }
 0x10d   : > { %v2446_v3 = vpop.permute.xlu0 %2445  ;;  %v1911_v8 = vshrl.u32 %v1439_v55, 16  ;;  %v1914_v9 = vshll.u32 %v1439_v55, 16  ;;  %v755_v52 = vrot.slane %v753_v37, 5  ;;  %v1442_v55 = vld [vmem:[%s6118_s28 + $0xd0] sm:$0xf]  ;;  %v1210_v61 = vrot.slane %v7060_v49, 5 }
 0x10e   : > { %v2448_v10 = vpop.permute.xlu1 %2447  ;;  %2562 = vst.msk [vmem:[#allocation2 + $0x10] sm:$0xf] %vm2557_vm0, %v2446_v3  ;;  %v5859_v11 = vld [vmem:[#allocation2 + $0x58] sm:$0xff]   ;;  %v722_v21 = vsel %vm6146_vm5, %v717_v7, %v6986_v38  ;;  %v732_v33 = vsel %vm6146_vm5, %v727_v16, %v731_v6  ;;  %v1939_v6 = vshrl.u32 %v1442_v55, 16  ;;  %v1942_v7 = vshll.u32 %v1442_v55, 16 }
 0x10f   : > { %2563 = vst.msk [vmem:[#allocation2 + $0x14] sm:$0xf] %vm2557_vm0, %v2448_v10  ;;  %2037 = vrot.lane.b32.xlu0 %v1638_v62, %s6036_s4  ;;  %5637 = vmatmul.mubr.msk.bf16.gmra.mxu1 %vm2722_vm1, %v5859_v11  ;;  %v1014_v62 = vld [vmem:[%s6118_s28 + $0xc0] sm:$0xe]  ;;  %v736_v10 = vrot.slane %v734_v53, 4  ;;  %v739_v11 = vrot.slane %v737_v54, 5 }
 0x110   : > { %2039 = vrot.lane.b32.xlu1 %v1648_v56, %s6036_s4  ;;  %v7011_v56 = vld [vmem:[%s6118_s28 + $0xc8] sm:$0x1]  ;;  %v1913_v24 = vrot.slane %v1911_v8, 5  ;;  %v7048_v38 = vld [vmem:[%s7743_s1 + $0x38] ss:$0 sps:$4 sm:$0x33]  }
 0x111   : > { %v2450_v20 = vpop.permute.xlu0 %2449  ;;  %v740_v29 = vor.u32 %v739_v11, %v736_v10  ;;  %5801 = vmatprep.subr.msk.bf16.mxu0 %vm2294_vm9, %v7048_v38  ;;  %v1441_v53 = vld [vmem:[%s6118_s28 + $0xcc] sm:$0xe]  ;;  %v7086_v8 = vld [vmem:[%s6118_s28 + $0xc8] sm:$0x3]  ;;  %v1212_v10 = vrot.slane %v1210_v61, 4  ;;  %v1941_v23 = vrot.slane %v1939_v6, 5 }
 0x112   : > { %v2452_v25 = vpop.permute.xlu1 %2451  ;;  %2564 = vst.msk [vmem:[#allocation2 + $0x18] sm:$0xf] %vm2557_vm0, %v2450_v20  ;;  %v1206_v20 = vrot.slane %v7011_v56, 5  ;;  %v1017_v56 = vld [vmem:[%s6118_s28 + $0xcc] sm:$0xe] }
 0x113   : > { %2565 = vst.msk [vmem:[#allocation2 + $0x1c] sm:$0xf] %vm2557_vm0, %v2452_v25  ;;  %2497 = vrot.lane.b32.xlu0 %v2405_v17, %s6037_s5  ;;  %v7025_v17 = vrot.slane %v743_v63, 5  ;;  %v1916_v25 = vrot.slane %v1914_v9, 6  ;;  %v1443_v9 = vld [vmem:[%s6118_s28 + $0xd4] sm:$0x3] }
 0x114   : > { %2499 = vrot.lane.b32.xlu1 %v2408_v22, %s6037_s5  ;;  %v5149_v22 = vrot.slane %v1014_v62, 9  ;;  %v1207_v51 = vsel %vm6111_vm2, %v1205_v34, %v1206_v20  ;;  %v5150_v13 = vrot.slane %v1017_v56, 9  ;;  %v317_v20 = vld [vmem:[%s6118_s28 + $0xdc] sm:$0xf]  ;;  %v1952_v27 = vshll.u32 %v1443_v9, 16 }
 0x115   : > { %v854_v46 = vpop.permute.xlu0 %853  ;;  %v7052_v44 = vor.u32 %v1916_v25, %v1913_v24  ;;  %v1944_v24 = vrot.slane %v1942_v7, 6  ;;  %v1949_v25 = vshrl.u32 %v1443_v9, 16  ;;  %v2227_v6 = vld [vmem:[%s6118_s28 + $0xd4] sm:$0x3]  ;;  %v7134_v9 = vld [vmem:[%s6118_s28 + $0xdc] sm:$0xf] }
 0x116   : > { %v856_v26 = vpop.permute.xlu1 %855  ;;  %950 = vst.msk [vmem:[#allocation2 + $0x60] sm:$0xf] %vm925_vm13, %v854_v46  ;;  %v5860_v48 = vld [vmem:[#allocation2 + $0x10] sm:$0xff]   ;;  %v1926_v46 = vrot.slane %v1924_v28, 6  ;;  %v1954_v49 = vrot.slane %v1952_v27, 6 }
 0x117   : > { %951 = vst.msk [vmem:[#allocation2 + $0x64] sm:$0xf] %vm925_vm13, %v856_v26  ;;  %2041 = vrot.lane.b32.xlu0 %v1666_v35, %s6036_s4  ;;  %5620 = vmatprep.mubr.msk.bf16.mxu0 %vm2722_vm1, %v5860_v48  ;;  %v750_v35 = vor.u32 %v749_v18, %v7025_v17  ;;  %v741_v26 = vrot.slane %v740_v29, 4  ;;  %v1908_v48 = vor.u32 %v1907_v31, %v1904_v30  ;;  %v1919_v57 = vrot.slane %v7052_v44, 4 }
 0x118   : > { %2043 = vrot.lane.b32.xlu1 %v1676_v47, %s6036_s4  ;;  %v1204_v47 = vsel %vm6111_vm2, %v5149_v22, %v1203_v4  ;;  %v2414_v30 = vrot.slane %v7086_v8, 6 }
 0x119   : > { %v858_v58 = vpop.permute.xlu0 %857  ;;  %v746_v62 = vsel %vm6146_vm5, %v741_v26, %v7025_v17  ;;  %v1909_v63 = vrot.slane %v1908_v48, 4  ;;  %v2222_v17 = vld [vmem:[%s6118_s28 + $0xc0] sm:$0xc]  ;;  %v1945_v26 = vor.u32 %v1944_v24, %v1941_v23  ;;  %v1951_v48 = vrot.slane %v1949_v25, 5  ;;  %v321_v24 = vld [vmem:[%s6118_s28 + $0xec] sm:$0x1] }
 0x11a   : > { %v860_v2 = vpop.permute.xlu1 %859  ;;  %952 = vst.msk [vmem:[#allocation2 + $0x68] sm:$0xf] %vm925_vm13, %v858_v58  ;;  %v5861_v3 = vld [vmem:[#allocation2 + $0x18] sm:$0xff]   ;;  %v1927_v58 = vor.u32 %v1926_v46, %v1923_v45  ;;  %v5169_v31 = vrot.slane %v2222_v17, 10  ;;  %v213_v45 = vld [vmem:[%s6118_s28 + $0xc0] sm:$0xf] }
 0x11b   : > { %953 = vst.msk [vmem:[#allocation2 + $0x6c] sm:$0xf] %vm925_vm13, %v860_v2  ;;  %2461 = vrot.lane.b32.xlu0 %v2342_v12, %s6037_s5  ;;  %5621 = vmatmul.mubr.msk.bf16.gmra.mxu0 %vm2722_vm1, %v5861_v3  ;;  %v751_v12 = vrot.slane %v750_v35, 4  ;;  %v1930_v2 = vshrl.u32 %v1441_v53, 16  ;;  %v1933_v3 = vshll.u32 %v1441_v53, 16  ;;  %v1918_v4 = vsel %vm6177_vm8, %v1909_v63, %v7052_v44 }
 0x11c   : > { %2463 = vrot.lane.b32.xlu1 %v2345_v59, %s6037_s5  ;;  %v1019_v59 = vld [vmem:[%s6118_s28 + $0xd4] sm:$0x1]  ;;  %v1928_v16 = vsel %vm6177_vm8, %v1919_v57, %v1927_v58  ;;  %v1211_v35 = vsel %vm6111_vm2, %v5150_v13, %v1210_v61  ;;  %v214_v44 = vld [vmem:[%s6118_s28 + $0xc4] sm:$0xf]  ;;  %254 = vst.msk [vmem:[#allocation2 + $0x80] sm:$0xf] %vm221_vm12, %v213_v45  ;;  %v2412_v58 = vsel %vm6218_vm11, %v5169_v31, %v2411_v14 }
 0x11d   : > { %v1278_v15 = vpop.permute.xlu0 %1277  ;;  %v1213_v11 = vrot.slane %v1019_v59, 5  ;;  %v1932_v18 = vrot.slane %v1930_v2, 5  ;;  %255 = vst.msk [vmem:[#allocation2 + $0x84] sm:$0xf] %vm221_vm12, %v214_v44  ;;  %v2225_v53 = vld [vmem:[%s6118_s28 + $0xcc] sm:$0xc] }
 0x11e   : > { %v1280_v19 = vpop.permute.xlu1 %1279  ;;  %1374 = vst.msk [vmem:[#allocation2 + $0x60] sm:$0xf] %vm1349_vm14, %v1278_v15  ;;  %v316_v15 = vld [vmem:[%s6118_s28 + $0xd8] sm:$0xf]  ;;  %v1947_v2 = vrot.slane %v1945_v26, 4  ;;  %v5170_v7 = vrot.slane %v2225_v53, 10 }
 0x11f   : > { %1375 = vst.msk [vmem:[#allocation2 + $0x64] sm:$0xf] %vm1349_vm14, %v1280_v19  ;;  %2465 = vrot.lane.b32.xlu0 %v2349_v5, %s6037_s5  ;;  %v756_v5 = vsel %vm6146_vm5, %v751_v12, %v755_v52  ;;  %v1935_v19 = vrot.slane %v1933_v3, 6  ;;  %v761_v29 = vshll.u32 %v316_v15, 16  ;;  %v1214_v34 = vsel %vm6111_vm2, %v1212_v10, %v1213_v11  ;;  %v216_v17 = vld [vmem:[%s6118_s28 + $0xd0] sm:$0xf] }
 0x120   : > { %2467 = vrot.lane.b32.xlu1 %v2352_v36, %s6037_s5  ;;  %v1955_v3 = vor.u32 %v1954_v49, %v1951_v48  ;;  %v2421_v23 = vrot.slane %v2227_v6, 6  ;;  %257 = vst.msk [vmem:[#allocation2 + $0x8c] sm:$0xf] %vm221_vm12, %v216_v17  ;;  %v801_v44 = vshll.u32 %v321_v24, 16  ;;  %v1025_v17 = vld [vmem:[%s6118_s28 + $0xec] sm:$0x1] }
 0x121   : > { %v822_v32 = vpop.permute.xlu0 %821  ;;  %v1936_v37 = vor.u32 %v1935_v19, %v1932_v18  ;;  %v763_v52 = vrot.slane %v761_v29, 5  ;;  %v215_v18 = vld [vmem:[%s6118_s28 + $0xcc] sm:$0xf]  ;;  %v1445_v29 = vld [vmem:[%s6118_s28 + $0xdc] sm:$0xf] }
 0x122   : > { %v824_v43 = vpop.permute.xlu1 %823  ;;  %934 = vst.msk [vmem:[#allocation2 + $0x20] sm:$0xf] %vm925_vm13, %v822_v32  ;;  %v767_v32 = vshll.u32 %v317_v20, 16  ;;  %v1967_v48 = vshrl.u32 %v1445_v29, 16  ;;  %v1970_v49 = vshll.u32 %v1445_v29, 16 }
 0x123   : > { %935 = vst.msk [vmem:[#allocation2 + $0x24] sm:$0xf] %vm925_vm13, %v824_v43  ;;  %869 = vrot.lane.b32.xlu0 %v722_v21, %s6035_s30  ;;  %v758_v21 = vshrl.u32 %v316_v15, 16  ;;  %v320_v43 = vld [vmem:[%s6118_s28 + $0xe8] sm:$0xf]  ;;  %v1937_v59 = vrot.slane %v1936_v37, 4 }
 0x124   : > { %871 = vrot.lane.b32.xlu1 %v732_v33, %s6035_s30  ;;  %v771_v33 = vshrl.u32 %v317_v20, 16  ;;  %v791_v55 = vshll.u32 %v320_v43, 16  ;;  %v795_v57 = vshrl.u32 %v320_v43, 16  ;;  %v7124_v61 = vrot.slane %v767_v32, 5  ;;  %256 = vst.msk [vmem:[#allocation2 + $0x88] sm:$0xf] %vm221_vm12, %v215_v18 }
 0x125   : > { %v1282_v50 = vpop.permute.xlu0 %1281  ;;  %v760_v12 = vrot.slane %v758_v21, 4  ;;  %v1946_v15 = vsel %vm6177_vm8, %v1937_v59, %v1945_v26  ;;  %v1956_v20 = vsel %vm6177_vm8, %v1947_v2, %v1955_v3  ;;  %v1217_v21 = vrot.slane %v7134_v9, 5  ;;  %v1446_v32 = vld [vmem:[%s6118_s28 + $0xe0] sm:$0x3]  ;;  %v1020_v26 = vld [vmem:[%s6118_s28 + $0xd8] sm:$0xe] }
 0x126   : > { %v1284_v54 = vpop.permute.xlu1 %1283  ;;  %1376 = vst.msk [vmem:[#allocation2 + $0x68] sm:$0xf] %vm1349_vm14, %v1282_v50  ;;  %v773_v56 = vrot.slane %v771_v33, 4  ;;  %v7136_v10 = vrot.slane %v791_v55, 5  ;;  %v797_v11 = vrot.slane %v795_v57, 4  ;;  %v5151_v59 = vrot.slane %v1020_v26, 9 }
 0x127   : > { %1377 = vst.msk [vmem:[#allocation2 + $0x6c] sm:$0xf] %vm1349_vm14, %v1284_v54  ;;  %1293 = vrot.lane.b32.xlu0 %v1204_v47, %s6034_s29  ;;  %v2413_v47 = vrot.slane %v2411_v14, 4  ;;  %v318_v54 = vld [vmem:[%s6118_s28 + $0xe0] sm:$0x1]  ;;  %v764_v8 = vor.u32 %v763_v52, %v760_v12  ;;  %v1219_v12 = vrot.slane %v1217_v21, 4 }
 0x128   : > { %1295 = vrot.lane.b32.xlu1 %v1207_v51, %s6034_s29  ;;  %v2226_v51 = vld [vmem:[%s6118_s28 + $0xd0] sm:$0xf]  ;;  %v798_v43 = vor.u32 %v797_v11, %v7136_v10  ;;  %v1977_v52 = vshrl.u32 %v1446_v32, 16  ;;  %v1972_v2 = vrot.slane %v1970_v49, 6  ;;  %v1218_v9 = vsel %vm6111_vm2, %v5151_v59, %v1217_v21  ;;  %v1448_v11 = vld [vmem:[%s6118_s28 + $0xe8] sm:$0xf] }
 0x129   : > { %v2062_v36 = vpop.permute.xlu0 %2061  ;;  %v2415_v1 = vsel %vm6218_vm11, %v2413_v47, %v2414_v30  ;;  %v1022_v47 = vld [vmem:[%s6118_s28 + $0xe0] sm:$0x1] }
 0x12a   : > { %v2064_v60 = vpop.permute.xlu1 %2063  ;;  %2158 = vst.msk [vmem:[#allocation2 + $0x60] sm:$0xf] %vm2133_vm15, %v2062_v36  ;;  %v2418_v36 = vrot.slane %v2226_v51, 6 }
 0x12b   : > { %2159 = vst.msk [vmem:[#allocation2 + $0x64] sm:$0xf] %vm2133_vm15, %v2064_v60  ;;  %873 = vrot.lane.b32.xlu0 %v746_v62, %s6035_s30  ;;  %v319_v62 = vld [vmem:[%s6118_s28 + $0xe4] sm:$0xf]  ;;  %v777_v60 = vshll.u32 %v318_v54, 16  ;;  %v1980_v54 = vshll.u32 %v1446_v32, 16 }
 0x12c   : > { %875 = vrot.lane.b32.xlu1 %v756_v5, %s6035_s30  ;;  %v782_v13 = vshrl.u32 %v319_v62, 16  ;;  %v785_v14 = vshll.u32 %v319_v62, 16  ;;  %v2419_v27 = vsel %vm6218_vm11, %v5170_v7, %v2418_v36  ;;  %v803_v62 = vrot.slane %v801_v44, 5 }
 0x12d   : > { %v826_v22 = vpop.permute.xlu0 %825  ;;  %v779_v37 = vrot.slane %v777_v60, 5  ;;  %v1982_v7 = vrot.slane %v1980_v54, 6 }
 0x12e   : > { %v828_v28 = vpop.permute.xlu1 %827  ;;  %936 = vst.msk [vmem:[#allocation2 + $0x28] sm:$0xf] %vm925_vm13, %v826_v22  ;;  %v2420_v22 = vrot.slane %v2418_v36, 4  ;;  %v784_v30 = vrot.slane %v782_v13, 4  ;;  %v787_v31 = vrot.slane %v785_v14, 5 }
 0x12f   : > { %937 = vst.msk [vmem:[#allocation2 + $0x2c] sm:$0xf] %vm925_vm13, %v828_v28  ;;  %2077 = vrot.lane.b32.xlu0 %v1918_v4, %s6036_s4  ;;  %v1444_v4 = vld [vmem:[%s6118_s28 + $0xd8] sm:$0xe]  ;;  %v765_v28 = vrot.slane %v764_v8, 4 }
 0x130   : > { %2079 = vrot.lane.b32.xlu1 %v1928_v16, %s6036_s4  ;;  %v774_v16 = vor.u32 %v773_v56, %v7124_v61  ;;  %v1958_v33 = vshrl.u32 %v1444_v4, 16  ;;  %v788_v53 = vor.u32 %v787_v31, %v784_v30  ;;  %v799_v56 = vrot.slane %v798_v43, 4  ;;  %v1024_v8 = vld [vmem:[%s6118_s28 + $0xe8] sm:$0xf]  ;;  %v2230_v43 = vld [vmem:[%s6118_s28 + $0xe0] sm:$0x3] }
 0x131   : > { %v1246_v46 = vpop.permute.xlu0 %1245  ;;  %v770_v51 = vsel %vm6146_vm5, %v765_v28, %v7124_v61  ;;  %v1224_v18 = vrot.slane %v1024_v8, 5 }
 0x132   : > { %v1248_v50 = vpop.permute.xlu1 %1247  ;;  %1358 = vst.msk [vmem:[#allocation2 + $0x20] sm:$0xf] %vm1349_vm14, %v1246_v46  ;;  %v2422_v46 = vsel %vm6218_vm11, %v2420_v22, %v2421_v23  ;;  %v1960_v55 = vrot.slane %v1958_v33, 5  ;;  %v789_v6 = vrot.slane %v788_v53, 4  ;;  %v2229_v22 = vld [vmem:[%s6118_s28 + $0xdc] sm:$0xf]  ;;  %v804_v30 = vsel %vm6146_vm5, %v799_v56, %v803_v62 }
 0x133   : > { %1359 = vst.msk [vmem:[#allocation2 + $0x24] sm:$0xf] %vm1349_vm14, %v1248_v50  ;;  %1297 = vrot.lane.b32.xlu0 %v1211_v35, %s6034_s29  ;;  %v775_v35 = vrot.slane %v774_v16, 4  ;;  %v1447_v16 = vld [vmem:[%s6118_s28 + $0xe4] sm:$0xe]  ;;  %v1995_v23 = vshrl.u32 %v1448_v11, 16 }
 0x134   : > { %1299 = vrot.lane.b32.xlu1 %v1214_v34, %s6034_s29  ;;  %v1961_v34 = vshll.u32 %v1444_v4, 16  ;;  %v794_v24 = vsel %vm6146_vm5, %v789_v6, %v7136_v10  ;;  %v1986_v28 = vshrl.u32 %v1447_v16, 16  ;;  %v1989_v21 = vshll.u32 %v1447_v16, 16 }
 0x135   : > { %v2066_v63 = vpop.permute.xlu0 %2065  ;;  %v780_v61 = vsel %vm6146_vm5, %v775_v35, %v779_v37  ;;  %v1227_v35 = vrot.slane %v1025_v17, 5  ;;  %v2425_v44 = vrot.slane %v2229_v22, 6  ;;  %v1997_v40 = vrot.slane %v1995_v23, 5 }
 0x136   : > { %v2068_v5 = vpop.permute.xlu1 %2067  ;;  %2160 = vst.msk [vmem:[#allocation2 + $0x68] sm:$0xf] %vm2133_vm15, %v2066_v63  ;;  %v1963_v57 = vrot.slane %v1961_v34, 6  ;;  %v1226_v34 = vrot.slane %v1224_v18, 4  ;;  %v1991_v49 = vrot.slane %v1989_v21, 6 }
 0x137   : > { %2161 = vst.msk [vmem:[#allocation2 + $0x6c] sm:$0xf] %vm2133_vm15, %v2068_v5  ;;  %2501 = vrot.lane.b32.xlu0 %v2412_v58, %s6037_s5  ;;  %v1220_v58 = vrot.slane %v1022_v47, 5  ;;  %v1979_v5 = vrot.slane %v1977_v52, 5  ;;  %v2427_v54 = vrot.slane %v2425_v44, 4 }
 0x138   : > { %2503 = vrot.lane.b32.xlu1 %v2415_v1, %s6037_s5  ;;  %v1969_v1 = vrot.slane %v1967_v48, 5  ;;  %v1964_v60 = vor.u32 %v1963_v57, %v1960_v55  ;;  %v1988_v48 = vrot.slane %v1986_v28, 5  ;;  %v2428_v55 = vrot.slane %v2230_v43, 6  ;;  %v220_v43 = vld [vmem:[%s6118_s28 + $0xe8] sm:$0xf] }
 0x139   : > { %v2486_v19 = vpop.permute.xlu0 %2485  ;;  %v1221_v14 = vsel %vm6111_vm2, %v1219_v12, %v1220_v58  ;;  %v1983_v32 = vor.u32 %v1982_v7, %v1979_v5  ;;  %261 = vst.msk [vmem:[#allocation2 + $0x9c] sm:$0xf] %vm221_vm12, %v220_v43 }
 0x13a   : > { %v2488_v25 = vpop.permute.xlu1 %2487  ;;  %2582 = vst.msk [vmem:[#allocation2 + $0x60] sm:$0xf] %vm2557_vm0, %v2486_v19  ;;  %v1965_v19 = vrot.slane %v1964_v60, 4  ;;  %v1992_v62 = vor.u32 %v1991_v49, %v1988_v48  ;;  %v2231_v60 = vld [vmem:[%s6118_s28 + $0xe4] sm:$0xc]  ;;  %v2429_v8 = vsel %vm6218_vm11, %v2427_v54, %v2428_v55 }
 0x13b   : > { %2583 = vst.msk [vmem:[#allocation2 + $0x64] sm:$0xf] %vm2557_vm0, %v2488_v25  ;;  %2081 = vrot.lane.b32.xlu0 %v1946_v15, %s6036_s4  ;;  %v1973_v15 = vor.u32 %v1972_v2, %v1969_v1  ;;  %v1449_v25 = vld [vmem:[%s6118_s28 + $0xec] sm:$0x3]  ;;  %v2232_v1 = vld [vmem:[%s6118_s28 + $0xe8] sm:$0xf] }
 0x13c   : > { %2083 = vrot.lane.b32.xlu1 %v1956_v20, %s6036_s4  ;;  %v1023_v20 = vld [vmem:[%s6118_s28 + $0xe4] sm:$0xe]  ;;  %v2008_v26 = vshll.u32 %v1449_v25, 16  ;;  %v1993_v6 = vrot.slane %v1992_v62, 4  ;;  %v2432_v7 = vrot.slane %v2232_v1, 6  ;;  %v4008_v1 = vsel %vm2294_vm9, %v7042_v42, 0 }
 0x13d   : > { %v1250_v45 = vpop.permute.xlu0 %1249  ;;  %v1975_v31 = vrot.slane %v1973_v15, 4  ;;  %v5152_v37 = vrot.slane %v1023_v20, 9  ;;  %v1974_v10 = vsel %vm6177_vm8, %v1965_v19, %v1973_v15  ;;  %v5898_v62 = vld [vmem:[%s7743_s1 + $0x24] sm:$0xff]   ;;  %v5877_v42 = vld [vmem:[#allocation2 + $0x10] sm:$0xff]  }
 0x13e   : > { %v1252_v50 = vpop.permute.xlu1 %1251  ;;  %1360 = vst.msk [vmem:[#allocation2 + $0x28] sm:$0xf] %vm1349_vm14, %v1250_v45  ;;  %v2005_v45 = vshrl.u32 %v1449_v25, 16  ;;  %v2010_v56 = vrot.slane %v2008_v26, 6  ;;  %v2434_v16 = vrot.slane %v2432_v7, 4 }
 0x13f   : > { %1361 = vst.msk [vmem:[#allocation2 + $0x2c] sm:$0xf] %vm1349_vm14, %v1252_v50  ;;  %2505 = vrot.lane.b32.xlu0 %v2419_v27, %s6037_s5  ;;  %v1998_v27 = vshll.u32 %v1448_v11, 16  ;;  %v1225_v53 = vsel %vm6111_vm2, %v5152_v37, %v1224_v18 }
 0x140   : > { %2507 = vrot.lane.b32.xlu1 %v2422_v46, %s6037_s5  ;;  %v2228_v46 = vld [vmem:[%s6118_s28 + $0xd8] sm:$0xc]  ;;  %v2007_v59 = vrot.slane %v2005_v45, 5 }
 0x141   : > { %v2030_v63 = vpop.permute.xlu0 %2029  ;;  %v2000_v47 = vrot.slane %v1998_v27, 6  ;;  %v5171_v57 = vrot.slane %v2228_v46, 10 }
 0x142   : > { %v2032_v3 = vpop.permute.xlu1 %2031  ;;  %2142 = vst.msk [vmem:[#allocation2 + $0x20] sm:$0xf] %vm2133_vm15, %v2030_v63  ;;  %v5862_v36 = vld [vmem:[#allocation2 + $0x60] sm:$0xff]  }
 0x143   : > { %2143 = vst.msk [vmem:[#allocation2 + $0x24] sm:$0xf] %vm2133_vm15, %v2032_v3  ;;  %877 = vrot.lane.b32.xlu0 %v770_v51, %s6035_s30  ;;  %5640 = vmatprep.mubr.msk.bf16.mxu1 %vm2722_vm1, %v5862_v36  ;;  %v1984_v51 = vsel %vm6177_vm8, %v1975_v31, %v1983_v32  ;;  %v2001_v58 = vor.u32 %v2000_v47, %v1997_v40  ;;  %v2233_v3 = vld [vmem:[%s6118_s28 + $0xec] sm:$0x3]  ;;  %v218_v32 = vld [vmem:[%s6118_s28 + $0xdc] sm:$0xf] }
 0x144   : > { %879 = vrot.lane.b32.xlu1 %v780_v61, %s6035_s30  ;;  %v1228_v61 = vsel %vm6111_vm2, %v1226_v34, %v1227_v35  ;;  %v2426_v36 = vsel %vm6218_vm11, %v5171_v57, %v2425_v44  ;;  %259 = vst.msk [vmem:[#allocation2 + $0x94] sm:$0xf] %vm221_vm12, %v218_v32  ;;  %v219_v44 = vld [vmem:[%s6118_s28 + $0xe4] sm:$0xf]  ;;  %v5871_v57 = vld [vmem:[#allocation2 + $0x8] sm:$0xff]  }
 0x145   : > { %v2490_v13 = vpop.permute.xlu0 %2489  ;;  %v2003_v5 = vrot.slane %v2001_v58, 4  ;;  %v2002_v15 = vsel %vm6177_vm8, %v1993_v6, %v2001_v58  ;;  %260 = vst.msk [vmem:[#allocation2 + $0x98] sm:$0xf] %vm221_vm12, %v219_v44  ;;  %v5896_v44 = vld [vmem:[#allocation2 + $0x60] sm:$0xff]  }
 0x146   : > { %v2492_v4 = vpop.permute.xlu1 %2491  ;;  %2584 = vst.msk [vmem:[#allocation2 + $0x68] sm:$0xf] %vm2557_vm0, %v2490_v13 }
 0x147   : > { %2585 = vst.msk [vmem:[#allocation2 + $0x6c] sm:$0xf] %vm2557_vm0, %v2492_v4  ;;  %1301 = vrot.lane.b32.xlu0 %v1218_v9, %s6034_s29  ;;  %v2011_v9 = vor.u32 %v2010_v56, %v2007_v59  ;;  %v5172_v4 = vrot.slane %v2231_v60, 10  ;;  %v5874_v56 = vld [vmem:[#allocation2 + $0x10] sm:$0xff]  }
 0x148   : > { %1303 = vrot.lane.b32.xlu1 %v1221_v14, %s6034_s29  ;;  %v2435_v14 = vrot.slane %v2233_v3, 6  ;;  %v5875_v3 = vld [vmem:[#allocation2 + $0x18] sm:$0xff]  }
 0x149   : > { %v2034_v29 = vpop.permute.xlu0 %2033  ;;  %v2012_v18 = vsel %vm6177_vm8, %v2003_v5, %v2011_v9  ;;  %v2433_v22 = vsel %vm6218_vm11, %v5172_v4, %v2432_v7 }
 0x14a   : > { %v2036_v33 = vpop.permute.xlu1 %2035  ;;  %2144 = vst.msk [vmem:[#allocation2 + $0x28] sm:$0xf] %vm2133_vm15, %v2034_v29  ;;  %v2436_v39 = vsel %vm6218_vm11, %v2434_v16, %v2435_v14 }
 0x14b   : > { %2145 = vst.msk [vmem:[#allocation2 + $0x2c] sm:$0xf] %vm2133_vm15, %v2036_v33  ;;  %881 = vrot.lane.b32.xlu0 %v794_v24, %s6035_s30  ;;  %v217_v33 = vld [vmem:[%s6118_s28 + $0xd8] sm:$0xf] }
 0x14c   : > { %883 = vrot.lane.b32.xlu1 %v804_v30, %s6035_s30  ;;  %258 = vst.msk [vmem:[#allocation2 + $0x90] sm:$0xf] %vm221_vm12, %v217_v33  ;;  %v5893_v33 = vld [vmem:[#allocation2 + $0x58] sm:$0xff]  }
 0x14d   : > { %v2454_v50 = vpop.permute.xlu0 %2453 }
 0x14e   : > { %v2456_v12 = vpop.permute.xlu1 %2455  ;;  %2566 = vst.msk [vmem:[#allocation2 + $0x20] sm:$0xf] %vm2557_vm0, %v2454_v50  ;;  %v5863_v52 = vld [vmem:[#allocation2 + $0x68] sm:$0xff]  }
 0x14f   : > { %2567 = vst.msk [vmem:[#allocation2 + $0x24] sm:$0xf] %vm2557_vm0, %v2456_v12  ;;  %2085 = vrot.lane.b32.xlu0 %v1974_v10, %s6036_s4  ;;  %5641 = vmatmul.mubr.msk.bf16.gmra.mxu1 %vm2722_vm1, %v5863_v52 }
 0x150   : > { %2087 = vrot.lane.b32.xlu1 %v1984_v51, %s6036_s4 }
 0x151   : > { %v2458_v63 = vpop.permute.xlu0 %2457 }
 0x152   : > { %v2460_v2 = vpop.permute.xlu1 %2459  ;;  %2568 = vst.msk [vmem:[#allocation2 + $0x28] sm:$0xf] %vm2557_vm0, %v2458_v63 }
 0x153   : > { %2569 = vst.msk [vmem:[#allocation2 + $0x2c] sm:$0xf] %vm2557_vm0, %v2460_v2  ;;  %1305 = vrot.lane.b32.xlu0 %v1225_v53, %s6034_s29 }
 0x154   : > { %1307 = vrot.lane.b32.xlu1 %v1228_v61, %s6034_s29 }
 0x155   : > { %v862_v0 = vpop.permute.xlu0 %861 }
 0x156   : > { %v864_v11 = vpop.permute.xlu1 %863  ;;  %954 = vst.msk [vmem:[#allocation2 + $0x70] sm:$0xf] %vm925_vm13, %v862_v0  ;;  %v5864_v13 = vld [vmem:[#allocation2 + $0x20] sm:$0xff]  }
 0x157   : > { %955 = vst.msk [vmem:[#allocation2 + $0x74] sm:$0xf] %vm925_vm13, %v864_v11  ;;  %2509 = vrot.lane.b32.xlu0 %v2426_v36, %s6037_s5  ;;  %5624 = vmatprep.mubr.msk.bf16.mxu0 %vm2722_vm1, %v5864_v13  ;;  %v5878_v60 = vld [vmem:[#allocation2 + $0x20] sm:$0xff]   ;;  %v5882_v11 = vld [vmem:[#allocation2 + $0x18] sm:$0xff]   ;;  %v4441_v13 = vsel %vm2294_vm9, %v7048_v38, 0 }
 0x158   : > { %2511 = vrot.lane.b32.xlu1 %v2429_v8, %s6037_s5  ;;  %v5883_v16 = vld [vmem:[#allocation2 + $0x20] sm:$0xff]  }
 0x159   : > { %v866_v17 = vpop.permute.xlu0 %865 }
 0x15a   : > { %v868_v19 = vpop.permute.xlu1 %867  ;;  %956 = vst.msk [vmem:[#allocation2 + $0x78] sm:$0xf] %vm925_vm13, %v866_v17  ;;  %v5865_v20 = vld [vmem:[#allocation2 + $0x28] sm:$0xff]  }
 0x15b   : > { %957 = vst.msk [vmem:[#allocation2 + $0x7c] sm:$0xf] %vm925_vm13, %v868_v19  ;;  %2089 = vrot.lane.b32.xlu0 %v2002_v15, %s6036_s4  ;;  %5625 = vmatmul.mubr.msk.bf16.gmra.mxu0 %vm2722_vm1, %v5865_v20  ;;  %v5879_v8 = vld [vmem:[#allocation2 + $0x28] sm:$0xff]   ;;  %v5899_v15 = vld [vmem:[%s7743_s1 + $0x30] sm:$0xff]  }
 0x15c   : > { %2091 = vrot.lane.b32.xlu1 %v2012_v18, %s6036_s4  ;;  %v5886_v20 = vld [vmem:[#allocation2 + $0x28] sm:$0xff]  }
 0x15d   : > { %v1286_v23 = vpop.permute.xlu0 %1285 }
 0x15e   : > { %v1288_v24 = vpop.permute.xlu1 %1287  ;;  %1378 = vst.msk [vmem:[#allocation2 + $0x70] sm:$0xf] %vm1349_vm14, %v1286_v23 }
 0x15f   : > { %1379 = vst.msk [vmem:[#allocation2 + $0x74] sm:$0xf] %vm1349_vm14, %v1288_v24  ;;  %2513 = vrot.lane.b32.xlu0 %v2433_v22, %s6037_s5  ;;  %v5888_v24 = vld [vmem:[#allocation2 + $0x40] sm:$0xff]  }
 0x160   : > { %2515 = vrot.lane.b32.xlu1 %v2436_v39, %s6037_s5 }
 0x161   : > { %v830_v25 = vpop.permute.xlu0 %829 }
 0x162   : > { %v832_v27 = vpop.permute.xlu1 %831  ;;  %938 = vst.msk [vmem:[#allocation2 + $0x30] sm:$0xf] %vm925_vm13, %v830_v25 }
 0x163   : > { %939 = vst.msk [vmem:[#allocation2 + $0x34] sm:$0xf] %vm925_vm13, %v832_v27  ;;  %v5889_v27 = vld [vmem:[#allocation2 + $0x48] sm:$0xff]  }
 0x165   : > { %v1290_v28 = vpop.permute.xlu0 %1289 }
 0x166   : > { %v1292_v41 = vpop.permute.xlu1 %1291  ;;  %1380 = vst.msk [vmem:[#allocation2 + $0x78] sm:$0xf] %vm1349_vm14, %v1290_v28 }
 0x167   : > { %1381 = vst.msk [vmem:[#allocation2 + $0x7c] sm:$0xf] %vm1349_vm14, %v1292_v41 }
 0x169   : > { %v2070_v21 = vpop.permute.xlu0 %2069 }
 0x16a   : > { %v2072_v29 = vpop.permute.xlu1 %2071  ;;  %2162 = vst.msk [vmem:[#allocation2 + $0x70] sm:$0xf] %vm2133_vm15, %v2070_v21 }
 0x16b   : > { %2163 = vst.msk [vmem:[#allocation2 + $0x74] sm:$0xf] %vm2133_vm15, %v2072_v29  ;;  %v5891_v29 = vld [vmem:[#allocation2 + $0x40] sm:$0xff]  }
 0x16d   : > { %v834_v30 = vpop.permute.xlu0 %833 }
 0x16e   : > { %v836_v31 = vpop.permute.xlu1 %835  ;;  %940 = vst.msk [vmem:[#allocation2 + $0x38] sm:$0xf] %vm925_vm13, %v834_v30 }
 0x16f   : > { %941 = vst.msk [vmem:[#allocation2 + $0x3c] sm:$0xf] %vm925_vm13, %v836_v31  ;;  %v5892_v31 = vld [vmem:[#allocation2 + $0x50] sm:$0xff]  }
 0x171   : > { %v1254_v34 = vpop.permute.xlu0 %1253 }
 0x172   : > { %v1256_v35 = vpop.permute.xlu1 %1255  ;;  %1362 = vst.msk [vmem:[#allocation2 + $0x30] sm:$0xf] %vm1349_vm14, %v1254_v34 }
 0x173   : > { %1363 = vst.msk [vmem:[#allocation2 + $0x34] sm:$0xf] %vm1349_vm14, %v1256_v35  ;;  %v5894_v35 = vld [vmem:[#allocation2 + $0x48] sm:$0xff]  }
 0x175   : > { %v2074_v37 = vpop.permute.xlu0 %2073 }
 0x176   : > { %v2076_v10 = vpop.permute.xlu1 %2075  ;;  %2164 = vst.msk [vmem:[#allocation2 + $0x78] sm:$0xf] %vm2133_vm15, %v2074_v37 }
 0x177   : > { %2165 = vst.msk [vmem:[#allocation2 + $0x7c] sm:$0xf] %vm2133_vm15, %v2076_v10  ;;  %v5895_v10 = vld [vmem:[#allocation2 + $0x50] sm:$0xff]  }
 0x179   : > { %v2494_v40 = vpop.permute.xlu0 %2493 }
 0x17a   : > { %v2496_v45 = vpop.permute.xlu1 %2495  ;;  %2586 = vst.msk [vmem:[#allocation2 + $0x70] sm:$0xf] %vm2557_vm0, %v2494_v40 }
 0x17b   : > { %2587 = vst.msk [vmem:[#allocation2 + $0x74] sm:$0xf] %vm2557_vm0, %v2496_v45  ;;  %v5897_v45 = vld [vmem:[#allocation2 + $0x68] sm:$0xff]  }
 0x17d   : > { %v1258_v46 = vpop.permute.xlu0 %1257 }
 0x17e   : > { %v1260_v47 = vpop.permute.xlu1 %1259  ;;  %1364 = vst.msk [vmem:[#allocation2 + $0x38] sm:$0xf] %vm1349_vm14, %v1258_v46 }
 0x17f   : > { %1365 = vst.msk [vmem:[#allocation2 + $0x3c] sm:$0xf] %vm1349_vm14, %v1260_v47  ;;  %v5900_v47 = vld [vmem:[#allocation2 + $0x58] sm:$0xff]  }
 0x181   : > { %v2038_v26 = vpop.permute.xlu0 %2037 }
 0x182   : > { %v2040_v48 = vpop.permute.xlu1 %2039  ;;  %2146 = vst.msk [vmem:[#allocation2 + $0x30] sm:$0xf] %vm2133_vm15, %v2038_v26  ;;  %v5868_v49 = vld [vmem:[#allocation2 + $0x70] sm:$0xff]  }
 0x183   : > { %2147 = vst.msk [vmem:[#allocation2 + $0x34] sm:$0xf] %vm2133_vm15, %v2040_v48  ;;  %5644 = vmatprep.mubr.msk.bf16.mxu1 %vm2722_vm1, %v5868_v49  ;;  %v5901_v48 = vld [vmem:[#allocation2 + $0x60] sm:$0xff]  }
 0x185   : > { %v2498_v50 = vpop.permute.xlu0 %2497 }
 0x186   : > { %v2500_v51 = vpop.permute.xlu1 %2499  ;;  %2588 = vst.msk [vmem:[#allocation2 + $0x78] sm:$0xf] %vm2557_vm0, %v2498_v50  ;;  %v5902_v50 = vld [vmem:[#allocation2 + $0x70] sm:$0xff]  }
 0x187   : > { %2589 = vst.msk [vmem:[#allocation2 + $0x7c] sm:$0xf] %vm2557_vm0, %v2500_v51 }
 0x189   : > { %v2042_v12 = vpop.permute.xlu0 %2041 }
 0x18a   : > { %v2044_v52 = vpop.permute.xlu1 %2043  ;;  %2148 = vst.msk [vmem:[#allocation2 + $0x38] sm:$0xf] %vm2133_vm15, %v2042_v12 }
 0x18b   : > { %2149 = vst.msk [vmem:[#allocation2 + $0x3c] sm:$0xf] %vm2133_vm15, %v2044_v52 }
 0x18d   : > { %v2462_v53 = vpop.permute.xlu0 %2461 }
 0x18e   : > { %v2464_v54 = vpop.permute.xlu1 %2463  ;;  %2570 = vst.msk [vmem:[#allocation2 + $0x30] sm:$0xf] %vm2557_vm0, %v2462_v53  ;;  %v5869_v55 = vld [vmem:[#allocation2 + $0x78] sm:$0xff]   ;;  %v5904_v53 = vld [vmem:[#allocation2 + $0x68] sm:$0xff]  }
 0x18f   : > { %2571 = vst.msk [vmem:[#allocation2 + $0x34] sm:$0xf] %vm2557_vm0, %v2464_v54  ;;  %5645 = vmatmul.mubr.msk.bf16.gmra.mxu1 %vm2722_vm1, %v5869_v55  ;;  %v5903_v12 = vld [vmem:[#allocation2 + $0x78] sm:$0xff]   ;;  %v5905_v55 = vld [vmem:[#allocation2 + $0x70] sm:$0xff]  }
 0x190   : > { %5652 = vmatprep.mubr.msk.bf16.mxu1 %vm2722_vm1, %v5871_v57 }
 0x191   : > { %v2466_v58 = vpop.permute.xlu0 %2465 }
 0x192   : > { %v2468_v59 = vpop.permute.xlu1 %2467  ;;  %2572 = vst.msk [vmem:[#allocation2 + $0x38] sm:$0xf] %vm2557_vm0, %v2466_v58 }
 0x193   : > { %2573 = vst.msk [vmem:[#allocation2 + $0x3c] sm:$0xf] %vm2557_vm0, %v2468_v59 }
 0x195   : > { %v870_v63 = vpop.permute.xlu0 %869 }
 0x196   : > { %v5873_v61 = vld [vmem:[#allocation2 + $0x30] sm:$0xff]   ;;  %v872_v2 = vpop.permute.xlu1 %871  ;;  %958 = vst.msk [vmem:[#allocation2 + $0x80] sm:$0xf] %vm925_vm13, %v870_v63 }
 0x197   : > { %959 = vst.msk [vmem:[#allocation2 + $0x84] sm:$0xf] %vm925_vm13, %v872_v2  ;;  %5628 = vmatprep.mubr.msk.bf16.mxu0 %vm2722_vm1, %v5873_v61  ;;  %5653 = vmatmul.mubr.msk.bf16.vlgmr.msra.gmra.mxu1 %vm2722_vm1, %v5874_v56  ;;  %v5884_v17 = vld [vmem:[#allocation2 + $0x30] sm:$0xff]   ;;  %v5907_v56 = vld [vmem:[#allocation2 + $0x18] sm:$0xff]   ;;  %v5910_v2 = vld [vmem:[#allocation2 + $0x20] sm:$0xff]  }
 0x198   : > { %5656 = vmatprep.mubr.msk.bf16.mxu1 %vm2722_vm1, %v5875_v3  ;;  %5721 = vmatpush3.bf16.msra.mxu1 %v4008_v1  ;;  %v5887_v23 = vld [vmem:[#allocation2 + $0x30] sm:$0xff]   ;;  %v5908_v61 = vld [vmem:[#allocation2 + $0x78] sm:$0xff]   ;;  %v5911_v3 = vld [vmem:[#allocation2 + $0x28] sm:$0xff]  }
 0x199   : > { %v1294_v36 = vpop.permute.xlu0 %1293  ;;  %5722 = vmatprep.subr.bf16.mxu1 %v5898_v62 }
 0x19a   : > { %v5876_v5 = vld [vmem:[#allocation2 + $0x38] sm:$0xff]   ;;  %v1296_v6 = vpop.permute.xlu1 %1295  ;;  %1382 = vst.msk [vmem:[#allocation2 + $0x80] sm:$0xf] %vm1349_vm14, %v1294_v36 }
 0x19b   : > { %1383 = vst.msk [vmem:[#allocation2 + $0x84] sm:$0xf] %vm1349_vm14, %v1296_v6  ;;  %5629 = vmatmul.mubr.msk.bf16.gmra.mxu0 %vm2722_vm1, %v5876_v5  ;;  %v5885_v38 = vld [vmem:[#allocation2 + $0x38] sm:$0xff]   ;;  %v5913_v5 = vld [vmem:[#allocation2 + $0x20] sm:$0xff]   ;;  %v5914_v6 = vld [vmem:[#allocation2 + $0x30] sm:$0xff]  }
 0x19c   : > { %5688 = vmatprep.mubr.msk.bf16.mxu0 %vm2722_vm1, %v5877_v42  ;;  %5723 = vmatpush3.bf16.msra.mxu1 %v5898_v62  ;;  %v5890_v41 = vld [vmem:[#allocation2 + $0x38] sm:$0xff]  }
 0x19d   : > { %v874_v7 = vpop.permute.xlu0 %873  ;;  %v5915_v42 = vld [vmem:[#allocation2 + $0x38] sm:$0xff]  }
 0x19e   : > { %v876_v0 = vpop.permute.xlu1 %875  ;;  %960 = vst.msk [vmem:[#allocation2 + $0x88] sm:$0xf] %vm925_vm13, %v874_v7  ;;  %v5916_v7 = vld [vmem:[#allocation2 + $0x28] sm:$0xff]  }
 0x19f   : > { %961 = vst.msk [vmem:[#allocation2 + $0x8c] sm:$0xf] %vm925_vm13, %v876_v0  ;;  %5657 = vmatmul.mubr.msk.bf16.gmra.mxu1 %vm2722_vm1, %v5878_v60  ;;  %v5917_v60 = vld [vmem:[#allocation2 + $0x30] sm:$0xff]   ;;  %v5918_v0 = vld [vmem:[#allocation2 + $0x40] sm:$0xff]  }
 0x1a0   : > { %5660 = vmatprep.mubr.msk.bf16.mxu1 %vm2722_vm1, %v5879_v8  ;;  %v5919_v8 = vld [vmem:[#allocation2 + $0x48] sm:$0xff]  }
 0x1a1   : > { %v2078_v9 = vpop.permute.xlu0 %2077 }
 0x1a2   : > { %v2080_v14 = vpop.permute.xlu1 %2079  ;;  %2166 = vst.msk [vmem:[#allocation2 + $0x80] sm:$0xf] %vm2133_vm15, %v2078_v9  ;;  %v5920_v9 = vld [vmem:[#allocation2 + $0x38] sm:$0xff]  }
 0x1a3   : > { %2167 = vst.msk [vmem:[#allocation2 + $0x84] sm:$0xf] %vm2133_vm15, %v2080_v14  ;;  %5689 = vmatmul.mubr.msk.bf16.vlgmr.msra.gmra.mxu0 %vm2722_vm1, %v5882_v11  ;;  %v5921_v11 = vld [vmem:[#allocation2 + $0x40] sm:$0xff]   ;;  %v5923_v14 = vld [vmem:[#allocation2 + $0x58] sm:$0xff]  }
 0x1a4   : > { %5757 = vmatpush3.bf16.msra.mxu0 %v4441_v13  ;;  %5692 = vmatprep.mubr.msk.bf16.mxu0 %vm2722_vm1, %v5883_v16  ;;  %v5922_v13 = vld [vmem:[#allocation2 + $0x50] sm:$0xff]  }
 0x1a5   : > { %v1298_v4 = vpop.permute.xlu0 %1297  ;;  %5758 = vmatprep.subr.bf16.mxu0 %v5899_v15  ;;  %v5925_v16 = vld [vmem:[#allocation2 + $0x50] sm:$0xff]  }
 0x1a6   : > { %v1300_v18 = vpop.permute.xlu1 %1299  ;;  %1384 = vst.msk [vmem:[#allocation2 + $0x88] sm:$0xf] %vm1349_vm14, %v1298_v4  ;;  %v5926_v4 = vld [vmem:[#allocation2 + $0x60] sm:$0xff]  }
 0x1a7   : > { %1385 = vst.msk [vmem:[#allocation2 + $0x8c] sm:$0xf] %vm1349_vm14, %v1300_v18  ;;  %5661 = vmatmul.mubr.msk.bf16.gmra.mxu1 %vm2722_vm1, %v5884_v17  ;;  %v5927_v17 = vld [vmem:[#allocation2 + $0x68] sm:$0xff]   ;;  %v5928_v18 = vld [vmem:[#allocation2 + $0x58] sm:$0xff]  }
 0x1a8   : > { %5664 = vmatprep.mubr.msk.bf16.mxu1 %vm2722_vm1, %v5885_v38  ;;  %5759 = vmatpush3.bf16.msra.mxu0 %v5899_v15  ;;  %v5924_v15 = vld [vmem:[#allocation2 + $0x48] sm:$0xff]   ;;  %v5929_v38 = vld [vmem:[#allocation2 + $0x60] sm:$0xff]  }
 0x1a9   : > { %v2502_v19 = vpop.permute.xlu0 %2501 }
 0x1aa   : > { %v2504_v22 = vpop.permute.xlu1 %2503  ;;  %2590 = vst.msk [vmem:[#allocation2 + $0x80] sm:$0xf] %vm2557_vm0, %v2502_v19  ;;  %v5930_v19 = vld [vmem:[#allocation2 + $0x70] sm:$0xff]  }
 0x1ab   : > { %2591 = vst.msk [vmem:[#allocation2 + $0x84] sm:$0xf] %vm2557_vm0, %v2504_v22  ;;  %5693 = vmatmul.mubr.msk.bf16.gmra.mxu0 %vm2722_vm1, %v5886_v20  ;;  %v5931_v20 = vld [vmem:[#allocation2 + $0x78] sm:$0xff]   ;;  %v5932_v22 = vld [vmem:[#allocation2 + $0x68] sm:$0xff]  }
 0x1ac   : > { %5696 = vmatprep.mubr.msk.bf16.mxu0 %vm2722_vm1, %v5887_v23  ;;  %v5933_v23 = vld [vmem:[#allocation2 + $0x70] sm:$0xff]  }
 0x1ad   : > { %v2082_v39 = vpop.permute.xlu0 %2081 }
 0x1ae   : > { %v2084_v25 = vpop.permute.xlu1 %2083  ;;  %2168 = vst.msk [vmem:[#allocation2 + $0x88] sm:$0xf] %vm2133_vm15, %v2082_v39 }
 0x1af   : > { %2169 = vst.msk [vmem:[#allocation2 + $0x8c] sm:$0xf] %vm2133_vm15, %v2084_v25  ;;  %5665 = vmatmul.mubr.msk.bf16.gmra.mxu1 %vm2722_vm1, %v5888_v24  ;;  %v5936_v25 = vld [vmem:[#allocation2 + $0x78] sm:$0xff]  }
 0x1b0   : > { %5668 = vmatprep.mubr.msk.bf16.mxu1 %vm2722_vm1, %v5889_v27 }
 0x1b1   : > { %v2506_v28 = vpop.permute.xlu0 %2505 }
 0x1b2   : > { %v2508_v21 = vpop.permute.xlu1 %2507  ;;  %2592 = vst.msk [vmem:[#allocation2 + $0x88] sm:$0xf] %vm2557_vm0, %v2506_v28  ;;  %v5906_v57 = vld [vmem:[#allocation2 + $0x80] sm:$0xff]  }
 0x1b3   : > { %2593 = vst.msk [vmem:[#allocation2 + $0x8c] sm:$0xf] %vm2557_vm0, %v2508_v21  ;;  %5697 = vmatmul.mubr.msk.bf16.gmra.mxu0 %vm2722_vm1, %v5890_v41  ;;  %v5909_v62 = vld [vmem:[#allocation2 + $0x80] sm:$0xff]  }
 0x1b4   : > { %5700 = vmatprep.mubr.msk.bf16.mxu0 %vm2722_vm1, %v5891_v29  ;;  %v5934_v39 = vld [vmem:[#allocation2 + $0x80] sm:$0xff]  }
 0x1b5   : > { %v878_v30 = vpop.permute.xlu0 %877  ;;  %v5937_v27 = vld [vmem:[#allocation2 + $0x80] sm:$0xff]  }
 0x1b6   : > { %v880_v32 = vpop.permute.xlu1 %879  ;;  %962 = vst.msk [vmem:[#allocation2 + $0x90] sm:$0xf] %vm925_vm13, %v878_v30  ;;  %v7394_v30 = vpop.f32.mrf.mxu1 }
 0x1b7   : > { %963 = vst.msk [vmem:[#allocation2 + $0x94] sm:$0xf] %vm925_vm13, %v880_v32  ;;  %5669 = vmatmul.mubr.msk.bf16.gmra.mxu1 %vm2722_vm1, %v5892_v31 }
 0x1b8   : > { %5672 = vmatprep.mubr.msk.bf16.mxu1 %vm2722_vm1, %v5893_v33  ;;  %v7396_v31 = vpop.f32.mrf.mxu1 }
 0x1b9   : > { %v1302_v34 = vpop.permute.xlu0 %1301 }
 0x1ba   : > { %v1304_v37 = vpop.permute.xlu1 %1303  ;;  %1386 = vst.msk [vmem:[#allocation2 + $0x90] sm:$0xf] %vm1349_vm14, %v1302_v34  ;;  %v5912_v36 = vld [vmem:[#allocation2 + $0x88] sm:$0xff]   ;;  %v7398_v32 = vpop.f32.mrf.mxu1 }
 0x1bb   : > { %1387 = vst.msk [vmem:[#allocation2 + $0x94] sm:$0xf] %vm1349_vm14, %v1304_v37  ;;  %5701 = vmatmul.mubr.msk.bf16.gmra.mxu0 %vm2722_vm1, %v5894_v35  ;;  %v5935_v24 = vld [vmem:[#allocation2 + $0x88] sm:$0xff]   ;;  %v5618_v34 = vpop.f32.mrf.mxu0 }
 0x1bc   : > { %5704 = vmatprep.mubr.msk.bf16.mxu0 %vm2722_vm1, %v5895_v10  ;;  %v5939_v21 = vld [vmem:[#allocation2 + $0x88] sm:$0xff]   ;;  %v7400_v33 = vpop.f32.mrf.mxu1 }
 0x1bd   : > { %v882_v43 = vpop.permute.xlu0 %881  ;;  %v2809_v37 = vpop.f32.mrf.mxu0 }
 0x1be   : > { %v884_v40 = vpop.permute.xlu1 %883  ;;  %964 = vst.msk [vmem:[#allocation2 + $0x98] sm:$0xf] %vm925_vm13, %v882_v43 }
 0x1bf   : > { %965 = vst.msk [vmem:[#allocation2 + $0x9c] sm:$0xf] %vm925_vm13, %v884_v40  ;;  %5673 = vmatmul.mubr.msk.bf16.gmra.mxu1 %vm2722_vm1, %v5896_v44  ;;  %v7406_v43 = vpop.f32.mrf.mxu0 }
 0x1c0   : > { %5676 = vmatprep.mubr.msk.bf16.mxu1 %vm2722_vm1, %v5897_v45 }
 0x1c1   : > { %v2086_v46 = vpop.permute.xlu0 %2085  ;;  %v7410_v40 = vpop.f32.mrf.mxu0 }
 0x1c2   : > { %v2088_v26 = vpop.permute.xlu1 %2087  ;;  %2170 = vst.msk [vmem:[#allocation2 + $0x90] sm:$0xf] %vm2133_vm15, %v2086_v46 }
 0x1c3   : > { %2171 = vst.msk [vmem:[#allocation2 + $0x94] sm:$0xf] %vm2133_vm15, %v2088_v26  ;;  %5705 = vmatmul.mubr.msk.bf16.gmra.mxu0 %vm2722_vm1, %v5900_v47 }
 0x1c4   : > { %5708 = vmatprep.mubr.msk.bf16.mxu0 %vm2722_vm1, %v5901_v48 }
 0x1c5   : > { %v1306_v49 = vpop.permute.xlu0 %1305 }
 0x1c6   : > { %v1308_v51 = vpop.permute.xlu1 %1307  ;;  %1388 = vst.msk [vmem:[#allocation2 + $0x98] sm:$0xf] %vm1349_vm14, %v1306_v49 }
 0x1c7   : > { %1389 = vst.msk [vmem:[#allocation2 + $0x9c] sm:$0xf] %vm1349_vm14, %v1308_v51  ;;  %5677 = vmatmul.mubr.msk.bf16.gmra.mxu1 %vm2722_vm1, %v5902_v50 }
 0x1c8   : > { %5680 = vmatprep.mubr.msk.bf16.mxu1 %vm2722_vm1, %v5903_v12 }
 0x1c9   : > { %v2510_v52 = vpop.permute.xlu0 %2509 }
 0x1ca   : > { %v2512_v54 = vpop.permute.xlu1 %2511  ;;  %2594 = vst.msk [vmem:[#allocation2 + $0x90] sm:$0xf] %vm2557_vm0, %v2510_v52 }
 0x1cb   : > { %2595 = vst.msk [vmem:[#allocation2 + $0x94] sm:$0xf] %vm2557_vm0, %v2512_v54  ;;  %5709 = vmatmul.mubr.msk.bf16.gmra.mxu0 %vm2722_vm1, %v5904_v53 }
 0x1cc   : > { %5712 = vmatprep.mubr.msk.bf16.mxu0 %vm2722_vm1, %v5905_v55 }
 0x1cd   : > { %v2090_v58 = vpop.permute.xlu0 %2089 }
 0x1ce   : > { %v2092_v59 = vpop.permute.xlu1 %2091  ;;  %2172 = vst.msk [vmem:[#allocation2 + $0x98] sm:$0xf] %vm2133_vm15, %v2090_v58 }
 0x1cf   : > { %2173 = vst.msk [vmem:[#allocation2 + $0x9c] sm:$0xf] %vm2133_vm15, %v2092_v59  ;;  %5681 = vmatmul.mubr.msk.bf16.gmra.mxu1 %vm2722_vm1, %v5906_v57  ;;  %v7402_v35 = vpop.f32.mrf.mxu1 }
 0x1d0   : > { %5724 = vmatprep.mubr.msk.bf16.mxu1 %vm2722_vm1, %v5907_v56 }
 0x1d1   : > { %v2514_v63 = vpop.permute.xlu0 %2513  ;;  %v7404_v10 = vpop.f32.mrf.mxu1 }
 0x1d2   : > { %v2516_v1 = vpop.permute.xlu1 %2515  ;;  %2596 = vst.msk [vmem:[#allocation2 + $0x98] sm:$0xf] %vm2557_vm0, %v2514_v63  ;;  %v5938_v28 = vld [vmem:[#allocation2 + $0x90] sm:$0xff]   ;;  %7756 = vst [vmem:[#allocation10_spill] sm:$0xff] %v7404_v10 }
 0x1d3   : > { %2597 = vst.msk [vmem:[#allocation2 + $0x9c] sm:$0xf] %vm2557_vm0, %v2516_v1  ;;  %5713 = vmatmul.mubr.msk.bf16.gmra.mxu0 %vm2722_vm1, %v5908_v61  ;;  %v5940_v41 = vld [vmem:[#allocation2 + $0x90] sm:$0xff]   ;;  %v7408_v44 = vpop.f32.mrf.mxu1 }
 0x1d4   : > { %5716 = vmatprep.mubr.msk.bf16.mxu0 %vm2722_vm1, %v5909_v62  ;;  %7757 = vst [vmem:[#allocation11_spill] sm:$0xff] %v7408_v44 }
 0x1d5   : > { %v7412_v45 = vpop.f32.mrf.mxu1 }
 0x1d6   : > { %7758 = vst [vmem:[#allocation12_spill] sm:$0xff] %v7412_v45 }
 0x1d7   : > { %5725 = vmatmul.mubr.msk.bf16.vlgmr.msra.gmra.mxu1 %vm2722_vm1, %v5910_v2 }
 0x1d8   : > { %5728 = vmatprep.mubr.msk.bf16.mxu1 %vm2722_vm1, %v5911_v3 }
 0x1da   : > { %v5941_v29 = vld [vmem:[#allocation2 + $0x98] sm:$0xff]  }
 0x1db   : > { %5717 = vmatmul.mubr.msk.bf16.gmra.mxu0 %vm2722_vm1, %v5912_v36  ;;  %v5622_v46 = vpop.f32.mrf.mxu0 }
 0x1dc   : > { %5760 = vmatprep.mubr.msk.bf16.mxu0 %vm2722_vm1, %v5913_v5 }
 0x1dd   : > { %v7416_v26 = vpop.f32.mrf.mxu0 }
 0x1df   : > { %5729 = vmatmul.mubr.msk.bf16.gmra.mxu1 %vm2722_vm1, %v5914_v6  ;;  %v7420_v49 = vpop.f32.mrf.mxu0 }
 0x1e0   : > { %5732 = vmatprep.mubr.msk.bf16.mxu1 %vm2722_vm1, %v5915_v42 }
 0x1e1   : > { %v7424_v51 = vpop.f32.mrf.mxu0 }
 0x1e3   : > { %5761 = vmatmul.mubr.msk.bf16.vlgmr.msra.gmra.mxu0 %vm2722_vm1, %v5916_v7 }
 0x1e4   : > { %5764 = vmatprep.mubr.msk.bf16.mxu0 %vm2722_vm1, %v5917_v60 }
 0x1e7   : > { %5733 = vmatmul.mubr.msk.bf16.gmra.mxu1 %vm2722_vm1, %v5918_v0 }
 0x1e8   : > { %5736 = vmatprep.mubr.msk.bf16.mxu1 %vm2722_vm1, %v5919_v8 }
 0x1eb   : > { %5765 = vmatmul.mubr.msk.bf16.gmra.mxu0 %vm2722_vm1, %v5920_v9 }
 0x1ec   : > { %5768 = vmatprep.mubr.msk.bf16.mxu0 %vm2722_vm1, %v5921_v11 }
 0x1ef   : > { %5737 = vmatmul.mubr.msk.bf16.gmra.mxu1 %vm2722_vm1, %v5922_v13 }
 0x1f0   : > { %5740 = vmatprep.mubr.msk.bf16.mxu1 %vm2722_vm1, %v5923_v14 }
 0x1f3   : > { %5769 = vmatmul.mubr.msk.bf16.gmra.mxu0 %vm2722_vm1, %v5924_v15 }
 0x1f4   : > { %5772 = vmatprep.mubr.msk.bf16.mxu0 %vm2722_vm1, %v5925_v16 }
 0x1f7   : > { %5741 = vmatmul.mubr.msk.bf16.gmra.mxu1 %vm2722_vm1, %v5926_v4 }
 0x1f8   : > { %5744 = vmatprep.mubr.msk.bf16.mxu1 %vm2722_vm1, %v5927_v17 }
 0x1fb   : > { %5773 = vmatmul.mubr.msk.bf16.gmra.mxu0 %vm2722_vm1, %v5928_v18 }
 0x1fc   : > { %5776 = vmatprep.mubr.msk.bf16.mxu0 %vm2722_vm1, %v5929_v38 }
 0x1ff   : > { %5745 = vmatmul.mubr.msk.bf16.gmra.mxu1 %vm2722_vm1, %v5930_v19 }
 0x200   : > { %5748 = vmatprep.mubr.msk.bf16.mxu1 %vm2722_vm1, %v5931_v20 }
 0x203   : > { %5777 = vmatmul.mubr.msk.bf16.gmra.mxu0 %vm2722_vm1, %v5932_v22 }
 0x204   : > { %5780 = vmatprep.mubr.msk.bf16.mxu0 %vm2722_vm1, %v5933_v23 }
 0x207   : > { %5749 = vmatmul.mubr.msk.bf16.gmra.mxu1 %vm2722_vm1, %v5934_v39 }
 0x208   : > { %5752 = vmatprep.mubr.msk.bf16.mxu1 %vm2722_vm1, %v5935_v24 }
 0x20b   : > { %5781 = vmatmul.mubr.msk.bf16.gmra.mxu0 %vm2722_vm1, %v5936_v25 }
 0x20c   : > { %5784 = vmatprep.mubr.msk.bf16.mxu0 %vm2722_vm1, %v5937_v27 }
 0x20f   : > { %5753 = vmatmul.mubr.msk.bf16.gmra.mxu1 %vm2722_vm1, %v5938_v28  ;;  %v7414_v47 = vpop.f32.mrf.mxu1 }
 0x211   : > { %v7418_v48 = vpop.f32.mrf.mxu1 }
 0x212   : > { %7759 = vst [vmem:[#allocation13_spill] sm:$0xff] %v7418_v48 }
 0x213   : > { %5785 = vmatmul.mubr.msk.bf16.gmra.mxu0 %vm2722_vm1, %v5939_v21  ;;  %v7422_v50 = vpop.f32.mrf.mxu1 }
 0x214   : > { %5788 = vmatprep.mubr.msk.bf16.mxu0 %vm2722_vm1, %v5940_v41  ;;  %7760 = vst [vmem:[#allocation14_spill] sm:$0xff] %v7422_v50 }
 0x215   : > { %v7426_v12 = vpop.f32.mrf.mxu1 }
 0x216   : > { %7761 = vst [vmem:[#allocation15_spill] sm:$0xff] %v7426_v12 }
 0x21b   : > { %5789 = vmatmul.mubr.msk.bf16.gmra.mxu0 %vm2722_vm1, %v5941_v29  ;;  %v5626_v52 = vpop.f32.mrf.mxu0 }
 0x21d   : > { %v7430_v54 = vpop.f32.mrf.mxu0 }
 0x21f   : > { %v7436_v58 = vpop.f32.mrf.mxu0 }
 0x221   : > { %v7440_v62 = vpop.f32.mrf.mxu0 }
 0x24f   : > { %v7428_v53 = vpop.f32.mrf.mxu1 }
 0x251   : > { %v7432_v55 = vpop.f32.mrf.mxu1 }
 0x252   : > { %7762 = vst [vmem:[#allocation16_spill] sm:$0xff] %v7432_v55 }
 0x253   : > { %v7434_v57 = vpop.f32.mrf.mxu1 }
 0x254   : > { %7763 = vst [vmem:[#allocation17_spill] sm:$0xff] %v7434_v57 }
 0x255   : > { %v7438_v59 = vpop.f32.mrf.mxu1 }
 0x256   : > { %7764 = vst [vmem:[#allocation18_spill] sm:$0xff] %v7438_v59 }
 0x257   : > { %v5654_v56 = vpop.f32.mrf.mxu1 }
 0x258   : > { %v3339_v7 = vadd.f32 %v5654_v56, %v5618_v34 }
 0x259   : > { %v3178_v63 = vpop.f32.mrf.mxu1 }
 0x25a   : > { %v3337_v8 = vadd.f32 %v3178_v63, %v2809_v37 }
 0x25b   : > { %v5630_v61 = vpop.f32.mrf.mxu0  ;;  %v7442_v1 = vpop.f32.mrf.mxu1 }
 0x25d   : > { %v7444_v2 = vpop.f32.mrf.mxu0  ;;  %v7446_v3 = vpop.f32.mrf.mxu1 }
 0x25f   : > { %v7448_v36 = vpop.f32.mrf.mxu0  ;;  %v5658_v5 = vpop.f32.mrf.mxu1 }
 0x260   : > { %v3343_v18 = vadd.f32 %v5658_v5, %v5622_v46 }
 0x261   : > { %v7450_v6 = vpop.f32.mrf.mxu0  ;;  %v7452_v42 = vpop.f32.mrf.mxu1 }
 0x263   : > { %v7454_v60 = vpop.f32.mrf.mxu1  ;;  %v5690_v0 = vpop.f32.mrf.mxu0 }
 0x264   : > { %v7456_v9 = vadd.f32 %v5690_v0, %v3339_v7 }
 0x265   : > { %v7458_v11 = vpop.f32.mrf.mxu1  ;;  %v3611_v13 = vpop.f32.mrf.mxu0 }
 0x266   : > { %v7460_v14 = vadd.f32 %v3611_v13, %v3337_v8 }
 0x267   : > { %v5662_v15 = vpop.f32.mrf.mxu1  ;;  %v7462_v16 = vpop.f32.mrf.mxu0 }
 0x268   : > { %v3347_v41 = vadd.f32 %v5662_v15, %v5626_v52 }
 0x269   : > { %v7464_v4 = vpop.f32.mrf.mxu1  ;;  %v7466_v17 = vpop.f32.mrf.mxu0 }
 0x26b   : > { %v7468_v38 = vpop.f32.mrf.mxu1  ;;  %v5694_v19 = vpop.f32.mrf.mxu0 }
 0x26c   : > { %v7470_v20 = vadd.f32 %v5694_v19, %v3343_v18 }
 0x26d   : > { %v7472_v22 = vpop.f32.mrf.mxu1  ;;  %v7474_v23 = vpop.f32.mrf.mxu0 }
 0x26f   : > { %v5666_v39 = vpop.f32.mrf.mxu1  ;;  %v7476_v24 = vpop.f32.mrf.mxu0 }
 0x270   : > { %v3351_v25 = vadd.f32 %v5666_v39, %v5630_v61 }
 0x271   : > { %v7478_v27 = vpop.f32.mrf.mxu1  ;;  %v7480_v28 = vpop.f32.mrf.mxu0 }
 0x273   : > { %v7482_v21 = vpop.f32.mrf.mxu1  ;;  %v5698_v29 = vpop.f32.mrf.mxu0 }
 0x274   : > { %v7484_v34 = vadd.f32 %v5698_v29, %v3347_v41 }
 0x275   : > { %v7486_v37 = vpop.f32.mrf.mxu1  ;;  %v7488_v46 = vpop.f32.mrf.mxu0 }
 0x277   : > { %v5670_v56 = vpop.f32.mrf.mxu1  ;;  %v7490_v63 = vpop.f32.mrf.mxu0 }
 0x278   : > { %v3355_v41 = vadd.f32 %v5670_v56, %v7394_v30 }
 0x279   : > { %v7492_v5 = vpop.f32.mrf.mxu1  ;;  %v7494_v61 = vpop.f32.mrf.mxu0 }
 0x27b   : > { %v7496_v7 = vpop.f32.mrf.mxu1  ;;  %v5702_v0 = vpop.f32.mrf.mxu0 }
 0x27c   : > { %v7498_v52 = vadd.f32 %v5702_v0, %v3351_v25 }
 0x27d   : > { %v7500_v8 = vpop.f32.mrf.mxu1  ;;  %v7502_v13 = vpop.f32.mrf.mxu0 }
 0x27e   : > { %7765 = vst [vmem:[#allocation19_spill] sm:$0xff] %v7500_v8 }
 0x27f   : > { %v5674_v15 = vpop.f32.mrf.mxu1  ;;  %v7504_v18 = vpop.f32.mrf.mxu0 }
 0x280   : > { %v3359_v45 = vadd.f32 %v5674_v15, %v7402_v35 }
 0x281   : > { %v7506_v19 = vpop.f32.mrf.mxu1  ;;  %v7508_v39 = vpop.f32.mrf.mxu0 }
 0x282   : > { %7766 = vst [vmem:[#allocation20_spill] sm:$0xff] %v7506_v19 }
 0x283   : > { %v7511_v29 = vpop.f32.mrf.mxu1  ;;  %v5706_v59 = vpop.f32.mrf.mxu0 }
 0x284   : > { %7767 = vst [vmem:[#allocation21_spill] sm:$0xff] %v7511_v29  ;;  %v7513_v57 = vadd.f32 %v5706_v59, %v3355_v41 }
 0x285   : > { %v7515_v25 = vpop.f32.mrf.mxu1  ;;  %v7517_v0 = vpop.f32.mrf.mxu0 }
 0x286   : > { %7768 = vst [vmem:[#allocation22_spill] sm:$0xff] %v7513_v57  ;;  %7769 = vst [vmem:[#allocation23_spill] sm:$0xff] %v7515_v25 }
 0x287   : > { %v5678_v55 = vpop.f32.mrf.mxu1  ;;  %v7519_v12 = vpop.f32.mrf.mxu0 }
 0x288   : > { %7770 = vst [vmem:[#allocation24_spill] sm:$0xff] %v7519_v12  ;;  %v3363_v35 = vadd.f32 %v5678_v55, %v7414_v47 }
 0x289   : > { %v7521_v50 = vpop.f32.mrf.mxu1  ;;  %v7523_v48 = vpop.f32.mrf.mxu0 }
 0x28a   : > { %7771 = vst [vmem:[#allocation25_spill] sm:$0xff] %v7521_v50  ;;  %7772 = vst [vmem:[#allocation26_spill] sm:$0xff] %v7523_v48 }
 0x28b   : > { %v7526_v44 = vpop.f32.mrf.mxu1  ;;  %v5710_v30 = vpop.f32.mrf.mxu0 }
 0x28c   : > { %7773 = vst [vmem:[#allocation27_spill] sm:$0xff] %v7526_v44  ;;  %v7528_v56 = vadd.f32 %v5710_v30, %v3359_v45 }
 0x28d   : > { %v7530_v59 = vpop.f32.mrf.mxu1  ;;  %v7532_v41 = vpop.f32.mrf.mxu0 }
 0x28e   : > { %7774 = vst [vmem:[#allocation28_spill] sm:$0xff] %v7528_v56  ;;  %7775 = vst [vmem:[#allocation29_spill] sm:$0xff] %v7530_v59 }
 0x28f   : > { %7776 = vst [vmem:[#allocation30_spill] sm:$0xff] %v7532_v41  ;;  %v5682_v25 = vpop.f32.mrf.mxu1  ;;  %v7534_v29 = vpop.f32.mrf.mxu0 }
 0x290   : > { %7777 = vst [vmem:[#allocation31_spill] sm:$0xff] %v7534_v29  ;;  %v3367_v57 = vadd.f32 %v5682_v25, %v7428_v53 }
 0x291   : > { %v7537_v19 = vpop.f32.mrf.mxu1  ;;  %v7539_v50 = vpop.f32.mrf.mxu0 }
 0x292   : > { %7778 = vst [vmem:[#allocation32_spill] sm:$0xff] %v7537_v19  ;;  %7779 = vst [vmem:[#allocation33_spill] sm:$0xff] %v7539_v50 }
 0x293   : > { %v7542_v15 = vpop.f32.mrf.mxu1  ;;  %v5714_v44 = vpop.f32.mrf.mxu0 }
 0x294   : > { %7780 = vst [vmem:[#allocation34_spill] sm:$0xff] %v7542_v15  ;;  %v7544_v45 = vadd.f32 %v5714_v44, %v3363_v35 }
 0x295   : > { %v7546_v30 = vpop.f32.mrf.mxu1  ;;  %v7548_v59 = vpop.f32.mrf.mxu0 }
 0x296   : > { %7781 = vst [vmem:[#allocation35_spill] sm:$0xff] %v7544_v45  ;;  %7782 = vst [vmem:[#allocation36_spill] sm:$0xff] %v7546_v30  ;;  %v3340_v45 = vadd.f32 %v7442_v1, %v7406_v43  ;;  %v3341_v43 = vadd.f32 %v7452_v42, %v7416_v26 }
 0x297   : > { %7783 = vst [vmem:[#allocation37_spill] sm:$0xff] %v7548_v59  ;;  %v7550_v56 = vpop.f32.mrf.mxu0  ;;  %v5726_v29 = vpop.f32.mrf.mxu1 }
 0x298   : > { %7784 = vst [vmem:[#allocation38_spill] sm:$0xff] %v7550_v56 }
 0x299   : > { %v7552_v53 = vpop.f32.mrf.mxu0  ;;  %v4044_v25 = vpop.f32.mrf.mxu1 }
 0x29a   : > { %7785 = vst [vmem:[#allocation39_spill] sm:$0xff] %v7552_v53  ;;  %v4203_v53 = vadd.f32 %v4044_v25, %v7460_v14  ;;  %v3342_v14 = vadd.f32 %v7458_v11, %v7424_v51 }
 0x29b   : > { %v5718_v19 = vpop.f32.mrf.mxu0  ;;  %v5727_v50 = vpop.f32.mrf.mxu1 }
 0x29c   : > { %v7554_v41 = vadd.f32 %v5718_v19, %v3367_v57  ;;  %v3338_v57 = vadd.f32 %v7446_v3, %v7410_v40  ;;  %v3773_v19 = vadd.f32 %v7462_v16, %v3340_v45  ;;  %v3774_v45 = vadd.f32 %v7474_v23, %v3341_v43 }
 0x29d   : > { %v7556_v47 = vpop.f32.mrf.mxu0  ;;  %v4047_v55 = vpop.f32.mrf.mxu1 }
 0x29e   : > { %7786 = vst [vmem:[#allocation40_spill] sm:$0xff] %v7554_v41  ;;  %7787 = vst [vmem:[#allocation41_spill] sm:$0xff] %v7556_v47  ;;  %v4206_v10 = vadd.f32 %v5727_v50, %v3773_v19  ;;  %v3344_v50 = vadd.f32 %v7454_v60, %v7420_v49 }
 0x29f   : > { %v7558_v44 = vpop.f32.mrf.mxu0  ;;  %v5730_v35 = vpop.f32.mrf.mxu1 }
 0x2a0   : > { %7788 = vst [vmem:[#allocation42_spill] sm:$0xff] %v7558_v44  ;;  %v3771_v44 = vadd.f32 %v7466_v17, %v3338_v57 }
 0x2a1   : > { %v7560_v30 = vpop.f32.mrf.mxu0  ;;  %v4060_v15 = vpop.f32.mrf.mxu1 }
 0x2a2   : > { %7789 = vst [vmem:[#allocation43_spill] sm:$0xff] %v7560_v30  ;;  %v4205_v30 = vadd.f32 %v5726_v29, %v7456_v9  ;;  %v4204_v12 = vadd.f32 %v4047_v55, %v3771_v44  ;;  %v4207_v26 = vadd.f32 %v4060_v15, %v3774_v45 }
 0x2a3   : > { %v5731_v56 = vpop.f32.mrf.mxu1  ;;  %v5762_v59 = vpop.f32.mrf.mxu0 }
 0x2a4   : > { %v4638_v40 = vadd.f32 %v5762_v59, %v4205_v30  ;;  %v3775_v59 = vadd.f32 %v7480_v28, %v3342_v14 }
 0x2a5   : > { %v4063_v41 = vpop.f32.mrf.mxu1  ;;  %v4477_v47 = vpop.f32.mrf.mxu0 }
 0x2a6   : > { %v4636_v3 = vadd.f32 %v4477_v47, %v4203_v53  ;;  %v4932_v30 = vmul.f32 %v4638_v40, %v4638_v40  ;;  %v3345_v53 = vadd.f32 %v7464_v4, %v7430_v54  ;;  %v4209_v47 = vadd.f32 %v5730_v35, %v7470_v20 }
 0x2a7   : > { %v7576_v1 = vpop.f32.mrf.mxu1  ;;  %v5763_v48 = vpop.f32.mrf.mxu0  ;;  %v4208_v43 = vadd.f32 %v4063_v41, %v3775_v59  ;;  %v3348_v20 = vadd.f32 %v7468_v38, %v7436_v58 }
 0x2a8   : > { %v4639_v16 = vadd.f32 %v5763_v48, %v4206_v10  ;;  %v4930_v25 = vmul.f32 %v4636_v3, %v4636_v3  ;;  %v3778_v45 = vadd.f32 %v7488_v46, %v3345_v53 }
 0x2a9   : > { %v4076_v8 = vpop.f32.mrf.mxu1  ;;  %v4480_v17 = vpop.f32.mrf.mxu0 }
 0x2aa   : > { %v5435_v57 = vpack.c.bf16 %v4639_v16, %v4638_v40  ;;  %v4637_v9 = vadd.f32 %v4480_v17, %v4204_v12  ;;  %v3777_v12 = vadd.f32 %v7476_v24, %v3344_v50  ;;  %v4933_v24 = vmul.f32 %v4639_v16, %v4639_v16 }
 0x2ab   : > { %v5735_v42 = vpop.f32.mrf.mxu1  ;;  %v5766_v29 = vpop.f32.mrf.mxu0  ;;  %v4211_v41 = vadd.f32 %v4076_v8, %v3778_v45  ;;  %v4213_v8 = vadd.f32 %v7576_v1, %v7484_v34  ;;  %v3352_v34 = vadd.f32 %v7482_v21, %v7448_v36  ;;  %v3350_v1 = vadd.f32 %v7486_v37, %v7450_v6 }
 0x2ac   : > { %5507 = vst [vmem:[%s7583_s11 + $0x8] sm:$0xff] %v5435_v57   ;;  %v5430_v10 = vpack.c.bf16 %v4637_v9, %v4636_v3  ;;  %v4892_v48 = vadd.f32 %v4637_v9, %v4636_v3  ;;  %v4931_v23 = vmul.f32 %v4637_v9, %v4637_v9  ;;  %v4210_v55 = vadd.f32 %v5731_v56, %v3777_v12 }
 0x2ad   : > { %v4079_v49 = vpop.f32.mrf.mxu1  ;;  %v4493_v60 = vpop.f32.mrf.mxu0  ;;  %v4642_v17 = vadd.f32 %v5766_v29, %v4209_v47  ;;  %v3346_v56 = vadd.f32 %v7472_v22, %v7440_v62  ;;  %v3349_v22 = vadd.f32 %v7478_v27, %v7444_v2  ;;  %v3353_v37 = vadd.f32 %v7492_v5, %v7396_v31 }
 0x2ae   : > { %5431 = vst [vmem:[%s7583_s11] sm:$0xff] %v5430_v10   ;;  %v4893_v51 = vadd.f32 %v4892_v48, %v4638_v40  ;;  %v4962_v11 = vadd.f32 %v4931_v23, %v4930_v25  ;;  %v4640_v15 = vadd.f32 %v4493_v60, %v4207_v26  ;;  %v3781_v48 = vadd.f32 %v7490_v63, %v3348_v20 }
 0x2af   : > { %v7592_v44 = vpop.f32.mrf.mxu1  ;;  %v5767_v19 = vpop.f32.mrf.mxu0  ;;  %v3779_v23 = vadd.f32 %v7494_v61, %v3346_v56  ;;  %v4936_v58 = vmul.f32 %v4642_v17, %v4642_v17  ;;  %v3782_v47 = vadd.f32 %v7502_v13, %v3349_v22 }
 0x2b0   : > { %v4963_v3 = vadd.f32 %v4962_v11, %v4932_v30  ;;  %v4894_v28 = vadd.f32 %v4893_v51, %v4639_v16  ;;  %v4643_v57 = vadd.f32 %v5767_v19, %v4210_v55  ;;  %v4934_v14 = vmul.f32 %v4640_v15, %v4640_v15 }
 0x2b1   : > { %v4092_v40 = vpop.f32.mrf.mxu1  ;;  %v4496_v9 = vpop.f32.mrf.mxu0  ;;  %v4214_v30 = vadd.f32 %v5735_v42, %v3781_v48  ;;  %v4212_v11 = vadd.f32 %v4079_v49, %v3779_v23 }
 0x2b2   : > { %v4895_v50 = vadd.f32 %v4894_v28, %v4640_v15  ;;  %v4964_v54 = vadd.f32 %v4963_v3, %v4933_v24  ;;  %v4641_v4 = vadd.f32 %v4496_v9, %v4208_v43  ;;  %v5445_v35 = vpack.c.bf16 %v4643_v57, %v4642_v17 }
 0x2b3   : > { %v5739_v16 = vpop.f32.mrf.mxu1  ;;  %v5770_v46 = vpop.f32.mrf.mxu0  ;;  %v4937_v61 = vmul.f32 %v4643_v57, %v4643_v57  ;;  %v4215_v42 = vadd.f32 %v4092_v40, %v3782_v47  ;;  %v4217_v40 = vadd.f32 %v7592_v44, %v7498_v52  ;;  %v3356_v52 = vadd.f32 %v7496_v7, %v7398_v32  ;;  %v7790_v44 = vld [vmem:[#allocation19_spill] sm:$0xff] }
 0x2b4   : > { %v4965_v26 = vadd.f32 %v4964_v54, %v4934_v14  ;;  %v5440_v29 = vpack.c.bf16 %v4641_v4, %v4640_v15  ;;  %v4896_v25 = vadd.f32 %v4895_v50, %v4641_v4  ;;  %v4935_v10 = vmul.f32 %v4641_v4, %v4641_v4  ;;  %5509 = vst [vmem:[%s7583_s11 + $0x18] sm:$0xff] %v5445_v35  }
 0x2b5   : > { %v4095_v12 = vpop.f32.mrf.mxu1  ;;  %v4509_v59 = vpop.f32.mrf.mxu0  ;;  %v4646_v55 = vadd.f32 %v5770_v46, %v4213_v8  ;;  %v3785_v14 = vadd.f32 %v7504_v18, %v3352_v34  ;;  %v3783_v54 = vadd.f32 %v7508_v39, %v3350_v1 }
 0x2b6   : > { %5508 = vst [vmem:[%s7583_s11 + $0x10] sm:$0xff] %v5440_v29   ;;  %v4897_v38 = vadd.f32 %v4896_v25, %v4642_v17  ;;  %v4966_v60 = vadd.f32 %v4965_v26, %v4935_v10  ;;  %v4644_v62 = vadd.f32 %v4509_v59, %v4211_v41  ;;  %v3786_v25 = vadd.f32 %v7517_v0, %v3353_v37  ;;  %v7797_v37 = vld [vmem:[#allocation11_spill] sm:$0xff] }
 0x2b7   : > { %v7607_v51 = vpop.f32.mrf.mxu1  ;;  %v5771_v63 = vpop.f32.mrf.mxu0  ;;  %v4940_v36 = vmul.f32 %v4646_v55, %v4646_v55  ;;  %v4218_v41 = vadd.f32 %v5739_v16, %v3785_v14  ;;  %v4216_v46 = vadd.f32 %v4095_v12, %v3783_v54  ;;  %v3354_v16 = vadd.f32 %v7790_v44, %v7400_v33 }
 0x2b8   : > { %v4967_v15 = vadd.f32 %v4966_v60, %v4936_v58  ;;  %v4898_v53 = vadd.f32 %v4897_v38, %v4643_v57  ;;  %v4647_v19 = vadd.f32 %v5771_v63, %v4214_v30  ;;  %v4938_v2 = vmul.f32 %v4644_v62, %v4644_v62 }
 0x2b9   : > { %v4108_v43 = vpop.f32.mrf.mxu1  ;;  %v4512_v24 = vpop.f32.mrf.mxu0 }
 0x2ba   : > { %v4899_v3 = vadd.f32 %v4898_v53, %v4644_v62  ;;  %v4968_v27 = vadd.f32 %v4967_v15, %v4937_v61  ;;  %v4645_v28 = vadd.f32 %v4512_v24, %v4212_v11  ;;  %v5455_v49 = vpack.c.bf16 %v4647_v19, %v4646_v55  ;;  %v7791_v11 = vld [vmem:[#allocation24_spill] sm:$0xff]  ;;  %v7792_v15 = vld [vmem:[#allocation26_spill] sm:$0xff] }
 0x2bb   : > { %v5743_v45 = vpop.f32.mrf.mxu1  ;;  %v5774_v13 = vpop.f32.mrf.mxu0  ;;  %v4941_v39 = vmul.f32 %v4647_v19, %v4647_v19  ;;  %v4219_v12 = vadd.f32 %v4108_v43, %v3786_v25  ;;  %v3789_v61 = vadd.f32 %v7791_v11, %v3356_v52  ;;  %v3787_v53 = vadd.f32 %v7792_v15, %v3354_v16  ;;  %v7793_v43 = vld [vmem:[#allocation10_spill] sm:$0xff]  ;;  %v7794_v24 = vld [vmem:[#allocation20_spill] sm:$0xff] }
 0x2bc   : > { %v4969_v17 = vadd.f32 %v4968_v27, %v4938_v2  ;;  %v5450_v57 = vpack.c.bf16 %v4645_v28, %v4644_v62  ;;  %v4900_v9 = vadd.f32 %v4899_v3, %v4645_v28  ;;  %v4939_v50 = vmul.f32 %v4645_v28, %v4645_v28  ;;  %5511 = vst [vmem:[%s7583_s11 + $0x28] sm:$0xff] %v5455_v49   ;;  %v7795_v2 = vld [vmem:[#allocation22_spill] sm:$0xff] }
 0x2bd   : > { %v4111_v4 = vpop.f32.mrf.mxu1  ;;  %v4525_v20 = vpop.f32.mrf.mxu0  ;;  %v4650_v10 = vadd.f32 %v5774_v13, %v4217_v40  ;;  %v3357_v3 = vadd.f32 %v7794_v24, %v7793_v43  ;;  %v4221_v27 = vadd.f32 %v7607_v51, %v7795_v2  ;;  %v4222_v28 = vadd.f32 %v5743_v45, %v3789_v61  ;;  %v7798_v51 = vld [vmem:[#allocation21_spill] sm:$0xff]  ;;  %v7799_v40 = vld [vmem:[#allocation12_spill] sm:$0xff] }
 0x2be   : > { %5510 = vst [vmem:[%s7583_s11 + $0x20] sm:$0xff] %v5450_v57   ;;  %v4901_v21 = vadd.f32 %v4900_v9, %v4646_v55  ;;  %v4970_v56 = vadd.f32 %v4969_v17, %v4939_v50  ;;  %v4648_v6 = vadd.f32 %v4525_v20, %v4215_v42  ;;  %v4220_v42 = vadd.f32 %v4111_v4, %v3787_v53  ;;  %v7796_v57 = vld [vmem:[#allocation30_spill] sm:$0xff] }
 0x2bf   : > { %v7622_v35 = vpop.f32.mrf.mxu1  ;;  %v5775_v18 = vpop.f32.mrf.mxu0  ;;  %v4944_v32 = vmul.f32 %v4650_v10, %v4650_v10  ;;  %v3790_v9 = vadd.f32 %v7796_v57, %v3357_v3  ;;  %v3360_v45 = vadd.f32 %v7798_v51, %v7797_v37 }
 0x2c0   : > { %v4971_v26 = vadd.f32 %v4970_v56, %v4940_v36  ;;  %v4902_v29 = vadd.f32 %v4901_v21, %v4647_v19  ;;  %v4651_v48 = vadd.f32 %v5775_v18, %v4218_v41  ;;  %v4942_v31 = vmul.f32 %v4648_v6, %v4648_v6  ;;  %v7800_v41 = vld [vmem:[#allocation23_spill] sm:$0xff] }
 0x2c1   : > { %v4124_v23 = vpop.f32.mrf.mxu1  ;;  %v4528_v59 = vpop.f32.mrf.mxu0  ;;  %v3358_v4 = vadd.f32 %v7800_v41, %v7799_v40 }
 0x2c2   : > { %v4903_v58 = vadd.f32 %v4902_v29, %v4648_v6  ;;  %v4972_v5 = vadd.f32 %v4971_v26, %v4941_v39  ;;  %v4649_v38 = vadd.f32 %v4528_v59, %v4216_v46  ;;  %v5465_v60 = vpack.c.bf16 %v4651_v48, %v4650_v10  ;;  %v7801_v59 = vld [vmem:[#allocation31_spill] sm:$0xff] }
 0x2c3   : > { %v5747_v62 = vpop.f32.mrf.mxu1  ;;  %v5778_v0 = vpop.f32.mrf.mxu0  ;;  %v4945_v49 = vmul.f32 %v4651_v48, %v4651_v48  ;;  %v4223_v18 = vadd.f32 %v4124_v23, %v3790_v9  ;;  %v7803_v23 = vld [vmem:[#allocation13_spill] sm:$0xff] }
 0x2c4   : > { %v4973_v22 = vadd.f32 %v4972_v5, %v4942_v31  ;;  %v5460_v8 = vpack.c.bf16 %v4649_v38, %v4648_v6  ;;  %v4904_v30 = vadd.f32 %v4903_v58, %v4649_v38  ;;  %v4943_v63 = vmul.f32 %v4649_v38, %v4649_v38  ;;  %5513 = vst [vmem:[%s7583_s11 + $0x38] sm:$0xff] %v5465_v60   ;;  %v7802_v31 = vld [vmem:[#allocation33_spill] sm:$0xff] }
 0x2c5   : > { %v4127_v47 = vpop.f32.mrf.mxu1  ;;  %v4541_v55 = vpop.f32.mrf.mxu0  ;;  %v4654_v50 = vadd.f32 %v5778_v0, %v4221_v27  ;;  %v3793_v58 = vadd.f32 %v7801_v59, %v3360_v45  ;;  %v3791_v5 = vadd.f32 %v7802_v31, %v3358_v4  ;;  %v7804_v0 = vld [vmem:[#allocation25_spill] sm:$0xff]  ;;  %v7815_v31 = vld [vmem:[#allocation32_spill] sm:$0xff] }
 0x2c6   : > { %5512 = vst [vmem:[%s7583_s11 + $0x30] sm:$0xff] %v5460_v8   ;;  %v4905_v7 = vadd.f32 %v4904_v30, %v4650_v10  ;;  %v4974_v19 = vadd.f32 %v4973_v22, %v4943_v63  ;;  %v4652_v33 = vadd.f32 %v4541_v55, %v4219_v12  ;;  %v3361_v22 = vadd.f32 %v7804_v0, %v7803_v23  ;;  %v7805_v8 = vld [vmem:[#allocation28_spill] sm:$0xff] }
 0x2c7   : > { %v5750_v34 = vpop.f32.mrf.mxu1  ;;  %v5779_v1 = vpop.f32.mrf.mxu0  ;;  %v4948_v44 = vmul.f32 %v4654_v50, %v4654_v50  ;;  %v4225_v30 = vadd.f32 %v7622_v35, %v7805_v8  ;;  %v4226_v63 = vadd.f32 %v5747_v62, %v3793_v58  ;;  %v4224_v61 = vadd.f32 %v4127_v47, %v3791_v5  ;;  %v7809_v62 = vld [vmem:[#allocation38_spill] sm:$0xff]  ;;  %v7814_v58 = vld [vmem:[#allocation16_spill] sm:$0xff]  ;;  %v7818_v8 = vld [vmem:[#allocation41_spill] sm:$0xff] }
 0x2c8   : > { %v4975_v13 = vadd.f32 %v4974_v19, %v4944_v32  ;;  %v4906_v17 = vadd.f32 %v4905_v7, %v4651_v48  ;;  %v4655_v14 = vadd.f32 %v5779_v1, %v4222_v28  ;;  %v4946_v21 = vmul.f32 %v4652_v33, %v4652_v33  ;;  %v7806_v32 = vld [vmem:[#allocation14_spill] sm:$0xff]  ;;  %v7807_v7 = vld [vmem:[#allocation27_spill] sm:$0xff] }
 0x2c9   : > { %v4140_v54 = vpop.f32.mrf.mxu1  ;;  %v4544_v20 = vpop.f32.mrf.mxu0  ;;  %v3364_v19 = vadd.f32 %v7807_v7, %v7806_v32  ;;  %v7817_v5 = vld [vmem:[#allocation34_spill] sm:$0xff] }
 0x2ca   : > { %v4907_v36 = vadd.f32 %v4906_v17, %v4652_v33  ;;  %v4976_v56 = vadd.f32 %v4975_v13, %v4945_v49  ;;  %v4653_v6 = vadd.f32 %v4544_v20, %v4220_v42  ;;  %v5475_v46 = vpack.c.bf16 %v4655_v14, %v4654_v50  ;;  %v7810_v20 = vld [vmem:[#allocation15_spill] sm:$0xff] }
 0x2cb   : > { %v5751_v39 = vpop.f32.mrf.mxu1  ;;  %v5782_v26 = vpop.f32.mrf.mxu0  ;;  %v4949_v15 = vmul.f32 %v4655_v14, %v4655_v14  ;;  %v3797_v47 = vadd.f32 %v7809_v62, %v3364_v19 }
 0x2cc   : > { %v4977_v29 = vadd.f32 %v4976_v56, %v4946_v21  ;;  %v5470_v25 = vpack.c.bf16 %v4653_v6, %v4652_v33  ;;  %v4908_v10 = vadd.f32 %v4907_v36, %v4653_v6  ;;  %v4947_v48 = vmul.f32 %v4653_v6, %v4653_v6  ;;  %5515 = vst [vmem:[%s7583_s11 + $0x48] sm:$0xff] %v5475_v46   ;;  %v7808_v33 = vld [vmem:[#allocation37_spill] sm:$0xff]  ;;  %v7812_v56 = vld [vmem:[#allocation35_spill] sm:$0xff] }
 0x2cd   : > { %v4143_v38 = vpop.f32.mrf.mxu1  ;;  %v4557_v52 = vpop.f32.mrf.mxu0  ;;  %v3794_v43 = vadd.f32 %v7808_v33, %v3361_v22  ;;  %v4658_v24 = vadd.f32 %v5782_v26, %v4225_v30  ;;  %v7811_v36 = vld [vmem:[#allocation29_spill] sm:$0xff]  ;;  %v4229_v6 = vadd.f32 %v5750_v34, %v7812_v56  ;;  %v4230_v37 = vadd.f32 %v5751_v39, %v3797_v47 }
 0x2ce   : > { %5514 = vst [vmem:[%s7583_s11 + $0x40] sm:$0xff] %v5470_v25   ;;  %v4909_v16 = vadd.f32 %v4908_v10, %v4654_v50  ;;  %v4978_v12 = vadd.f32 %v4977_v29, %v4947_v48  ;;  %v4656_v60 = vadd.f32 %v4557_v52, %v4223_v18  ;;  %v3362_v21 = vadd.f32 %v7811_v36, %v7810_v20  ;;  %v7813_v18 = vld [vmem:[#allocation39_spill] sm:$0xff]  ;;  %v7816_v39 = vld [vmem:[#allocation17_spill] sm:$0xff] }
 0x2cf   : > { %v5783_v11 = vpop.f32.mrf.mxu0  ;;  %v5754_v3 = vpop.f32.mrf.mxu1  ;;  %v4227_v49 = vadd.f32 %v4140_v54, %v3794_v43  ;;  %v4952_v40 = vmul.f32 %v4658_v24, %v4658_v24  ;;  %v3365_v34 = vadd.f32 %v7815_v31, %v7814_v58  ;;  %v3368_v52 = vadd.f32 %v7817_v5, %v7816_v39 }
 0x2d0   : > { %v4979_v53 = vadd.f32 %v4978_v12, %v4948_v44  ;;  %v4910_v55 = vadd.f32 %v4909_v16, %v4655_v14  ;;  %v4659_v2 = vadd.f32 %v5783_v11, %v4226_v63  ;;  %v4950_v1 = vmul.f32 %v4656_v60, %v4656_v60 }
 0x2d1   : > { %v4560_v27 = vpop.f32.mrf.mxu0  ;;  %v4156_v51 = vpop.f32.mrf.mxu1  ;;  %v3795_v46 = vadd.f32 %v7813_v18, %v3362_v21  ;;  %v3798_v30 = vadd.f32 %v7818_v8, %v3365_v34 }
 0x2d2   : > { %v4911_v28 = vadd.f32 %v4910_v55, %v4656_v60  ;;  %v4980_v42 = vadd.f32 %v4979_v53, %v4949_v15  ;;  %v4657_v35 = vadd.f32 %v4560_v27, %v4224_v61  ;;  %v5485_v13 = vpack.c.bf16 %v4659_v2, %v4658_v24  ;;  %v7819_v61 = vld [vmem:[#allocation18_spill] sm:$0xff]  ;;  %v7820_v15 = vld [vmem:[#allocation36_spill] sm:$0xff]  ;;  %v7822_v27 = vld [vmem:[#allocation43_spill] sm:$0xff] }
 0x2d3   : > { %v5786_v17 = vpop.f32.mrf.mxu0  ;;  %v4953_v26 = vmul.f32 %v4659_v2, %v4659_v2  ;;  %v4228_v44 = vadd.f32 %v4143_v38, %v3795_v46  ;;  %v5755_v16 = vpop.f32.mrf.mxu1  ;;  %v3366_v53 = vadd.f32 %v7820_v15, %v7819_v61  ;;  %v7821_v55 = vld [vmem:[#allocation42_spill] sm:$0xff]  ;;  %v4231_v19 = vadd.f32 %v4156_v51, %v3798_v30 }
 0x2d4   : > { %v4981_v57 = vadd.f32 %v4980_v42, %v4950_v1  ;;  %v5480_v9 = vpack.c.bf16 %v4657_v35, %v4656_v60  ;;  %v4912_v50 = vadd.f32 %v4911_v28, %v4657_v35  ;;  %v4951_v14 = vmul.f32 %v4657_v35, %v4657_v35  ;;  %5517 = vst [vmem:[%s7583_s11 + $0x58] sm:$0xff] %v5485_v13   ;;  %v7823_v1 = vld [vmem:[#allocation40_spill] sm:$0xff] }
 0x2d5   : > { %v4573_v45 = vpop.f32.mrf.mxu0  ;;  %v4662_v10 = vadd.f32 %v5786_v17, %v4229_v6  ;;  %v3801_v32 = vadd.f32 %v7821_v55, %v3368_v52  ;;  %v4159_v38 = vpop.f32.mrf.mxu1  ;;  %v3799_v28 = vadd.f32 %v7822_v27, %v3366_v53  ;;  %v4233_v42 = vadd.f32 %v5754_v3, %v7823_v1 }
 0x2d6   : > { %5516 = vst [vmem:[%s7583_s11 + $0x50] sm:$0xff] %v5480_v9   ;;  %v4913_v41 = vadd.f32 %v4912_v50, %v4658_v24  ;;  %v4982_v4 = vadd.f32 %v4981_v57, %v4951_v14  ;;  %v4660_v54 = vadd.f32 %v4573_v45, %v4227_v49 }
 0x2d7   : > { %v5787_v29 = vpop.f32.mrf.mxu0  ;;  %v4234_v35 = vadd.f32 %v5755_v16, %v3801_v32  ;;  %v4956_v62 = vmul.f32 %v4662_v10, %v4662_v10  ;;  %v4232_v57 = vadd.f32 %v4159_v38, %v3799_v28 }
 0x2d8   : > { %v4983_v25 = vadd.f32 %v4982_v4, %v4952_v40  ;;  %v4914_v48 = vadd.f32 %v4913_v41, %v4659_v2  ;;  %v4663_v59 = vadd.f32 %v5787_v29, %v4230_v37  ;;  %v4954_v23 = vmul.f32 %v4660_v54, %v4660_v54 }
 0x2d9   : > { %v4576_v12 = vpop.f32.mrf.mxu0 }
 0x2da   : > { %v4915_v60 = vadd.f32 %v4914_v48, %v4660_v54  ;;  %v4984_v0 = vadd.f32 %v4983_v25, %v4953_v26  ;;  %v5495_v22 = vpack.c.bf16 %v4663_v59, %v4662_v10  ;;  %v4661_v63 = vadd.f32 %v4576_v12, %v4228_v44 }
 0x2db   : > { %v5790_v11 = vpop.f32.mrf.mxu0  ;;  %v4957_v14 = vmul.f32 %v4663_v59, %v4663_v59 }
 0x2dc   : > { %v4985_v7 = vadd.f32 %v4984_v0, %v4954_v23  ;;  %5519 = vst [vmem:[%s7583_s11 + $0x68] sm:$0xff] %v5495_v22   ;;  %v5490_v33 = vpack.c.bf16 %v4661_v63, %v4660_v54  ;;  %v4916_v43 = vadd.f32 %v4915_v60, %v4661_v63  ;;  %v4955_v24 = vmul.f32 %v4661_v63, %v4661_v63 }
 0x2dd   : > { %v4589_v2 = vpop.f32.mrf.mxu0  ;;  %v4666_v9 = vadd.f32 %v5790_v11, %v4233_v42 }
 0x2de   : > { %5518 = vst [vmem:[%s7583_s11 + $0x60] sm:$0xff] %v5490_v33   ;;  %v4917_v47 = vadd.f32 %v4916_v43, %v4662_v10  ;;  %v4986_v49 = vadd.f32 %v4985_v7, %v4955_v24  ;;  %v4664_v13 = vadd.f32 %v4589_v2, %v4231_v19 }
 0x2df   : > { %v5791_v17 = vpop.f32.mrf.mxu0  ;;  %v4960_v54 = vmul.f32 %v4666_v9, %v4666_v9 }
 0x2e0   : > { %v4667_v50 = vadd.f32 %v5791_v17, %v4234_v35  ;;  %v4987_v20 = vadd.f32 %v4986_v49, %v4956_v62  ;;  %v4918_v36 = vadd.f32 %v4917_v47, %v4663_v59  ;;  %v4958_v37 = vmul.f32 %v4664_v13, %v4664_v13 }
 0x2e1   : > { %v4592_v21 = vpop.f32.mrf.mxu0 }
 0x2e2   : > { %v5505_v3 = vpack.c.bf16 %v4667_v50, %v4666_v9  ;;  %v4665_v56 = vadd.f32 %v4592_v21, %v4232_v57  ;;  %v4919_v6 = vadd.f32 %v4918_v36, %v4664_v13  ;;  %v4988_v51 = vadd.f32 %v4987_v20, %v4957_v14 }
 0x2e4   : > { %5521 = vst [vmem:[%s7583_s11 + $0x78] sm:$0xff] %v5505_v3   ;;  %v5500_v45 = vpack.c.bf16 %v4665_v56, %v4664_v13  ;;  %v4959_v40 = vmul.f32 %v4665_v56, %v4665_v56  ;;  %v4989_v41 = vadd.f32 %v4988_v51, %v4958_v37  ;;  %v4920_v4 = vadd.f32 %v4919_v6, %v4665_v56 }
 0x2e6   : > { %5520 = vst [vmem:[%s7583_s11 + $0x70] sm:$0xff] %v5500_v45   ;;  %v4921_v18 = vadd.f32 %v4920_v4, %v4666_v9  ;;  %v4990_v46 = vadd.f32 %v4989_v41, %v4959_v40 }
 0x2e7   : > { %5955 = shalt.err (!%p5952_p3)
}
 0x2e8   : > { %s5956_s28 = scalar_lea.hbm %s7677_s25, 2048  ;;  %s5960_s5 = scalar_lea.hbm %s7744_s2, 4096 }
 0x2e9   : > { %p5957_p4 = scmp.ne.s32.totalorder %s7677_s25, %s5956_s28  ;;  %p5961_p9 = scmp.lt.s32.totalorder %s7677_s25, %s7744_s2 }
 0x2ea   : > { %p5962_p10 = scmp.lt.s32.totalorder %s5960_s5, %s5956_s28 }
 0x2eb   : > { %p5958_p7 = pnand %p5957_p4, %p6099_p5 }
 0x2ec   : > { %p5963_p11 = por %p5962_p10, %p5961_p9 }
 0x2ed   : > { %p5959_p8 = pneg %p5958_p7 }
 0x2ef   : > { %p5964_p12 = pnand %p5963_p11, %p5959_p8 }
 0x2f1   : > { %5967 = shalt.err (!%p5964_p12)
}
 0x2f2   : > { %s6039_s17 = smov 64   ;;  %v4961_v26 = vmul.f32 %v4667_v50, %v4667_v50  ;;  %v4922_v29 = vadd.f32 %v4921_v18, %v4667_v50  ;;  %v4991_v25 = vadd.f32 %v4990_v46, %v4960_v54  ;;  %s5131_s20 = sshll.u32 %s7565_s9, 1 }
 0x2f3   : > { %5803 = dma.vmem_to_hbm [thread:$0]  (%p6099_p5), %s7680_s19, 2048, %s7677_s25, %s5001_s26, %s6039_s17, %s6039_s17, %s6035_s30  }
 0x2f4   : > { %v4923_v10 = vrot.slane %v4922_v29, 4  ;;  %v4992_v48 = vadd.f32 %v4991_v25, %v4961_v26  ;;  %s5391_s24 = sshll.u32 %s6082_s16, 5  ;;  %s174_s27 = scalar_lea.vmem [#allocation6], %s5131_s20 }
 0x2f5   : > { %s5035_s6 = sshll.u32 %s174_s27, 4  ;;  %s5033_s25 = scalar_lea.hbm %s7745_s3, %s5391_s24  ;;  %s5036_s6 = int_to_ptr.vmem [resolvable:$true] %s5035_s6 }
 0x2f6   : > { %v4924_v59 = vadd.f32 %v4923_v10, %v4922_v29  ;;  %v4993_v58 = vrot.slane %v4992_v48, 4  ;;  %s5006_s26 = scalar_lea.sflag [#allocation7], %s7565_s9  ;;  %s5968_s7 = scalar_lea.vmem %s5036_s6, 32 }
 0x2f7   : > { %p5969_p13 = scmp.ne.s32.totalorder %s5036_s6, %s5968_s7  ;;  %s6040_s8 = smov [#allocation6]  }
 0x2f8   : > { %v4925_v31 = vrot.slane %v4924_v59, 2  ;;  %v4994_v34 = vadd.f32 %v4993_v58, %v4992_v48  ;;  %s5972_s16 = sshll.u32 %s6040_s8, 4  ;;  %s5973_s16 = int_to_ptr.vmem [resolvable:$false] %s5972_s16 }
 0x2f9   : > { %p5970_p0 = pnand %p5969_p13, %p6099_p5  ;;  %s5974_s28 = scalar_lea.vmem %s5973_s16, 64 }
 0x2fa   : > { %v4926_v39 = vadd.f32 %v4925_v31, %v4924_v59  ;;  %v4995_v5 = vrot.slane %v4994_v34, 2  ;;  %p5975_p2 = scmp.lt.s32.totalorder %s5036_s6, %s5973_s16  ;;  %p5976_p3 = scmp.lt.s32.totalorder %s5974_s28, %s5968_s7 }
 0x2fb   : > { %p5971_p1 = pneg %p5970_p0 }
 0x2fc   : > { %v4927_v52 = vrot.slane %v4926_v39, 1  ;;  %v4996_v44 = vadd.f32 %v4995_v5, %v4994_v34  ;;  %p5977_p4 = por %p5976_p3, %p5975_p2 }
 0x2fe   : > { %v4928_v16 = vadd.f32 %v4927_v52, %v4926_v39  ;;  %v4997_v12 = vrot.slane %v4996_v44, 1  ;;  %p5978_p7 = pnand %p5977_p4, %p5971_p1 }
 0x300   : > { %4929 = vst [vmem:[%s174_s27] sm:$0x1] %v4928_v16  ;;  %v4998_v60 = vadd.f32 %v4997_v12, %v4996_v44 }
 0x302   : > { %4999 = vst [vmem:[%s174_s27 + $0x1] sm:$0x1] %v4998_v60 }
 0x303   : > { %5981 = shalt.err (!%p5978_p7)
}
 0x304   : > { %s5982_s29 = scalar_lea.hbm %s5033_s25, 32  ;;  %s5986_s5 = scalar_lea.hbm %s7745_s3, 64 }
 0x305   : > { %p5983_p8 = scmp.ne.s32.totalorder %s5033_s25, %s5982_s29  ;;  %p5987_p11 = scmp.lt.s32.totalorder %s5033_s25, %s7745_s3 }
 0x306   : > { %p5988_p12 = scmp.lt.s32.totalorder %s5986_s5, %s5982_s29 }
 0x307   : > { %p5984_p9 = pnand %p5983_p8, %p6099_p5 }
 0x308   : > { %p5989_p13 = por %p5988_p12, %p5987_p11 }
 0x309   : > { %p5985_p10 = pneg %p5984_p9 }
 0x30b   : > { %p5990_p0 = pnand %p5989_p13, %p5985_p10 }
 0x30d   : > { %5993 = shalt.err (!%p5990_p0)
}
 0x30e   : > { %5804 = dma.vmem_to_hbm [thread:$0]  (%p6099_p5), %s5036_s6, 32, %s5033_s25, %s5006_s26  }
 0x30f PF: > { %p5814_p1 = scmp.ge.s32.totalorder %s6032_s15, 2  ;;  %s5047_s17 = sand.u32 1, %s6020_s12  }
 0x310   : > { %s5048_s20 = scalar_lea.sflag [#allocation5], %s5047_s17 }
 0x311   : > { %p5808_p2 = pnand %p5814_p1, %p6103_p6 }
 0x313   : > { %p5809_p3 = pneg %p5808_p2 }
 0x315   : > { %6011 = dma.done.wait (%p5809_p3), %s5048_s20, 2048  }
 0x316   : > { %6013 = vsyncadd (%p5809_p3), %s5048_s20, 4294965248  ;;  %s5057_s24 = scalar_lea.sflag [#allocation7], %s5047_s17 }
 0x317   : > { %6015 = dma.done.wait (%p5809_p3), %s5057_s24, 32  }
 0x318   : > { %6017 = vsyncadd (%p5809_p3), %s5057_s24, 4294967264  ;;  %p17_p5 = scmp.ge.s32.totalorder %s6086_s18, 4   ;;  %s7824_s12 = smov %s6024_s13 }
 0x319   : > { %s7825_s13 = smov %s6028_s14  ;;  %s7826_s14 = smov %s6097_s21 }
 0x31a   : > { %s7827_s15 = smov %s6086_s18  ;;  %19 = sbr.rel (!%p17_p5) target bundleno = 5 (0x5), region = 84 }
 0x31f   :  { %5062 = vsyncpa [#allocation5], 1 }
 0x320   :  { %5064 = vsyncpa [#allocation5 + $0x1], 1 }
 0x321   :  { %5065 = vsyncpa [#allocation7], 1 }
 0x322   :  { %5067 = vsyncpa [#allocation7 + $0x1], 1 }

</bundles_post_ra>
